<compile_context>
chip_gen: v7x
topology: tpu7x:2x2x1
jax: 0.10.0
libtpu: 0.0.40
codegen_flags: <defaults>
</compile_context>

<pallas_src>
import functools
import math

import jax
import jax.numpy as jnp
from jax.experimental import pallas as pl
from jax.experimental.pallas import tpu as pltpu


# ------------------------------ Pallas kernel -------------------------------

def _bottleneck_kernel(x_ref, w1_ref, b1_ref, w2_ref, b2_ref, w3_ref, b3_ref,
                       mask_ref, o_ref, h1pad_ref, col_ref, *,
                       W, pad_rows, compute_dtype):
    """Fused Bottleneck forward for one image (downsample=None, eval-mode BN)."""
    HW = x_ref.shape[1]
    planes = w1_ref.shape[1]

    # Zero only the two (small) halo bands of the padded conv1 scratch; the
    # interior is fully rewritten each step.  Re-zeroed every step for
    # megacore safety (each TensorCore owns its own scratch instance).
    halo = jnp.zeros((pad_rows, planes), compute_dtype)
    h1pad_ref[pl.ds(0, pad_rows), :] = halo
    h1pad_ref[pl.ds(pad_rows + HW, pad_rows), :] = halo

    x = x_ref[0]                                              # (HW, Cin)

    # conv1 (1x1) + bn1 (scale folded into w1) + ReLU, stored in compute_dtype.
    h1 = jnp.dot(x, w1_ref[...], preferred_element_type=jnp.float32)
    h1 = jnp.maximum(h1 + b1_ref[...], 0.0).astype(compute_dtype)
    h1pad_ref[pl.ds(pad_rows, HW), :] = h1                    # aligned interior

    # conv2 (3x3, pad=1): build an (HW, 9*planes) im2col slab from statically
    # row-shifted views of the padded scratch (out-of-image rows read the zero
    # halo; flattened-width wrap-around removed by the kw = -1/+1 masks), then
    # run ONE MXU matmul with contraction depth K = 9*planes.
    for kh in range(3):
        for kw in range(3):
            tap = kh * 3 + kw
            if kh == 1 and kw == 1:
                v = h1                                        # centre tap: reuse registers
            else:
                shift = (kh - 1) * W + (kw - 1)               # static offset
                v = h1pad_ref[pl.ds(pad_rows + shift, HW), :]
                if kw != 1:
                    v = v * mask_ref[0 if kw == 0 else 1]     # (HW, 1) width mask
            col_ref[:, pl.ds(tap * planes, planes)] = v
    h2 = jnp.dot(col_ref[...], w2_ref[...], preferred_element_type=jnp.float32)
    h2 = jnp.maximum(h2 + b2_ref[...], 0.0).astype(compute_dtype)

    # conv3 (1x1) + bn3 (folded) + residual + ReLU.
    h3 = jnp.dot(h2, w3_ref[...], preferred_element_type=jnp.float32)
    h3 = h3 + b3_ref[...] + x.astype(jnp.float32)
    o_ref[0] = jnp.maximum(h3, 0.0).astype(o_ref.dtype)


# ------------------------------- JAX wrapper --------------------------------

def _fold_bn(bn, eps=1e-5):
    gamma, beta, mean, var = bn
    scale = gamma / jnp.sqrt(var + eps)
    bias = beta - mean * scale
    return scale, bias


def bottleneck_forward(x_nchw, params, stride=1, compute_dtype=jnp.float32):
    """Fused Pallas implementation of Bottleneck.forward (downsample=None)."""
    N, Cin, H, W = x_nchw.shape
    w1 = params["conv1"]                      # (planes, Cin, 1, 1)
    w2 = params["conv2"]                      # (planes, planes, 3, 3)
    w3 = params["conv3"]                      # (planes*4, planes, 1, 1)
    planes = w1.shape[0]
    cexp = w3.shape[0]
    if stride != 1 or Cin != cexp:
        raise NotImplementedError(
            "fused kernel implements the downsample=None configuration "
            "(stride=1, inplanes == planes * expansion)")

    s1, b1 = _fold_bn(params["bn1"])
    s2, b2 = _fold_bn(params["bn2"])
    s3, b3 = _fold_bn(params["bn3"])

    # Fold BN scales into (K, Cout) matmul weights; biases stay f32.
    w1m = (w1.reshape(planes, Cin).T * s1[None, :]).astype(compute_dtype)
    # w2m row index = tap*planes + ci with tap = kh*3 + kw -> matches the
    # im2col K layout built in-kernel.
    w2m = (jnp.transpose(w2, (2, 3, 1, 0)).reshape(9, planes, planes)
           * s2[None, None, :]).reshape(9 * planes, planes).astype(compute_dtype)
    w3m = (w3.reshape(cexp, planes).T * s3[None, :]).astype(compute_dtype)
    b1 = b1.reshape(1, planes).astype(jnp.float32)
    b2 = b2.reshape(1, planes).astype(jnp.float32)
    b3 = b3.reshape(1, cexp).astype(jnp.float32)

    HW = H * W
    x = jnp.transpose(x_nchw, (0, 2, 3, 1)).reshape(N, HW, Cin).astype(compute_dtype)

    # Width-validity masks for dw = -1 and dw = +1 (zero contributions that
    # would wrap across image-row boundaries in the flattened (H*W) layout).
    col = jnp.arange(HW, dtype=jnp.int32) % W
    masks = jnp.stack([col != 0, col != W - 1], axis=0
                      ).astype(compute_dtype).reshape(2, HW, 1)

    # Sublane-aligned halo (>= W+1 rows; multiple of 16 covers f32 and bf16).
    pad_rows = ((W + 1 + 15) // 16) * 16

    # Size vmem_limit_bytes from the actual per-step footprint (double-buffered
    # blocks + single-buffered scratch) rather than a flat 48 MiB.
    cd = jnp.dtype(compute_dtype).itemsize
    od = jnp.dtype(x_nchw.dtype).itemsize
    footprint = (
        2 * HW * Cin * cd + 2 * HW * cexp * od
        + 2 * (Cin * planes + 9 * planes * planes + planes * cexp) * cd
        + 2 * (2 * planes + cexp) * 4 + 2 * 2 * HW * cd
        + (HW + 2 * pad_rows) * planes * cd + HW * 9 * planes * cd)
    vmem_limit = max(16 << 20, min(int(1.5 * footprint) + (2 << 20), 96 << 20))

    kernel = functools.partial(_bottleneck_kernel, W=W, pad_rows=pad_rows,
                               compute_dtype=compute_dtype)
    out = pl.pallas_call(
        kernel,
        out_shape=jax.ShapeDtypeStruct((N, HW, cexp), x_nchw.dtype),
        grid=(N,),
        in_specs=[
            pl.BlockSpec((1, HW, Cin), lambda n: (n, 0, 0)),          # image
            pl.BlockSpec((Cin, planes), lambda n: (0, 0)),            # w1 (BN folded)
            pl.BlockSpec((1, planes), lambda n: (0, 0)),              # b1
            pl.BlockSpec((9 * planes, planes), lambda n: (0, 0)),     # w2 (tap-major K)
            pl.BlockSpec((1, planes), lambda n: (0, 0)),              # b2
            pl.BlockSpec((planes, cexp), lambda n: (0, 0)),           # w3
            pl.BlockSpec((1, cexp), lambda n: (0, 0)),                # b3
            pl.BlockSpec((2, HW, 1), lambda n: (0, 0, 0)),            # width masks
        ],
        out_specs=pl.BlockSpec((1, HW, cexp), lambda n: (n, 0, 0)),
        scratch_shapes=[
            pltpu.VMEM((HW + 2 * pad_rows, planes), compute_dtype),   # padded conv1 out
            pltpu.VMEM((HW, 9 * planes), compute_dtype),              # im2col slab
        ],
        compiler_params=pltpu.CompilerParams(
            dimension_semantics=("parallel",),
            vmem_limit_bytes=vmem_limit),
    )(x, w1m, b1, w2m, b2, w3m, b3, masks)

    out = out.reshape(N, H, W, cexp)
    return jnp.transpose(out, (0, 3, 1, 2))   # back to NCHW


# -------------------------- deterministic params ----------------------------

def init_params(key, inplanes, planes, expansion=4):
    ks = jax.random.split(key, 15)

    def conv_w(k, cout, cin, kh, kw):
        fan_in = cin * kh * kw
        return jax.random.normal(k, (cout, cin, kh, kw), jnp.float32) / math.sqrt(fan_in)

    def bn_p(kg, kb, km, kv, c):
        gamma = 1.0 + 0.1 * jax.random.normal(kg, (c,), jnp.float32)
        beta = 0.1 * jax.random.normal(kb, (c,), jnp.float32)
        mean = 0.1 * jax.random.normal(km, (c,), jnp.float32)
        var = 1.0 + 0.1 * jnp.abs(jax.random.normal(kv, (c,), jnp.float32))
        return (gamma, beta, mean, var)

    cexp = planes * expansion
    return {
        "conv1": conv_w(ks[0], planes, inplanes, 1, 1),
        "bn1": bn_p(ks[1], ks[2], ks[3], ks[4], planes),
        "conv2": conv_w(ks[5], planes, planes, 3, 3),
        "bn2": bn_p(ks[6], ks[7], ks[8], ks[9], planes),
        "conv3": conv_w(ks[10], cexp, planes, 1, 1),
        "bn3": bn_p(ks[11], ks[12], ks[13], ks[14], cexp),
    }


# -------------------------------- reference ---------------------------------

def bottleneck_reference(x_nchw, params, stride=1, eps=1e-5):
    def conv(x, w, s=1, p=0):
        return jax.lax.conv_general_dilated(
            x, w, (s, s), [(p, p), (p, p)],
            dimension_numbers=("NCHW", "OIHW", "NCHW"))

    def bn(x, bnp):
        g, b, m, v = bnp
        inv = g / jnp.sqrt(v + eps)
        return (x - m[None, :, None, None]) * inv[None, :, None, None] + b[None, :, None, None]

    out = jax.nn.relu(bn(conv(x_nchw, params["conv1"]), params["bn1"]))
    out = jax.nn.relu(bn(conv(out, params["conv2"], stride, 1), params["bn2"]))
    out = bn(conv(out, params["conv3"]), params["bn3"])
    out = out + x_nchw
    return jax.nn.relu(out)


# ---------------------------------- main -------------------------------------

if __name__ == "__main__":
    key = jax.random.PRNGKey(0)
    k_x, k_p = jax.random.split(key)

    # Bottleneck(inplanes=16, planes=4): inplanes == planes * expansion, so
    # downsample=None / stride=1 is the valid configuration of the module.
    inplanes, planes, stride = 16, 4, 1
    N, H, W = 2, 16, 16

    x = jax.random.normal(k_x, (N, inplanes, H, W), jnp.float32)
    params = init_params(k_p, inplanes, planes)

    fwd = jax.jit(bottleneck_forward, static_argnames=("stride", "compute_dtype"))
    ref = bottleneck_reference(x, params, stride=stride)

    # f32 MXU path: tight numerical check against the XLA conv reference.
    out_f32 = jax.block_until_ready(fwd(x, params, stride=stride,
                                        compute_dtype=jnp.float32))
    assert out_f32.shape == ref.shape == (N, planes * 4, H, W)
    err32 = jnp.max(jnp.abs(out_f32 - ref))
    assert jnp.allclose(out_f32, ref, atol=1e-4, rtol=1e-4), (
        f"f32 max abs err = {err32}")

    # bf16 MXU path (recommended fast path on v6e/v7x): looser tolerance.
    out_bf16 = jax.block_until_ready(fwd(x, params, stride=stride,
                                         compute_dtype=jnp.bfloat16))
    errbf = jnp.max(jnp.abs(out_bf16 - ref))
    assert jnp.allclose(out_bf16, ref, atol=1e-1, rtol=1e-1), (
        f"bf16 max abs err = {errbf}")

    print("KERNEL_OK")
</pallas_src>

<mosaic_0001>
module attributes {stable_mosaic.version = 11 : i64} {
  func.func @_bottleneck_kernel(%arg0: i32, %arg1: memref<1x256x16xf32, #tpu.memory_space<vmem>>, %arg2: memref<16x4xf32, #tpu.memory_space<vmem>>, %arg3: memref<1x4xf32, #tpu.memory_space<vmem>>, %arg4: memref<36x4xf32, #tpu.memory_space<vmem>>, %arg5: memref<1x4xf32, #tpu.memory_space<vmem>>, %arg6: memref<4x16xf32, #tpu.memory_space<vmem>>, %arg7: memref<1x16xf32, #tpu.memory_space<vmem>>, %arg8: memref<2x256x1xf32, #tpu.memory_space<vmem>>, %arg9: memref<1x256x16xf32, #tpu.memory_space<vmem>>, %arg10: memref<320x4xf32, #tpu.memory_space<vmem>>, %arg11: memref<256x36xf32, #tpu.memory_space<vmem>>) attributes {dimension_semantics = [#tpu.dimension_semantics<parallel>], iteration_bounds = array<i64: 2>, scalar_prefetch = 0 : i64, scratch_operands = 2 : i64, tpu.core_type = #tpu.core_type<tc>, window_params = [{transform_indices = @transform_0, window_bounds = array<i64: 1, 256, 16>}, {pipeline_mode = #tpu.pipeline_mode<synchronous>, transform_indices = @transform_1, window_bounds = array<i64: 16, 4>}, {pipeline_mode = #tpu.pipeline_mode<synchronous>, transform_indices = @transform_2, window_bounds = array<i64: 1, 4>}, {pipeline_mode = #tpu.pipeline_mode<synchronous>, transform_indices = @transform_3, window_bounds = array<i64: 36, 4>}, {pipeline_mode = #tpu.pipeline_mode<synchronous>, transform_indices = @transform_4, window_bounds = array<i64: 1, 4>}, {pipeline_mode = #tpu.pipeline_mode<synchronous>, transform_indices = @transform_5, window_bounds = array<i64: 4, 16>}, {pipeline_mode = #tpu.pipeline_mode<synchronous>, transform_indices = @transform_6, window_bounds = array<i64: 1, 16>}, {pipeline_mode = #tpu.pipeline_mode<synchronous>, transform_indices = @transform_7, window_bounds = array<i64: 2, 256, 1>}, {transform_indices = @transform_8, window_bounds = array<i64: 1, 256, 16>}]} {
    %cst = arith.constant 0.000000e+00 : f32
    %0 = vector.broadcast %cst : f32 to vector<32x4xf32>
    %c0 = arith.constant 0 : index
    %c0_0 = arith.constant 0 : index
    %1 = vector.load %arg10[%c0, %c0_0] : memref<320x4xf32, #tpu.memory_space<vmem>>, vector<32x4xf32>
    tpu.vector_store %arg10[%c0, %c0_0], %0 {strides = array<i32>} : memref<320x4xf32, #tpu.memory_space<vmem>>, vector<32x4xf32>,
    %c288 = arith.constant 288 : index
    %c0_1 = arith.constant 0 : index
    %2 = vector.load %arg10[%c288, %c0_1] : memref<320x4xf32, #tpu.memory_space<vmem>>, vector<32x4xf32>
    tpu.vector_store %arg10[%c288, %c0_1], %0 {strides = array<i32>} : memref<320x4xf32, #tpu.memory_space<vmem>>, vector<32x4xf32>,
    %c0_2 = arith.constant 0 : index
    %c0_3 = arith.constant 0 : index
    %c0_4 = arith.constant 0 : index
    %3 = vector.load %arg1[%c0_2, %c0_3, %c0_4] : memref<1x256x16xf32, #tpu.memory_space<vmem>>, vector<1x256x16xf32>
    %4 = vector.shape_cast %3 : vector<1x256x16xf32> to vector<256x16xf32>
    %c0_5 = arith.constant 0 : index
    %c0_6 = arith.constant 0 : index
    %5 = vector.load %arg2[%c0_5, %c0_6] : memref<16x4xf32, #tpu.memory_space<vmem>>, vector<16x4xf32>
    %cst_7 = arith.constant dense<0.000000e+00> : vector<256x4xf32>
    %6 = tpu.matmul %4, %5, %cst_7 {dimension_numbers = #tpu.dot_dimension_numbers<[1], [0], [0], [1], [0, 0, 1, 1], [], []>} : vector<256x16xf32>, vector<16x4xf32>, vector<256x4xf32> -> vector<256x4xf32>
    %c0_8 = arith.constant 0 : index
    %c0_9 = arith.constant 0 : index
    %7 = vector.load %arg3[%c0_8, %c0_9] : memref<1x4xf32, #tpu.memory_space<vmem>>, vector<1x4xf32>
    %8 = vector.broadcast %7 : vector<1x4xf32> to vector<256x4xf32>
    %9 = arith.addf %6, %8 : vector<256x4xf32>
    %cst_10 = arith.constant 0.000000e+00 : f32
    %10 = vector.broadcast %cst_10 : f32 to vector<256x4xf32>
    %11 = arith.maximumf %9, %10 : vector<256x4xf32>
    %c32 = arith.constant 32 : index
    %c0_11 = arith.constant 0 : index
    %12 = vector.load %arg10[%c32, %c0_11] : memref<320x4xf32, #tpu.memory_space<vmem>>, vector<256x4xf32>
    tpu.vector_store %arg10[%c32, %c0_11], %11 {strides = array<i32>} : memref<320x4xf32, #tpu.memory_space<vmem>>, vector<256x4xf32>,
    %c15 = arith.constant 15 : index
    %c0_12 = arith.constant 0 : index
    %13 = vector.load %arg10[%c15, %c0_12] : memref<320x4xf32, #tpu.memory_space<vmem>>, vector<256x4xf32>
    %c0_13 = arith.constant 0 : index
    %c0_14 = arith.constant 0 : index
    %c0_15 = arith.constant 0 : index
    %14 = vector.load %arg8[%c0_13, %c0_14, %c0_15] : memref<2x256x1xf32, #tpu.memory_space<vmem>>, vector<1x256x1xf32>
    %15 = vector.shape_cast %14 : vector<1x256x1xf32> to vector<256x1xf32>
    %16 = vector.broadcast %15 : vector<256x1xf32> to vector<256x4xf32>
    %17 = arith.mulf %13, %16 : vector<256x4xf32>
    %c0_16 = arith.constant 0 : index
    %c0_17 = arith.constant 0 : index
    %18 = vector.load %arg11[%c0_16, %c0_17] : memref<256x36xf32, #tpu.memory_space<vmem>>, vector<256x4xf32>
    tpu.vector_store %arg11[%c0_16, %c0_17], %17 {strides = array<i32>} : memref<256x36xf32, #tpu.memory_space<vmem>>, vector<256x4xf32>,
    %c16 = arith.constant 16 : index
    %c0_18 = arith.constant 0 : index
    %19 = vector.load %arg10[%c16, %c0_18] : memref<320x4xf32, #tpu.memory_space<vmem>>, vector<256x4xf32>
    %c0_19 = arith.constant 0 : index
    %c4 = arith.constant 4 : index
    %20 = vector.load %arg11[%c0_19, %c4] : memref<256x36xf32, #tpu.memory_space<vmem>>, vector<256x4xf32>
    tpu.vector_store %arg11[%c0_19, %c4], %19 {strides = array<i32>} : memref<256x36xf32, #tpu.memory_space<vmem>>, vector<256x4xf32>,
    %c17 = arith.constant 17 : index
    %c0_20 = arith.constant 0 : index
    %21 = vector.load %arg10[%c17, %c0_20] : memref<320x4xf32, #tpu.memory_space<vmem>>, vector<256x4xf32>
    %c1 = arith.constant 1 : index
    %c0_21 = arith.constant 0 : index
    %c0_22 = arith.constant 0 : index
    %22 = vector.load %arg8[%c1, %c0_21, %c0_22] : memref<2x256x1xf32, #tpu.memory_space<vmem>>, vector<1x256x1xf32>
    %23 = vector.shape_cast %22 : vector<1x256x1xf32> to vector<256x1xf32>
    %24 = vector.broadcast %23 : vector<256x1xf32> to vector<256x4xf32>
    %25 = arith.mulf %21, %24 : vector<256x4xf32>
    %c0_23 = arith.constant 0 : index
    %c8 = arith.constant 8 : index
    %26 = vector.load %arg11[%c0_23, %c8] : memref<256x36xf32, #tpu.memory_space<vmem>>, vector<256x4xf32>
    tpu.vector_store %arg11[%c0_23, %c8], %25 {strides = array<i32>} : memref<256x36xf32, #tpu.memory_space<vmem>>, vector<256x4xf32>,
    %c31 = arith.constant 31 : index
    %c0_24 = arith.constant 0 : index
    %27 = vector.load %arg10[%c31, %c0_24] : memref<320x4xf32, #tpu.memory_space<vmem>>, vector<256x4xf32>
    %c0_25 = arith.constant 0 : index
    %c0_26 = arith.constant 0 : index
    %c0_27 = arith.constant 0 : index
    %28 = vector.load %arg8[%c0_25, %c0_26, %c0_27] : memref<2x256x1xf32, #tpu.memory_space<vmem>>, vector<1x256x1xf32>
    %29 = vector.shape_cast %28 : vector<1x256x1xf32> to vector<256x1xf32>
    %30 = vector.broadcast %29 : vector<256x1xf32> to vector<256x4xf32>
    %31 = arith.mulf %27, %30 : vector<256x4xf32>
    %c0_28 = arith.constant 0 : index
    %c12 = arith.constant 12 : index
    %32 = vector.load %arg11[%c0_28, %c12] : memref<256x36xf32, #tpu.memory_space<vmem>>, vector<256x4xf32>
    tpu.vector_store %arg11[%c0_28, %c12], %31 {strides = array<i32>} : memref<256x36xf32, #tpu.memory_space<vmem>>, vector<256x4xf32>,
    %c0_29 = arith.constant 0 : index
    %c16_30 = arith.constant 16 : index
    %33 = vector.load %arg11[%c0_29, %c16_30] : memref<256x36xf32, #tpu.memory_space<vmem>>, vector<256x4xf32>
    tpu.vector_store %arg11[%c0_29, %c16_30], %11 {strides = array<i32>} : memref<256x36xf32, #tpu.memory_space<vmem>>, vector<256x4xf32>,
    %c33 = arith.constant 33 : index
    %c0_31 = arith.constant 0 : index
    %34 = vector.load %arg10[%c33, %c0_31] : memref<320x4xf32, #tpu.memory_space<vmem>>, vector<256x4xf32>
    %c1_32 = arith.constant 1 : index
    %c0_33 = arith.constant 0 : index
    %c0_34 = arith.constant 0 : index
    %35 = vector.load %arg8[%c1_32, %c0_33, %c0_34] : memref<2x256x1xf32, #tpu.memory_space<vmem>>, vector<1x256x1xf32>
    %36 = vector.shape_cast %35 : vector<1x256x1xf32> to vector<256x1xf32>
    %37 = vector.broadcast %36 : vector<256x1xf32> to vector<256x4xf32>
    %38 = arith.mulf %34, %37 : vector<256x4xf32>
    %c0_35 = arith.constant 0 : index
    %c20 = arith.constant 20 : index
    %39 = vector.load %arg11[%c0_35, %c20] : memref<256x36xf32, #tpu.memory_space<vmem>>, vector<256x4xf32>
    tpu.vector_store %arg11[%c0_35, %c20], %38 {strides = array<i32>} : memref<256x36xf32, #tpu.memory_space<vmem>>, vector<256x4xf32>,
    %c47 = arith.constant 47 : index
    %c0_36 = arith.constant 0 : index
    %40 = vector.load %arg10[%c47, %c0_36] : memref<320x4xf32, #tpu.memory_space<vmem>>, vector<256x4xf32>
    %c0_37 = arith.constant 0 : index
    %c0_38 = arith.constant 0 : index
    %c0_39 = arith.constant 0 : index
    %41 = vector.load %arg8[%c0_37, %c0_38, %c0_39] : memref<2x256x1xf32, #tpu.memory_space<vmem>>, vector<1x256x1xf32>
    %42 = vector.shape_cast %41 : vector<1x256x1xf32> to vector<256x1xf32>
    %43 = vector.broadcast %42 : vector<256x1xf32> to vector<256x4xf32>
    %44 = arith.mulf %40, %43 : vector<256x4xf32>
    %c0_40 = arith.constant 0 : index
    %c24 = arith.constant 24 : index
    %45 = vector.load %arg11[%c0_40, %c24] : memref<256x36xf32, #tpu.memory_space<vmem>>, vector<256x4xf32>
    tpu.vector_store %arg11[%c0_40, %c24], %44 {strides = array<i32>} : memref<256x36xf32, #tpu.memory_space<vmem>>, vector<256x4xf32>,
    %c48 = arith.constant 48 : index
    %c0_41 = arith.constant 0 : index
    %46 = vector.load %arg10[%c48, %c0_41] : memref<320x4xf32, #tpu.memory_space<vmem>>, vector<256x4xf32>
    %c0_42 = arith.constant 0 : index
    %c28 = arith.constant 28 : index
    %47 = vector.load %arg11[%c0_42, %c28] : memref<256x36xf32, #tpu.memory_space<vmem>>, vector<256x4xf32>
    tpu.vector_store %arg11[%c0_42, %c28], %46 {strides = array<i32>} : memref<256x36xf32, #tpu.memory_space<vmem>>, vector<256x4xf32>,
    %c49 = arith.constant 49 : index
    %c0_43 = arith.constant 0 : index
    %48 = vector.load %arg10[%c49, %c0_43] : memref<320x4xf32, #tpu.memory_space<vmem>>, vector<256x4xf32>
    %c1_44 = arith.constant 1 : index
    %c0_45 = arith.constant 0 : index
    %c0_46 = arith.constant 0 : index
    %49 = vector.load %arg8[%c1_44, %c0_45, %c0_46] : memref<2x256x1xf32, #tpu.memory_space<vmem>>, vector<1x256x1xf32>
    %50 = vector.shape_cast %49 : vector<1x256x1xf32> to vector<256x1xf32>
    %51 = vector.broadcast %50 : vector<256x1xf32> to vector<256x4xf32>
    %52 = arith.mulf %48, %51 : vector<256x4xf32>
    %c0_47 = arith.constant 0 : index
    %c32_48 = arith.constant 32 : index
    %53 = vector.load %arg11[%c0_47, %c32_48] : memref<256x36xf32, #tpu.memory_space<vmem>>, vector<256x4xf32>
    tpu.vector_store %arg11[%c0_47, %c32_48], %52 {strides = array<i32>} : memref<256x36xf32, #tpu.memory_space<vmem>>, vector<256x4xf32>,
    %c0_49 = arith.constant 0 : index
    %c0_50 = arith.constant 0 : index
    %54 = vector.load %arg11[%c0_49, %c0_50] : memref<256x36xf32, #tpu.memory_space<vmem>>, vector<256x36xf32>
    %c0_51 = arith.constant 0 : index
    %c0_52 = arith.constant 0 : index
    %55 = vector.load %arg4[%c0_51, %c0_52] : memref<36x4xf32, #tpu.memory_space<vmem>>, vector<36x4xf32>
    %cst_53 = arith.constant dense<0.000000e+00> : vector<256x4xf32>
    %56 = tpu.matmul %54, %55, %cst_53 {dimension_numbers = #tpu.dot_dimension_numbers<[1], [0], [0], [1], [0, 0, 1, 1], [], []>} : vector<256x36xf32>, vector<36x4xf32>, vector<256x4xf32> -> vector<256x4xf32>
    %c0_54 = arith.constant 0 : index
    %c0_55 = arith.constant 0 : index
    %57 = vector.load %arg5[%c0_54, %c0_55] : memref<1x4xf32, #tpu.memory_space<vmem>>, vector<1x4xf32>
    %58 = vector.broadcast %57 : vector<1x4xf32> to vector<256x4xf32>
    %59 = arith.addf %56, %58 : vector<256x4xf32>
    %cst_56 = arith.constant 0.000000e+00 : f32
    %60 = vector.broadcast %cst_56 : f32 to vector<256x4xf32>
    %61 = arith.maximumf %59, %60 : vector<256x4xf32>
    %c0_57 = arith.constant 0 : index
    %c0_58 = arith.constant 0 : index
    %62 = vector.load %arg6[%c0_57, %c0_58] : memref<4x16xf32, #tpu.memory_space<vmem>>, vector<4x16xf32>
    %cst_59 = arith.constant dense<0.000000e+00> : vector<256x16xf32>
    %63 = tpu.matmul %61, %62, %cst_59 {dimension_numbers = #tpu.dot_dimension_numbers<[1], [0], [0], [1], [0, 0, 1, 1], [], []>} : vector<256x4xf32>, vector<4x16xf32>, vector<256x16xf32> -> vector<256x16xf32>
    %c0_60 = arith.constant 0 : index
    %c0_61 = arith.constant 0 : index
    %64 = vector.load %arg7[%c0_60, %c0_61] : memref<1x16xf32, #tpu.memory_space<vmem>>, vector<1x16xf32>
    %65 = vector.broadcast %64 : vector<1x16xf32> to vector<256x16xf32>
    %66 = arith.addf %63, %65 : vector<256x16xf32>
    %67 = arith.addf %66, %4 : vector<256x16xf32>
    %cst_62 = arith.constant 0.000000e+00 : f32
    %68 = vector.broadcast %cst_62 : f32 to vector<256x16xf32>
    %69 = arith.maximumf %67, %68 : vector<256x16xf32>
    %c0_63 = arith.constant 0 : index
    %c0_64 = arith.constant 0 : index
    %c0_65 = arith.constant 0 : index
    %70 = vector.load %arg9[%c0_63, %c0_64, %c0_65] : memref<1x256x16xf32, #tpu.memory_space<vmem>>, vector<1x256x16xf32>
    %71 = vector.shape_cast %70 : vector<1x256x16xf32> to vector<256x16xf32>
    %72 = vector.shape_cast %69 : vector<256x16xf32> to vector<1x256x16xf32>
    tpu.vector_store %arg9[%c0_63, %c0_64, %c0_65], %72 {strides = array<i32>} : memref<1x256x16xf32, #tpu.memory_space<vmem>>, vector<1x256x16xf32>,
    return
  }
  func.func @transform_0(%arg0: i32) -> (i32, i32, i32) {
    %c0_i32 = arith.constant 0 : i32
    %c0_i32_0 = arith.constant 0 : i32
    %c0_i32_1 = arith.constant 0 : i32
    return %arg0, %c0_i32, %c0_i32_0 : i32, i32, i32
  }
  func.func @transform_1(%arg0: i32) -> (i32, i32) {
    %c0_i32 = arith.constant 0 : i32
    %c0_i32_0 = arith.constant 0 : i32
    %c0_i32_1 = arith.constant 0 : i32
    return %c0_i32, %c0_i32_0 : i32, i32
  }
  func.func @transform_2(%arg0: i32) -> (i32, i32) {
    %c0_i32 = arith.constant 0 : i32
    %c0_i32_0 = arith.constant 0 : i32
    %c0_i32_1 = arith.constant 0 : i32
    return %c0_i32, %c0_i32_0 : i32, i32
  }
  func.func @transform_3(%arg0: i32) -> (i32, i32) {
    %c0_i32 = arith.constant 0 : i32
    %c0_i32_0 = arith.constant 0 : i32
    %c0_i32_1 = arith.constant 0 : i32
    return %c0_i32, %c0_i32_0 : i32, i32
  }
  func.func @transform_4(%arg0: i32) -> (i32, i32) {
    %c0_i32 = arith.constant 0 : i32
    %c0_i32_0 = arith.constant 0 : i32
    %c0_i32_1 = arith.constant 0 : i32
    return %c0_i32, %c0_i32_0 : i32, i32
  }
  func.func @transform_5(%arg0: i32) -> (i32, i32) {
    %c0_i32 = arith.constant 0 : i32
    %c0_i32_0 = arith.constant 0 : i32
    %c0_i32_1 = arith.constant 0 : i32
    return %c0_i32, %c0_i32_0 : i32, i32
  }
  func.func @transform_6(%arg0: i32) -> (i32, i32) {
    %c0_i32 = arith.constant 0 : i32
    %c0_i32_0 = arith.constant 0 : i32
    %c0_i32_1 = arith.constant 0 : i32
    return %c0_i32, %c0_i32_0 : i32, i32
  }
  func.func @transform_7(%arg0: i32) -> (i32, i32, i32) {
    %c0_i32 = arith.constant 0 : i32
    %c0_i32_0 = arith.constant 0 : i32
    %c0_i32_1 = arith.constant 0 : i32
    %c0_i32_2 = arith.constant 0 : i32
    return %c0_i32, %c0_i32_0, %c0_i32_1 : i32, i32, i32
  }
  func.func @transform_8(%arg0: i32) -> (i32, i32, i32) {
    %c0_i32 = arith.constant 0 : i32
    %c0_i32_0 = arith.constant 0 : i32
    %c0_i32_1 = arith.constant 0 : i32
    return %arg0, %c0_i32, %c0_i32_0 : i32, i32, i32
  }
}

</mosaic_0001>

<bundles_post_ra>
// kernel: bottleneck_forward.1
= control target key start
LH: loop header
LB: loop body
LE: loop exit
PB: predicated region body
PF: predicated region fallthrough
CT: control target
= control target key end

     0   :  { %s5152_s27 = smov 0   ;;  %s7398_s0 = inlined_call_operand.vmem [shape: f32[2,256,16], index: 0, kind: input, shape index: {}]   ;;  %s7399_s1 = inlined_call_operand.vmem [shape: f32[16,4], index: 1, kind: input, shape index: {}]   ;;  %s7400_s2 = inlined_call_operand.vmem [shape: f32[1,4], index: 2, kind: input, shape index: {}]   ;;  %s7401_s3 = inlined_call_operand.vmem [shape: f32[36,4], index: 3, kind: input, shape index: {}]   ;;  %s7402_s4 = inlined_call_operand.vmem [shape: f32[1,4], index: 4, kind: input, shape index: {}]   ;;  %s7403_s5 = inlined_call_operand.vmem [shape: f32[4,16], index: 5, kind: input, shape index: {}]   ;;  %s7404_s6 = inlined_call_operand.vmem [shape: f32[1,16], index: 6, kind: input, shape index: {}]   ;;  %s7405_s7 = inlined_call_operand.vmem [shape: f32[2,256,1], index: 7, kind: input, shape index: {}]   ;;  %s7406_s8 = inlined_call_operand.vmem [shape: f32[2,256,16], index: 8, kind: output, shape index: {}]  }
   0x1 LB: > { %s4548_s28 = sadd.s32 4294967295, %s5095_s27   ;;  %p4552_p0 = scmp.ge.s32.totalorder %s5095_s27, 1  ;;  %s5095_s27 = sphi %s5152_s27, %s18_s27  }
   0x2   : > { %p262_p1 = scmp.lt.s32.totalorder %s5095_s27, 3 }
   0x4   : > { %p263_p2 = pnand %p4552_p0, %p262_p1 }
   0x6   : > { %266 = sbr.rel (%p263_p2) target bundleno = 1638 (0x666), region = 52 }
   0xd   : > { %v5163_v0 = vld [vmem:[%s7405_s7 + $0x10] sm:$0xff]  ;;  %v5168_v1 = vld [vmem:[%s7405_s7] sm:$0xff]  ;;  %p296_p3 = scmp.lt.s32.totalorder %s4548_s28, 1  ;;  %v5097_v3 = vmov 0   ;;  %v348_v4 = vld [vmem:[%s7399_s1 + $0x8] sm:$0xff]  ;;  %vm306_vm0 = vcmask 31744  }
   0xe   : > { %v347_v2 = vld [vmem:[%s7399_s1] sm:$0xff]  ;;  %5055 = vset.pattern.permute.xlu1 %v5097_v3  ;;  %5054 = vset.pattern.permute.xlu0 %v5097_v3  ;;  %v5098_v6 = vmov 0.0   ;;  %v5189_v7 = vld [vmem:[%s7405_s7 + $0x18] sm:$0xff]  ;;  %v5194_v8 = vld [vmem:[%s7405_s7 + $0x8] sm:$0xff]  ;;  %vm356_vm1 = vcmask 130048   ;;  %s5099_s25 = smov 4  }
   0xf   : > { %818 = vperm.xlu1 %5055, %v5163_v0   ;;  %808 = vperm.xlu0 %5054, %v5168_v1   ;;  %v5022_v5 = vpack.c.bf16 %v348_v4, %v347_v2  ;;  %s7548_s28 = smov (!%p296_p3, %s4548_s28), 1  ;;  %310 = vst.msk [vmem:[#allocation2 + $0x18] sm:$0xff] %vm306_vm0, %v5098_v6  ;;  %308 = vst.msk [vmem:[#allocation2 + $0x8] sm:$0xff] %vm306_vm0, %v5098_v6  ;;  %v779_v9 = vld [vmem:[%s7405_s7 + $0x28] sm:$0xff]  ;;  %v778_v10 = vld [vmem:[%s7405_s7 + $0x20] sm:$0xff]  ;;  %vm1190_vm2 = vcmask 64544  }
  0x10   : > { %309 = vst.msk [vmem:[#allocation2 + $0x10] sm:$0xff] %vm306_vm0, %v5098_v6  ;;  %311 = vst.msk [vmem:[#allocation2 + $0x120] sm:$0xff] %vm306_vm0, %v5098_v6  ;;  %s4756_s19 = sshll.u32 %s7548_s28, 8  ;;  %v781_v21 = vld [vmem:[%s7405_s7 + $0x38] sm:$0xff]  ;;  %v780_v22 = vld [vmem:[%s7405_s7 + $0x30] sm:$0xff]  ;;  %s5100_s20 = smov 8  }
  0x11   : > { %312 = vst.msk [vmem:[#allocation2 + $0x128] sm:$0xff] %vm306_vm0, %v5098_v6  ;;  %313 = vst.msk [vmem:[#allocation2 + $0x130] sm:$0xff] %vm306_vm0, %v5098_v6  ;;  %5023 = vmatprep.subr.bf16.mxu0 %v5022_v5  ;;  %5034 = vmatprep.subr.bf16.mxu1 %v5022_v5  ;;  %s5202_s22 = scalar_lea.vmem %s7398_s0, %s4756_s19  ;;  %v783_v27 = vld [vmem:[%s7405_s7 + $0x48] sm:$0xff]  ;;  %v782_v28 = vld [vmem:[%s7405_s7 + $0x40] sm:$0xff]  ;;  %vm1608_vm3 = vcmask 97344   ;;  %vm2025_vm4 = vcmask 130144   ;;  %s7260_s16 = scalar_lea.vmem %s7406_s8, %s4756_s19 }
  0x12   : > { %5025 = vmatpush3.bf16.msra.mxu0 %v5022_v5  ;;  %5035 = vmatpush3.bf16.msra.mxu1 %v5022_v5  ;;  %v315_v11 = vld [vmem:[%s5202_s22] sm:$0xff]  ;;  %v316_v13 = vld [vmem:[%s5202_s22 + $0x8] sm:$0xff]  ;;  %v317_v15 = vld [vmem:[%s5202_s22 + $0x10] sm:$0xff]  ;;  %s5102_s29 = smov 16   ;;  %vm2186_vm5 = vcmask 162944   ;;  %s5103_s12 = smov 20  }
  0x13   : > { %823 = vperm.xlu1 %5055, %v5189_v7   ;;  %813 = vperm.xlu0 %5054, %v5194_v8   ;;  %v331_v12 = vld [vmem:[%s5202_s22 + $0x80] sm:$0xff]  ;;  %v332_v14 = vld [vmem:[%s5202_s22 + $0x88] sm:$0xff]  ;;  %v333_v16 = vld [vmem:[%s5202_s22 + $0x90] sm:$0xff]  ;;  %s5104_s13 = smov 24   ;;  %s5105_s14 = smov 28   ;;  %vm3804_vm6 = vcmask 1043456  }
  0x14   : > { %4866 = vmatprep.mubr.msk.f32.mxu0 %vm356_vm1, %v315_v11  ;;  %4890 = vmatprep.mubr.msk.f32.mxu1 %vm356_vm1, %v331_v12  ;;  %v318_v17 = vld [vmem:[%s5202_s22 + $0x18] sm:$0xff]  ;;  %v319_v19 = vld [vmem:[%s5202_s22 + $0x20] sm:$0xff]  ;;  %v320_v23 = vld [vmem:[%s5202_s22 + $0x28] sm:$0xff]  ;;  %s5106_s15 = smov 32   ;;  %vm2603_vm7 = vcmask 195744   ;;  %vm3020_vm8 = vcmask 228544  }
  0x15   : > { %4867 = vmatmul.mubr.msk.f32.vlgmr.msra.gmra.mrb[0].mxu0 %vm356_vm1, %v316_v13  ;;  %4891 = vmatmul.mubr.msk.f32.vlgmr.msra.gmra.mrb[0].mxu1 %vm356_vm1, %v332_v14  ;;  %v334_v18 = vld [vmem:[%s5202_s22 + $0x98] sm:$0xff]  ;;  %v335_v20 = vld [vmem:[%s5202_s22 + $0xa0] sm:$0xff]  ;;  %v336_v24 = vld [vmem:[%s5202_s22 + $0xa8] sm:$0xff]  ;;  %vm3213_vm9 = vcmask 261344   ;;  %vm3630_vm10 = vcmask 294144   ;;  %vm3707_vm11 = vcmask 293888  }
  0x16   : > { %4869 = vmatprep.mubr.msk.f32.mxu0 %vm356_vm1, %v317_v15  ;;  %4893 = vmatprep.mubr.msk.f32.mxu1 %vm356_vm1, %v333_v16  ;;  %v321_v25 = vld [vmem:[%s5202_s22 + $0x30] sm:$0xff]  ;;  %v322_v29 = vld [vmem:[%s5202_s22 + $0x38] sm:$0xff]  ;;  %v323_v31 = vld [vmem:[%s5202_s22 + $0x40] sm:$0xff] }
  0x17   : > { %833 = vperm.xlu1 %5055, %v779_v9   ;;  %828 = vperm.xlu0 %5054, %v778_v10   ;;  %v337_v26 = vld [vmem:[%s5202_s22 + $0xb0] sm:$0xff]  ;;  %v338_v30 = vld [vmem:[%s5202_s22 + $0xb8] sm:$0xff]  ;;  %v339_v32 = vld [vmem:[%s5202_s22 + $0xc0] sm:$0xff] }
  0x18   : > { %v785_v33 = vld [vmem:[%s7405_s7 + $0x58] sm:$0xff]  ;;  %v784_v34 = vld [vmem:[%s7405_s7 + $0x50] sm:$0xff]  ;;  %v324_v35 = vld [vmem:[%s5202_s22 + $0x48] sm:$0xff] }
  0x19   : > { %4870 = vmatmul.mubr.msk.f32.gmra.mrb[2].mxu0 %vm356_vm1, %v318_v17  ;;  %4894 = vmatmul.mubr.msk.f32.gmra.mrb[2].mxu1 %vm356_vm1, %v334_v18  ;;  %v340_v36 = vld [vmem:[%s5202_s22 + $0xc8] sm:$0xff]  ;;  %v325_v37 = vld [vmem:[%s5202_s22 + $0x50] sm:$0xff]  ;;  %v786_v40 = vld [vmem:[%s7405_s7 + $0x60] sm:$0xff] }
  0x1a   : > { %4872 = vmatprep.mubr.msk.f32.mxu0 %vm356_vm1, %v319_v19  ;;  %4896 = vmatprep.mubr.msk.f32.mxu1 %vm356_vm1, %v335_v20  ;;  %v341_v38 = vld [vmem:[%s5202_s22 + $0xd0] sm:$0xff]  ;;  %v787_v39 = vld [vmem:[%s7405_s7 + $0x68] sm:$0xff]  ;;  %v326_v41 = vld [vmem:[%s5202_s22 + $0x58] sm:$0xff] }
  0x1b   : > { %843 = vperm.xlu1 %5055, %v781_v21   ;;  %838 = vperm.xlu0 %5054, %v780_v22   ;;  %v342_v42 = vld [vmem:[%s5202_s22 + $0xd8] sm:$0xff]  ;;  %v327_v43 = vld [vmem:[%s5202_s22 + $0x60] sm:$0xff]  ;;  %v788_v46 = vld [vmem:[%s7405_s7 + $0x70] sm:$0xff] }
  0x1c   : > { %v343_v44 = vld [vmem:[%s5202_s22 + $0xe0] sm:$0xff]  ;;  %v789_v45 = vld [vmem:[%s7405_s7 + $0x78] sm:$0xff]  ;;  %v328_v47 = vld [vmem:[%s5202_s22 + $0x68] sm:$0xff] }
  0x1d   : > { %4873 = vmatmul.mubr.msk.f32.gmra.mrb[4].mxu0 %vm356_vm1, %v320_v23  ;;  %4897 = vmatmul.mubr.msk.f32.gmra.mrb[4].mxu1 %vm356_vm1, %v336_v24  ;;  %v344_v48 = vld [vmem:[%s5202_s22 + $0xe8] sm:$0xff]  ;;  %v329_v49 = vld [vmem:[%s5202_s22 + $0x70] sm:$0xff]  ;;  %v790_v52 = vld [vmem:[%s7405_s7 + $0x80] sm:$0xff] }
  0x1e   : > { %4875 = vmatprep.mubr.msk.f32.mxu0 %vm356_vm1, %v321_v25  ;;  %4899 = vmatprep.mubr.msk.f32.mxu1 %vm356_vm1, %v337_v26  ;;  %v345_v50 = vld [vmem:[%s5202_s22 + $0xf0] sm:$0xff]  ;;  %v791_v51 = vld [vmem:[%s7405_s7 + $0x88] sm:$0xff]  ;;  %v330_v53 = vld [vmem:[%s5202_s22 + $0x78] sm:$0xff] }
  0x1f   : > { %853 = vperm.xlu1 %5055, %v783_v27   ;;  %848 = vperm.xlu0 %5054, %v782_v28   ;;  %v346_v54 = vld [vmem:[%s5202_s22 + $0xf8] sm:$0xff]  ;;  %v792_v56 = vld [vmem:[%s7405_s7 + $0x90] sm:$0xff]  ;;  %v795_v57 = vld [vmem:[%s7405_s7 + $0xa8] sm:$0xff] }
  0x20   : > { %v793_v55 = vld [vmem:[%s7405_s7 + $0x98] sm:$0xff]  ;;  %v794_v58 = vld [vmem:[%s7405_s7 + $0xa0] sm:$0xff]  ;;  %v796_v60 = vld [vmem:[%s7405_s7 + $0xb0] sm:$0xff] }
  0x21   : > { %4876 = vmatmul.mubr.msk.f32.gmra.mrb[6].mxu0 %vm356_vm1, %v322_v29  ;;  %4900 = vmatmul.mubr.msk.f32.gmra.mrb[6].mxu1 %vm356_vm1, %v338_v30  ;;  %v797_v59 = vld [vmem:[%s7405_s7 + $0xb8] sm:$0xff]  ;;  %v799_v61 = vld [vmem:[%s7405_s7 + $0xc8] sm:$0xff]  ;;  %v798_v62 = vld [vmem:[%s7405_s7 + $0xc0] sm:$0xff] }
  0x22   : > { %4878 = vmatprep.mubr.msk.f32.mxu0 %vm356_vm1, %v323_v31  ;;  %4902 = vmatprep.mubr.msk.f32.mxu1 %vm356_vm1, %v339_v32  ;;  %v801_v63 = vld [vmem:[%s7405_s7 + $0xd8] sm:$0xff]  ;;  %v800_v2 = vld [vmem:[%s7405_s7 + $0xd0] sm:$0xff]  ;;  %v803_v3 = vld [vmem:[%s7405_s7 + $0xe8] sm:$0xff] }
  0x23   : > { %863 = vperm.xlu1 %5055, %v785_v33   ;;  %858 = vperm.xlu0 %5054, %v784_v34   ;;  %v802_v4 = vld [vmem:[%s7405_s7 + $0xe0] sm:$0xff]  ;;  %v805_v5 = vld [vmem:[%s7405_s7 + $0xf8] sm:$0xff]  ;;  %v804_v6 = vld [vmem:[%s7405_s7 + $0xf0] sm:$0xff] }
  0x24   : > { %v1031_v9 = vld [vmem:[#allocation2 + $0x18] sm:$0xff]  ;;  %v1030_v10 = vld [vmem:[#allocation2 + $0x10] sm:$0xff]  ;;  %v4591_v11 = vld [vmem:[%s7405_s7 + $0x108] sm:$0xff] }
  0x25   : > { %4879 = vmatmul.mubr.msk.f32.gmra.mrb[8].mxu0 %vm356_vm1, %v324_v35  ;;  %4903 = vmatmul.mubr.msk.f32.gmra.mrb[8].mxu1 %vm356_vm1, %v340_v36  ;;  %v4590_v12 = vld [vmem:[%s7405_s7 + $0x100] sm:$0xff]  ;;  %v4593_v13 = vld [vmem:[%s7405_s7 + $0x118] sm:$0xff]  ;;  %v4592_v14 = vld [vmem:[%s7405_s7 + $0x110] sm:$0xff] }
  0x26   : > { %4881 = vmatprep.mubr.msk.f32.mxu0 %vm356_vm1, %v325_v37  ;;  %4905 = vmatprep.mubr.msk.f32.mxu1 %vm356_vm1, %v341_v38  ;;  %v4595_v15 = vld [vmem:[%s7405_s7 + $0x128] sm:$0xff]  ;;  %v4594_v16 = vld [vmem:[%s7405_s7 + $0x120] sm:$0xff]  ;;  %v4597_v17 = vld [vmem:[%s7405_s7 + $0x138] sm:$0xff] }
  0x27   : > { %873 = vperm.xlu1 %5055, %v787_v39   ;;  %868 = vperm.xlu0 %5054, %v786_v40   ;;  %v4596_v18 = vld [vmem:[%s7405_s7 + $0x130] sm:$0xff]  ;;  %v4599_v19 = vld [vmem:[%s7405_s7 + $0x148] sm:$0xff]  ;;  %v4598_v20 = vld [vmem:[%s7405_s7 + $0x140] sm:$0xff] }
  0x28   : > { %v4601_v21 = vld [vmem:[%s7405_s7 + $0x158] sm:$0xff]  ;;  %v4600_v22 = vld [vmem:[%s7405_s7 + $0x150] sm:$0xff]  ;;  %v4603_v23 = vld [vmem:[%s7405_s7 + $0x168] sm:$0xff] }
  0x29   : > { %4882 = vmatmul.mubr.msk.f32.gmra.mrb[10].mxu0 %vm356_vm1, %v326_v41  ;;  %4906 = vmatmul.mubr.msk.f32.gmra.mrb[10].mxu1 %vm356_vm1, %v342_v42  ;;  %v4602_v24 = vld [vmem:[%s7405_s7 + $0x160] sm:$0xff]  ;;  %v4605_v25 = vld [vmem:[%s7405_s7 + $0x178] sm:$0xff]  ;;  %v4604_v26 = vld [vmem:[%s7405_s7 + $0x170] sm:$0xff] }
  0x2a   : > { %4884 = vmatprep.mubr.msk.f32.mxu0 %vm356_vm1, %v327_v43  ;;  %4908 = vmatprep.mubr.msk.f32.mxu1 %vm356_vm1, %v343_v44  ;;  %v4607_v27 = vld [vmem:[%s7405_s7 + $0x188] sm:$0xff]  ;;  %v4606_v28 = vld [vmem:[%s7405_s7 + $0x180] sm:$0xff]  ;;  %v4609_v29 = vld [vmem:[%s7405_s7 + $0x198] sm:$0xff] }
  0x2b   : > { %883 = vperm.xlu1 %5055, %v789_v45   ;;  %878 = vperm.xlu0 %5054, %v788_v46   ;;  %v4608_v30 = vld [vmem:[%s7405_s7 + $0x190] sm:$0xff]  ;;  %v4611_v31 = vld [vmem:[%s7405_s7 + $0x1a8] sm:$0xff]  ;;  %v4610_v32 = vld [vmem:[%s7405_s7 + $0x1a0] sm:$0xff] }
  0x2c   : > { %v4613_v33 = vld [vmem:[%s7405_s7 + $0x1b8] sm:$0xff]  ;;  %v4612_v34 = vld [vmem:[%s7405_s7 + $0x1b0] sm:$0xff]  ;;  %v4615_v35 = vld [vmem:[%s7405_s7 + $0x1c8] sm:$0xff] }
  0x2d   : > { %4885 = vmatmul.mubr.msk.f32.gmra.mrb[12].mxu0 %vm356_vm1, %v328_v47  ;;  %4909 = vmatmul.mubr.msk.f32.gmra.mrb[12].mxu1 %vm356_vm1, %v344_v48  ;;  %v4614_v36 = vld [vmem:[%s7405_s7 + $0x1c0] sm:$0xff]  ;;  %v4617_v37 = vld [vmem:[%s7405_s7 + $0x1d8] sm:$0xff]  ;;  %v4616_v38 = vld [vmem:[%s7405_s7 + $0x1d0] sm:$0xff] }
  0x2e   : > { %4887 = vmatprep.mubr.msk.f32.mxu0 %vm356_vm1, %v329_v49  ;;  %4911 = vmatprep.mubr.msk.f32.mxu1 %vm356_vm1, %v345_v50  ;;  %v4619_v39 = vld [vmem:[%s7405_s7 + $0x1e8] sm:$0xff]  ;;  %v4618_v40 = vld [vmem:[%s7405_s7 + $0x1e0] sm:$0xff]  ;;  %v4621_v42 = vld [vmem:[%s7405_s7 + $0x1f8] sm:$0xff] }
  0x2f   : > { %893 = vperm.xlu1 %5055, %v791_v51   ;;  %888 = vperm.xlu0 %5054, %v790_v52   ;;  %v742_v41 = vld [vmem:[#allocation2 + $0xf] sm:$0xff]  ;;  %v743_v47 = vld [vmem:[#allocation2 + $0x17] sm:$0xff] }
  0x30   : > { %v4620_v43 = vld [vmem:[%s7405_s7 + $0x1f0] sm:$0xff] }
  0x31   : > { %4888 = vmatmul.mubr.msk.f32.gmra.mrb[14].mxu0 %vm356_vm1, %v330_v53  ;;  %4912 = vmatmul.mubr.msk.f32.gmra.mrb[14].mxu1 %vm356_vm1, %v346_v54 }
  0x33   : > { %903 = vperm.xlu1 %5055, %v793_v55   ;;  %898 = vperm.xlu0 %5054, %v792_v56  }
  0x37   : > { %913 = vperm.xlu1 %5055, %v795_v57   ;;  %908 = vperm.xlu0 %5054, %v794_v58  }
  0x3b   : > { %923 = vperm.xlu1 %5055, %v797_v59   ;;  %918 = vperm.xlu0 %5054, %v796_v60  }
  0x3f   : > { %933 = vperm.xlu1 %5055, %v799_v61   ;;  %928 = vperm.xlu0 %5054, %v798_v62  }
  0x43   : > { %943 = vperm.xlu1 %5055, %v801_v63   ;;  %938 = vperm.xlu0 %5054, %v800_v2  }
  0x47   : > { %953 = vperm.xlu1 %5055, %v803_v3   ;;  %948 = vperm.xlu0 %5054, %v802_v4  }
  0x4b   : > { %963 = vperm.xlu1 %5055, %v805_v5   ;;  %958 = vperm.xlu0 %5054, %v804_v6  }
  0x4f   : > { %1096 = vrot.lane.b32.xlu1 %v1031_v9, %s5099_s25  ;;  %1094 = vrot.lane.b32.xlu0 %v1030_v10, %s5099_s25 }
  0x53   : > { %1295 = vperm.xlu1 %5055, %v4591_v11   ;;  %1290 = vperm.xlu0 %5054, %v4590_v12  }
  0x57   : > { %1305 = vperm.xlu1 %5055, %v4593_v13   ;;  %1300 = vperm.xlu0 %5054, %v4592_v14  }
  0x5b   : > { %1315 = vperm.xlu1 %5055, %v4595_v15   ;;  %1310 = vperm.xlu0 %5054, %v4594_v16  }
  0x5f   : > { %1325 = vperm.xlu1 %5055, %v4597_v17   ;;  %1320 = vperm.xlu0 %5054, %v4596_v18  }
  0x63   : > { %1335 = vperm.xlu1 %5055, %v4599_v19   ;;  %1330 = vperm.xlu0 %5054, %v4598_v20   ;;  %v1223_v19 = vld [vmem:[#allocation2 + $0x11] sm:$0xff] }
  0x67   : > { %1345 = vperm.xlu1 %5055, %v4601_v21   ;;  %1340 = vperm.xlu0 %5054, %v4600_v22  }
  0x6b   : > { %1355 = vperm.xlu1 %5055, %v4603_v23   ;;  %1350 = vperm.xlu0 %5054, %v4602_v24  }
  0x6f   : > { %1365 = vperm.xlu1 %5055, %v4605_v25   ;;  %1360 = vperm.xlu0 %5054, %v4604_v26  }
  0x73   : > { %1375 = vperm.xlu1 %5055, %v4607_v27   ;;  %1370 = vperm.xlu0 %5054, %v4606_v28  }
  0x77   : > { %1385 = vperm.xlu1 %5055, %v4609_v29   ;;  %1380 = vperm.xlu0 %5054, %v4608_v30  }
  0x7b   : > { %1395 = vperm.xlu1 %5055, %v4611_v31   ;;  %1390 = vperm.xlu0 %5054, %v4610_v32  }
  0x7f   : > { %1405 = vperm.xlu1 %5055, %v4613_v33   ;;  %1400 = vperm.xlu0 %5054, %v4612_v34  }
  0x83   : > { %1415 = vperm.xlu1 %5055, %v4615_v35   ;;  %1410 = vperm.xlu0 %5054, %v4614_v36  }
  0x87   : > { %1425 = vperm.xlu1 %5055, %v4617_v37   ;;  %1420 = vperm.xlu0 %5054, %v4616_v38  }
  0x8b   : > { %1435 = vperm.xlu1 %5055, %v4619_v39   ;;  %1430 = vperm.xlu0 %5054, %v4618_v40  }
  0x8e   : > { %v5452_v44 = vpop.permute.xlu1 %818  ;;  %v809_v45 = vpop.permute.xlu0 %808 }
  0x8f   : > { %v966_v46 = vmul.f32 %v809_v45, %v742_v41  ;;  %1445 = vperm.xlu1 %5055, %v4621_v42   ;;  %1440 = vperm.xlu0 %5054, %v4620_v43  }
  0x91   : > { %998 = vst.msk [vmem:[#allocation3] sm:$0xff] %vm306_vm0, %v966_v46 }
  0x92   : > { %v5455_v48 = vpop.permute.xlu1 %823  ;;  %v814_v49 = vpop.permute.xlu0 %813 }
  0x93   : > { %v967_v50 = vmul.f32 %v814_v49, %v743_v47  ;;  %1712 = vperm.xlu1 %5055, %v5194_v8  }
  0x95   : > { %999 = vst.msk [vmem:[#allocation3 + $0x8] sm:$0xff] %vm306_vm0, %v967_v50 }
  0x96   : > { %v5459_v51 = vpop.permute.xlu1 %833  ;;  %v5461_v52 = vpop.permute.xlu0 %828 }
  0x97   : > { %1722 = vperm.xlu1 %5055, %v5189_v7  }
  0x9a   : > { %v5464_v53 = vpop.permute.xlu1 %843  ;;  %v5466_v54 = vpop.permute.xlu0 %838 }
  0x9e   : > { %v5468_v55 = vpop.permute.xlu1 %853  ;;  %v5470_v56 = vpop.permute.xlu0 %848 }
  0xa2   : > { %v5472_v57 = vpop.permute.xlu1 %863  ;;  %v5474_v58 = vpop.permute.xlu0 %858 }
  0xa6   : > { %v5476_v8 = vpop.permute.xlu1 %873  ;;  %v5478_v59 = vpop.permute.xlu0 %868 }
  0xaa   : > { %v5480_v60 = vpop.permute.xlu1 %883  ;;  %v5482_v61 = vpop.permute.xlu0 %878 }
  0xae   : > { %v5484_v7 = vpop.permute.xlu1 %893  ;;  %v5486_v62 = vpop.permute.xlu0 %888 }
  0xb2   : > { %v5488_v63 = vpop.permute.xlu1 %903  ;;  %v5490_v2 = vpop.permute.xlu0 %898 }
  0xb6   : > { %v5492_v3 = vpop.permute.xlu1 %913  ;;  %v5494_v4 = vpop.permute.xlu0 %908 }
  0xba   : > { %v5496_v5 = vpop.permute.xlu1 %923  ;;  %v5498_v6 = vpop.permute.xlu0 %918 }
  0xbe   : > { %v5500_v9 = vpop.permute.xlu1 %933  ;;  %v5502_v10 = vpop.permute.xlu0 %928 }
  0xc2   : > { %v5504_v11 = vpop.permute.xlu1 %943  ;;  %v5506_v12 = vpop.permute.xlu0 %938 }
  0xc6   : > { %v5508_v13 = vpop.permute.xlu1 %953  ;;  %v5510_v14 = vpop.permute.xlu0 %948 }
  0xca   : > { %v5512_v15 = vpop.permute.xlu1 %963  ;;  %v5514_v16 = vpop.permute.xlu0 %958 }
  0xce   : > { %v1097_v17 = vpop.permute.xlu1 %1096  ;;  %v1095_v18 = vpop.permute.xlu0 %1094 }
  0xcf   : > { %1192 = vst.msk [vmem:[#allocation3 + $0x8] sm:$0xff] %vm1190_vm2, %v1097_v17  ;;  %1191 = vst.msk [vmem:[#allocation3] sm:$0xff] %vm1190_vm2, %v1095_v18 }
  0xd2   : > { %v5518_v20 = vpop.permute.xlu1 %1295  ;;  %v1291_v21 = vpop.permute.xlu0 %1290 }
  0xd3   : > { %v1448_v22 = vmul.f32 %v1291_v21, %v1223_v19 }
  0xd5   : > { %1512 = vrot.lane.b32.xlu0 %v1448_v22, %s5100_s20 }
  0xd6   : > { %v5521_v23 = vpop.permute.xlu1 %1305  ;;  %v5523_v24 = vpop.permute.xlu0 %1300 }
  0xd9   : > { %1707 = vperm.xlu0 %5054, %v5168_v1   ;;  %v5544_v1 = vld [vmem:[%s7400_s2] ss:$0 sm:$0xff] }
  0xda   : > { %v5526_v25 = vpop.permute.xlu1 %1315  ;;  %v5528_v26 = vpop.permute.xlu0 %1310 }
  0xdd   : > { %1717 = vperm.xlu0 %5054, %v5163_v0  }
  0xde   : > { %v5531_v27 = vpop.permute.xlu0 %1320  ;;  %v5533_v28 = vpop.permute.xlu1 %1325 }
  0xe2   : > { %v5535_v29 = vpop.permute.xlu0 %1330  ;;  %v5537_v30 = vpop.permute.xlu1 %1335 }
  0xe6   : > { %v5539_v31 = vpop.permute.xlu0 %1340  ;;  %v5560_v40 = vpop.permute.xlu1 %1345 }
  0xe8   : > { %v4868_v32 = vpop.f32.mrb[0].mxu0  ;;  %v4892_v33 = vpop.f32.mrb[0].mxu1 }
  0xe9   : > { %v5547_v34 = vadd.f32 %v4868_v32, %v5544_v1  ;;  %v5550_v0 = vadd.f32 %v4892_v33, %v5544_v1  ;;  %v519_v35 = vpop.f32.mrb[1].mxu0  ;;  %v599_v36 = vpop.f32.mrb[1].mxu1 }
  0xea   : > { %v5553_v37 = vadd.f32 %v5544_v1, %v519_v35  ;;  %v5556_v38 = vadd.f32 %v5544_v1, %v599_v36  ;;  %v5558_v39 = vpop.permute.xlu0 %1350 }
  0xeb   : > { %7453 = vst [vmem:[#allocation4_spill] sm:$0xff] %v5547_v34  ;;  %7454 = vst [vmem:[#allocation5_spill] sm:$0xff] %v5550_v0  ;;  %v7411_v41 = vmax.f32 %v5547_v34, 0.0  ;;  %v7407_v42 = vmax.f32 %v5550_v0, 0.0 }
  0xec   : > { %7455 = vst [vmem:[#allocation6_spill] sm:$0xff] %v5553_v37  ;;  %7456 = vst [vmem:[#allocation7_spill] sm:$0xff] %v5556_v38  ;;  %v7412_v43 = vmax.f32 %v5553_v37, 0.0  ;;  %v7408_v45 = vmax.f32 %v5556_v38, 0.0  ;;  %v4871_v46 = vpop.f32.mrb[2].mxu0  ;;  %v4895_v47 = vpop.f32.mrb[2].mxu1 }
  0xed   : > { %711 = vst.msk [vmem:[#allocation2 + $0x28] sm:$0xff] %vm306_vm0, %v7411_v41  ;;  %727 = vst.msk [vmem:[#allocation2 + $0xa8] sm:$0xff] %vm306_vm0, %v7407_v42  ;;  %v5573_v49 = vadd.f32 %v4871_v46, %v5544_v1  ;;  %v5576_v50 = vadd.f32 %v4895_v47, %v5544_v1  ;;  %v529_v17 = vpop.f32.mrb[3].mxu0  ;;  %v609_v18 = vpop.f32.mrb[3].mxu1 }
  0xee   : > { %710 = vst.msk [vmem:[#allocation2 + $0x20] sm:$0xff] %vm306_vm0, %v7412_v43  ;;  %726 = vst.msk [vmem:[#allocation2 + $0xa0] sm:$0xff] %vm306_vm0, %v7408_v45  ;;  %v5585_v19 = vadd.f32 %v5544_v1, %v529_v17  ;;  %v5588_v21 = vadd.f32 %v5544_v1, %v609_v18  ;;  %v5590_v22 = vpop.permute.xlu0 %1360 }
  0xef   : > { %7457 = vst [vmem:[#allocation8_spill] sm:$0xff] %v5573_v49  ;;  %7458 = vst [vmem:[#allocation9_spill] sm:$0xff] %v5576_v50  ;;  %v7409_v32 = vmax.f32 %v5573_v49, 0.0  ;;  %v7410_v33 = vmax.f32 %v5576_v50, 0.0 }
  0xf0   : > { %7459 = vst [vmem:[#allocation10_spill] sm:$0xff] %v5585_v19  ;;  %7460 = vst [vmem:[#allocation11_spill] sm:$0xff] %v5588_v21  ;;  %v7413_v35 = vmax.f32 %v5585_v19, 0.0  ;;  %v7416_v36 = vmax.f32 %v5588_v21, 0.0  ;;  %v4874_v46 = vpop.f32.mrb[4].mxu0  ;;  %v4898_v47 = vpop.f32.mrb[4].mxu1 }
  0xf1   : > { %7461 = vst [vmem:[#allocation12_spill] sm:$0xff] %v5590_v22  ;;  %713 = vst.msk [vmem:[#allocation2 + $0x38] sm:$0xff] %vm306_vm0, %v7409_v32  ;;  %v5603_v17 = vadd.f32 %v4874_v46, %v5544_v1  ;;  %v5606_v18 = vadd.f32 %v4898_v47, %v5544_v1  ;;  %v539_v42 = vpop.f32.mrb[5].mxu0  ;;  %v619_v45 = vpop.f32.mrb[5].mxu1 }
  0xf2   : > { %729 = vst.msk [vmem:[#allocation2 + $0xb8] sm:$0xff] %vm306_vm0, %v7410_v33  ;;  %712 = vst.msk [vmem:[#allocation2 + $0x30] sm:$0xff] %vm306_vm0, %v7413_v35  ;;  %v5615_v32 = vadd.f32 %v5544_v1, %v539_v42  ;;  %v5618_v33 = vadd.f32 %v5544_v1, %v619_v45  ;;  %v5620_v46 = vpop.permute.xlu1 %1355  ;;  %v5624_v43 = vpop.permute.xlu0 %1370 }
  0xf3   : > { %7462 = vst [vmem:[#allocation13_spill] sm:$0xff] %v5603_v17  ;;  %7463 = vst [vmem:[#allocation14_spill] sm:$0xff] %v5606_v18  ;;  %v7420_v47 = vmax.f32 %v5603_v17, 0.0  ;;  %v7421_v41 = vmax.f32 %v5606_v18, 0.0 }
  0xf4   : > { %728 = vst.msk [vmem:[#allocation2 + $0xb0] sm:$0xff] %vm306_vm0, %v7416_v36  ;;  %7464 = vst [vmem:[#allocation15_spill] sm:$0xff] %v5615_v32  ;;  %v4877_v21 = vpop.f32.mrb[6].mxu0  ;;  %v4901_v36 = vpop.f32.mrb[6].mxu1  ;;  %v1033_v0 = vld [vmem:[#allocation2 + $0x28] sm:$0xff]  ;;  %v7468_v49 = vmax.f32 %v5615_v32, 0.0 }
  0xf5   : > { %7465 = vst [vmem:[#allocation16_spill] sm:$0xff] %v5618_v33  ;;  %7466 = vst [vmem:[#allocation17_spill] sm:$0xff] %v5624_v43  ;;  %v5635_v42 = vadd.f32 %v4877_v21, %v5544_v1  ;;  %v5638_v45 = vadd.f32 %v4901_v36, %v5544_v1  ;;  %v629_v35 = vpop.f32.mrb[7].mxu1  ;;  %1100 = vrot.lane.b32.xlu1 %v1033_v0, %s5099_s25  ;;  %v549_v50 = vpop.f32.mrb[7].mxu0  ;;  %v1032_v38 = vld [vmem:[#allocation2 + $0x20] sm:$0xff]  ;;  %v1049_v36 = vld [vmem:[#allocation2 + $0xa8] sm:$0xff] }
  0xf6   : > { %715 = vst.msk [vmem:[#allocation2 + $0x48] sm:$0xff] %vm306_vm0, %v7420_v47  ;;  %731 = vst.msk [vmem:[#allocation2 + $0xc8] sm:$0xff] %vm306_vm0, %v7421_v41  ;;  %v7469_v47 = vmax.f32 %v5618_v33, 0.0  ;;  %v5648_v41 = vadd.f32 %v5544_v1, %v629_v35  ;;  %v5651_v21 = vadd.f32 %v5544_v1, %v549_v50  ;;  %1098 = vrot.lane.b32.xlu0 %v1032_v38, %s5099_s25  ;;  %v5654_v0 = vld [vmem:[#allocation2 + $0x27] sm:$0xff]  ;;  %v5658_v32 = vld [vmem:[#allocation2 + $0x1f] sm:$0xff] }
  0xf7   : > { %7467 = vst [vmem:[#allocation18_spill] sm:$0xff] %v5638_v45  ;;  %714 = vst.msk [vmem:[#allocation2 + $0x40] sm:$0xff] %vm306_vm0, %v7468_v49  ;;  %v7429_v18 = vmax.f32 %v5635_v42, 0.0  ;;  %v7431_v17 = vmax.f32 %v5638_v45, 0.0  ;;  %v1048_v49 = vld [vmem:[#allocation2 + $0xa0] sm:$0xff]  ;;  %v969_v38 = vmul.f32 %v5654_v0, %v5455_v48  ;;  %v968_v48 = vmul.f32 %v5658_v32, %v5452_v44  ;;  %v5694_v44 = vpop.permute.xlu1 %1365 }
  0xf8   : > { %730 = vst.msk [vmem:[#allocation2 + $0xc0] sm:$0xff] %vm306_vm0, %v7469_v47  ;;  %7470 = vst [vmem:[#allocation19_spill] sm:$0xff] %v5648_v41  ;;  %v761_v33 = vld [vmem:[#allocation2 + $0xa7] sm:$0xff]  ;;  %v4880_v19 = vpop.f32.mrb[8].mxu0  ;;  %v4904_v50 = vpop.f32.mrb[8].mxu1  ;;  %v1224_v34 = vld [vmem:[#allocation2 + $0x19] sm:$0xff] }
  0xf9   : > { %717 = vst.msk [vmem:[#allocation2 + $0x58] sm:$0xff] %vm306_vm0, %v7429_v18  ;;  %733 = vst.msk [vmem:[#allocation2 + $0xd8] sm:$0xff] %vm306_vm0, %v7431_v17  ;;  %v5671_v37 = vadd.f32 %v4880_v19, %v5544_v1  ;;  %v5674_v47 = vadd.f32 %v4904_v50, %v5544_v1  ;;  %v639_v35 = vpop.f32.mrb[9].mxu1  ;;  %1132 = vrot.lane.b32.xlu1 %v1049_v36, %s5099_s25  ;;  %v559_v43 = vpop.f32.mrb[9].mxu0  ;;  %v1225_v22 = vld [vmem:[#allocation2 + $0x21] sm:$0xff]  ;;  %v985_v18 = vmul.f32 %v5488_v63, %v761_v33 }
  0xfa   : > { %v7472_v45 = vmax.f32 %v5648_v41, 0.0  ;;  %v7473_v19 = vmax.f32 %v5651_v21, 0.0  ;;  %v5687_v50 = vadd.f32 %v5544_v1, %v639_v35  ;;  %v5690_v36 = vadd.f32 %v5544_v1, %v559_v43  ;;  %1130 = vrot.lane.b32.xlu0 %v1048_v49, %s5099_s25  ;;  %1001 = vst.msk [vmem:[#allocation3 + $0x18] sm:$0xff] %vm306_vm0, %v969_v38  ;;  %v1381_v63 = vpop.permute.xlu0 %1380  ;;  %v5701_v35 = vld [vmem:[#allocation2 + $0x2f] sm:$0xff]  ;;  %1000 = vst.msk [vmem:[#allocation3 + $0x10] sm:$0xff] %vm306_vm0, %v968_v48 }
  0xfb   : > { %7471 = vst [vmem:[#allocation20_spill] sm:$0xff] %v5674_v47  ;;  %v1449_v17 = vmul.f32 %v5518_v20, %v1224_v34  ;;  %1017 = vst.msk [vmem:[#allocation3 + $0x98] sm:$0xff] %vm306_vm0, %v985_v18  ;;  %v1450_v33 = vmul.f32 %v5523_v24, %v1225_v22  ;;  %v1241_v20 = vld [vmem:[#allocation2 + $0xa1] sm:$0xff]  ;;  %v7475_v34 = vmax.f32 %v5671_v37, 0.0  ;;  %v7476_v48 = vmax.f32 %v5674_v47, 0.0 }
  0xfc   : > { %732 = vst.msk [vmem:[#allocation2 + $0xd0] sm:$0xff] %vm306_vm0, %v7472_v45  ;;  %716 = vst.msk [vmem:[#allocation2 + $0x50] sm:$0xff] %vm306_vm0, %v7473_v19  ;;  %v5699_v19 = vld [vmem:[#allocation2 + $0x37] sm:$0xff]  ;;  %v4883_v38 = vpop.f32.mrb[10].mxu0  ;;  %v4907_v41 = vpop.f32.mrb[10].mxu1  ;;  %v7479_v22 = vmax.f32 %v5687_v50, 0.0 }
  0xfd   : > { %7474 = vst [vmem:[#allocation21_spill] sm:$0xff] %v5687_v50  ;;  %v971_v45 = vmul.f32 %v5699_v19, %v5459_v51  ;;  %719 = vst.msk [vmem:[#allocation2 + $0x68] sm:$0xff] %vm306_vm0, %v7475_v34  ;;  %v5717_v18 = vadd.f32 %v4883_v38, %v5544_v1  ;;  %v5720_v49 = vadd.f32 %v4907_v41, %v5544_v1  ;;  %v569_v43 = vpop.f32.mrb[11].mxu0  ;;  %v649_v24 = vpop.f32.mrb[11].mxu1  ;;  %1514 = vrot.lane.b32.xlu1 %v1449_v17, %s5100_s20  ;;  %v1035_v17 = vld [vmem:[#allocation2 + $0x38] sm:$0xff] }
  0xfe   : > { %735 = vst.msk [vmem:[#allocation2 + $0xe8] sm:$0xff] %vm306_vm0, %v7476_v48  ;;  %v970_v51 = vmul.f32 %v5701_v35, %v5461_v52  ;;  %734 = vst.msk [vmem:[#allocation2 + $0xe0] sm:$0xff] %vm306_vm0, %v7479_v22  ;;  %v7480_v34 = vmax.f32 %v5690_v36, 0.0  ;;  %v5732_v38 = vadd.f32 %v5544_v1, %v569_v43  ;;  %v5735_v41 = vadd.f32 %v5544_v1, %v649_v24  ;;  %v5741_v22 = vld [vmem:[#allocation2 + $0xb7] sm:$0xff] }
  0xff   : > { %7477 = vst [vmem:[#allocation22_spill] sm:$0xff] %v5717_v18  ;;  %7478 = vst [vmem:[#allocation23_spill] sm:$0xff] %v5720_v49  ;;  %1516 = vrot.lane.b32.xlu0 %v1450_v33, %s5100_s20  ;;  %v7436_v52 = vmax.f32 %v5717_v18, 0.0  ;;  %v7435_v48 = vmax.f32 %v5720_v49, 0.0  ;;  %v987_v33 = vmul.f32 %v5492_v3, %v5741_v22 }
 0x100   : > { %718 = vst.msk [vmem:[#allocation2 + $0x60] sm:$0xff] %vm306_vm0, %v7480_v34  ;;  %7481 = vst [vmem:[#allocation24_spill] sm:$0xff] %v5732_v38  ;;  %v1466_v34 = vmul.f32 %v1381_v63, %v1241_v20  ;;  %v7437_v43 = vmax.f32 %v5732_v38, 0.0  ;;  %v7438_v47 = vmax.f32 %v5735_v41, 0.0  ;;  %v4886_v24 = vpop.f32.mrb[12].mxu0  ;;  %v4910_v50 = vpop.f32.mrb[12].mxu1 }
 0x101   : > { %7482 = vst [vmem:[#allocation25_spill] sm:$0xff] %v5735_v41  ;;  %1003 = vst.msk [vmem:[#allocation3 + $0x28] sm:$0xff] %vm306_vm0, %v971_v45  ;;  %v5755_v45 = vadd.f32 %v4886_v24, %v5544_v1  ;;  %v5758_v63 = vadd.f32 %v4910_v50, %v5544_v1  ;;  %v579_v20 = vpop.f32.mrb[13].mxu0  ;;  %1104 = vrot.lane.b32.xlu1 %v1035_v17, %s5099_s25  ;;  %v1051_v50 = vld [vmem:[#allocation2 + $0xb8] sm:$0xff]  ;;  %v5775_v17 = vpop.permute.xlu1 %1375  ;;  %v1226_v41 = vld [vmem:[#allocation2 + $0x29] sm:$0xff] }
 0x102   : > { %1002 = vst.msk [vmem:[#allocation3 + $0x20] sm:$0xff] %vm306_vm0, %v970_v51  ;;  %721 = vst.msk [vmem:[#allocation2 + $0x78] sm:$0xff] %vm306_vm0, %v7436_v52  ;;  %v659_v51 = vpop.f32.mrb[13].mxu1  ;;  %v5768_v3 = vadd.f32 %v5544_v1, %v579_v20  ;;  %v1034_v38 = vld [vmem:[#allocation2 + $0x30] sm:$0xff] }
 0x103   : > { %737 = vst.msk [vmem:[#allocation2 + $0xf8] sm:$0xff] %vm306_vm0, %v7435_v48  ;;  %7483 = vst [vmem:[#allocation26_spill] sm:$0xff] %v5758_v63  ;;  %v5771_v24 = vadd.f32 %v5544_v1, %v659_v51  ;;  %1548 = vrot.lane.b32.xlu0 %v1466_v34, %s5100_s20  ;;  %v7443_v48 = vmax.f32 %v5755_v45, 0.0  ;;  %v7444_v52 = vmax.f32 %v5758_v63, 0.0  ;;  %v5815_v63 = vld [vmem:[#allocation2 + $0x47] sm:$0xff] }
 0x104   : > { %720 = vst.msk [vmem:[#allocation2 + $0x70] sm:$0xff] %vm306_vm0, %v7437_v43  ;;  %736 = vst.msk [vmem:[#allocation2 + $0xf0] sm:$0xff] %vm306_vm0, %v7438_v47  ;;  %v5779_v43 = vld [vmem:[#allocation2 + $0xaf] sm:$0xff]  ;;  %v4889_v49 = vpop.f32.mrb[14].mxu0  ;;  %v4913_v51 = vpop.f32.mrb[14].mxu1 }
 0x105   : > { %7484 = vst [vmem:[#allocation27_spill] sm:$0xff] %v5771_v24  ;;  %1019 = vst.msk [vmem:[#allocation3 + $0xa8] sm:$0xff] %vm306_vm0, %v987_v33  ;;  %v986_v34 = vmul.f32 %v5494_v4, %v5779_v43  ;;  %v5792_v33 = vadd.f32 %v4889_v49, %v5544_v1  ;;  %v5795_v47 = vadd.f32 %v4913_v51, %v5544_v1  ;;  %v589_v20 = vpop.f32.mrb[15].mxu0  ;;  %v669_v18 = vpop.f32.mrb[15].mxu1  ;;  %1136 = vrot.lane.b32.xlu1 %v1051_v50, %s5099_s25 }
 0x106   : > { %723 = vst.msk [vmem:[#allocation2 + $0x88] sm:$0xff] %vm306_vm0, %v7443_v48  ;;  %739 = vst.msk [vmem:[#allocation2 + $0x108] sm:$0xff] %vm306_vm0, %v7444_v52  ;;  %v7486_v4 = vmax.f32 %v5768_v3, 0.0  ;;  %v7487_v48 = vmax.f32 %v5771_v24, 0.0  ;;  %v5805_v52 = vadd.f32 %v5544_v1, %v589_v20  ;;  %v5808_v49 = vadd.f32 %v5544_v1, %v669_v18  ;;  %v1242_v24 = vld [vmem:[#allocation2 + $0xa9] sm:$0xff]  ;;  %v1227_v18 = vld [vmem:[#allocation2 + $0x31] sm:$0xff] }
 0x107   : > { %7485 = vst [vmem:[#allocation28_spill] sm:$0xff] %v5795_v47  ;;  %1102 = vrot.lane.b32.xlu0 %v1034_v38, %s5099_s25  ;;  %1018 = vst.msk [vmem:[#allocation3 + $0xa0] sm:$0xff] %vm306_vm0, %v986_v34  ;;  %v7448_v50 = vmax.f32 %v5792_v33, 0.0  ;;  %v7447_v51 = vmax.f32 %v5795_v47, 0.0  ;;  %v973_v1 = vmul.f32 %v5464_v53, %v5815_v63  ;;  %v1386_v38 = vpop.permute.xlu1 %1385  ;;  %v5838_v34 = vld [vmem:[#allocation2 + $0x3f] sm:$0xff]  ;;  %v1243_v47 = vld [vmem:[#allocation2 + $0xb1] sm:$0xff] }
 0x108   : > { %722 = vst.msk [vmem:[#allocation2 + $0x80] sm:$0xff] %vm306_vm0, %v7486_v4  ;;  %738 = vst.msk [vmem:[#allocation2 + $0x100] sm:$0xff] %vm306_vm0, %v7487_v48  ;;  %v1451_v4 = vmul.f32 %v5521_v23, %v1226_v41  ;;  %v7449_v48 = vmax.f32 %v5805_v52, 0.0  ;;  %v7451_v20 = vmax.f32 %v5808_v49, 0.0  ;;  %v1050_v23 = vld [vmem:[#allocation2 + $0xb0] sm:$0xff]  ;;  %v1467_v53 = vmul.f32 %v1386_v38, %v1242_v24  ;;  %v5836_v41 = vld [vmem:[#allocation2 + $0xc7] sm:$0xff] }
 0x109   : > { %7488 = vst [vmem:[#allocation29_spill] sm:$0xff] %v5808_v49  ;;  %725 = vst.msk [vmem:[#allocation2 + $0x98] sm:$0xff] %vm306_vm0, %v7448_v50  ;;  %v972_v50 = vmul.f32 %v5466_v54, %v5838_v34  ;;  %v5849_v24 = vld [vmem:[#allocation2 + $0xbf] sm:$0xff]  ;;  %v5869_v38 = vld [vmem:[#allocation2 + $0x4f] sm:$0xff] }
 0x10a   : > { %741 = vst.msk [vmem:[#allocation2 + $0x118] sm:$0xff] %vm306_vm0, %v7447_v51  ;;  %1518 = vrot.lane.b32.xlu1 %v1451_v4, %s5100_s20  ;;  %724 = vst.msk [vmem:[#allocation2 + $0x90] sm:$0xff] %vm306_vm0, %v7449_v48  ;;  %v1452_v4 = vmul.f32 %v5528_v26, %v1227_v18  ;;  %v989_v51 = vmul.f32 %v5496_v5, %v5836_v41  ;;  %v1391_v48 = vpop.permute.xlu0 %1390  ;;  %v988_v5 = vmul.f32 %v5498_v6, %v5849_v24  ;;  %v1053_v18 = vld [vmem:[#allocation2 + $0xc8] sm:$0xff] }
 0x10b   : > { %740 = vst.msk [vmem:[#allocation2 + $0x110] sm:$0xff] %vm306_vm0, %v7451_v20  ;;  %1134 = vrot.lane.b32.xlu0 %v1050_v23, %s5099_s25  ;;  %1005 = vst.msk [vmem:[#allocation3 + $0x38] sm:$0xff] %vm306_vm0, %v973_v1  ;;  %v1037_v1 = vld [vmem:[#allocation2 + $0x48] sm:$0xff]  ;;  %v1468_v26 = vmul.f32 %v1391_v48, %v1243_v47  ;;  %v5863_v47 = vld [vmem:[#allocation2 + $0xd7] sm:$0xff] }
 0x10c   : > { %1021 = vst.msk [vmem:[#allocation3 + $0xb8] sm:$0xff] %vm306_vm0, %v989_v51  ;;  %1004 = vst.msk [vmem:[#allocation3 + $0x30] sm:$0xff] %vm306_vm0, %v972_v50  ;;  %v1228_v51 = vld [vmem:[#allocation2 + $0x39] sm:$0xff]  ;;  %v991_v48 = vmul.f32 %v5500_v9, %v5863_v47  ;;  %v5907_v20 = vld [vmem:[#allocation2 + $0x6f] sm:$0xff] }
 0x10d   : > { %1020 = vst.msk [vmem:[#allocation3 + $0xb0] sm:$0xff] %vm306_vm0, %v988_v5  ;;  %v5861_v50 = vld [vmem:[#allocation2 + $0x57] sm:$0xff]  ;;  %v5882_v5 = vld [vmem:[#allocation2 + $0xe7] sm:$0xff] }
 0x10e   : > { %1550 = vrot.lane.b32.xlu1 %v1467_v53, %s5100_s20  ;;  %v975_v6 = vmul.f32 %v5468_v55, %v5861_v50  ;;  %v5873_v53 = vld [vmem:[#allocation2 + $0x67] sm:$0xff]  ;;  %v1244_v9 = vld [vmem:[#allocation2 + $0xb9] sm:$0xff]  ;;  %1023 = vst.msk [vmem:[#allocation3 + $0xc8] sm:$0xff] %vm306_vm0, %v991_v48 }
 0x10f   : > { %1520 = vrot.lane.b32.xlu0 %v1452_v4, %s5100_s20  ;;  %v1036_v4 = vld [vmem:[#allocation2 + $0x40] sm:$0xff]  ;;  %v977_v55 = vmul.f32 %v5472_v57, %v5873_v53  ;;  %v1453_v57 = vmul.f32 %v5526_v25, %v1228_v51  ;;  %v5909_v25 = vld [vmem:[#allocation2 + $0xef] sm:$0xff] }
 0x110   : > { %v5851_v23 = vld [vmem:[#allocation2 + $0x9f] sm:$0xff]  ;;  %1007 = vst.msk [vmem:[#allocation3 + $0x48] sm:$0xff] %vm306_vm0, %v975_v6 }
 0x111   : > { %v984_v54 = vmul.f32 %v5490_v2, %v5851_v23  ;;  %v5871_v2 = vld [vmem:[#allocation2 + $0xcf] sm:$0xff]  ;;  %1009 = vst.msk [vmem:[#allocation3 + $0x58] sm:$0xff] %vm306_vm0, %v977_v55  ;;  %v1052_v55 = vld [vmem:[#allocation2 + $0xc0] sm:$0xff] }
 0x112   : > { %1108 = vrot.lane.b32.xlu1 %v1037_v1, %s5099_s25  ;;  %v974_v1 = vmul.f32 %v5470_v56, %v5869_v38  ;;  %v5891_v56 = vld [vmem:[#allocation2 + $0xdf] sm:$0xff] }
 0x113   : > { %1552 = vrot.lane.b32.xlu0 %v1468_v26, %s5100_s20  ;;  %1016 = vst.msk [vmem:[#allocation3 + $0x90] sm:$0xff] %vm306_vm0, %v984_v54  ;;  %v990_v26 = vmul.f32 %v5502_v10, %v5871_v2  ;;  %v993_v54 = vmul.f32 %v5504_v11, %v5882_v5  ;;  %v5893_v10 = vld [vmem:[#allocation2 + $0x77] sm:$0xff]  ;;  %v992_v11 = vmul.f32 %v5506_v12, %v5891_v56  ;;  %v1229_v49 = vld [vmem:[#allocation2 + $0x41] sm:$0xff] }
 0x114   : > { %1006 = vst.msk [vmem:[#allocation3 + $0x40] sm:$0xff] %vm306_vm0, %v974_v1  ;;  %v979_v48 = vmul.f32 %v5476_v8, %v5893_v10  ;;  %v994_v12 = vmul.f32 %v5510_v14, %v5909_v25  ;;  %v5918_v1 = vld [vmem:[#allocation2 + $0x87] sm:$0xff] }
 0x115   : > { %1022 = vst.msk [vmem:[#allocation3 + $0xc0] sm:$0xff] %vm306_vm0, %v990_v26  ;;  %1025 = vst.msk [vmem:[#allocation3 + $0xd8] sm:$0xff] %vm306_vm0, %v993_v54  ;;  %v5920_v8 = vld [vmem:[#allocation2 + $0x107] sm:$0xff]  ;;  %v5922_v26 = vld [vmem:[#allocation2 + $0x7f] sm:$0xff] }
 0x116   : > { %1140 = vrot.lane.b32.xlu1 %v1053_v18, %s5099_s25  ;;  %v5889_v18 = vld [vmem:[#allocation2 + $0x5f] sm:$0xff]  ;;  %1024 = vst.msk [vmem:[#allocation3 + $0xd0] sm:$0xff] %vm306_vm0, %v992_v11  ;;  %1011 = vst.msk [vmem:[#allocation3 + $0x68] sm:$0xff] %vm306_vm0, %v979_v48  ;;  %v980_v14 = vmul.f32 %v5482_v61, %v5922_v26 }
 0x117   : > { %1106 = vrot.lane.b32.xlu0 %v1036_v4, %s5099_s25  ;;  %v976_v6 = vmul.f32 %v5474_v58, %v5889_v18  ;;  %v5905_v4 = vld [vmem:[#allocation2 + $0xf7] sm:$0xff]  ;;  %v978_v58 = vmul.f32 %v5478_v59, %v5907_v20  ;;  %v981_v59 = vmul.f32 %v5480_v60, %v5918_v1  ;;  %v5934_v54 = vld [vmem:[#allocation2 + $0xff] sm:$0xff]  ;;  %1026 = vst.msk [vmem:[#allocation3 + $0xe0] sm:$0xff] %vm306_vm0, %v994_v12 }
 0x118   : > { %v995_v51 = vmul.f32 %v5508_v13, %v5905_v4  ;;  %v997_v13 = vmul.f32 %v5512_v15, %v5920_v8  ;;  %v996_v60 = vmul.f32 %v5514_v16, %v5934_v54  ;;  %v5944_v15 = vld [vmem:[#allocation2 + $0x8f] sm:$0xff]  ;;  %1012 = vst.msk [vmem:[#allocation3 + $0x70] sm:$0xff] %vm306_vm0, %v980_v14  ;;  %v1401_v16 = vpop.permute.xlu0 %1400 }
 0x119   : > { %1008 = vst.msk [vmem:[#allocation3 + $0x50] sm:$0xff] %vm306_vm0, %v976_v6  ;;  %1010 = vst.msk [vmem:[#allocation3 + $0x60] sm:$0xff] %vm306_vm0, %v978_v58  ;;  %v5942_v6 = vld [vmem:[#allocation2 + $0x97] sm:$0xff]  ;;  %v982_v48 = vmul.f32 %v5486_v62, %v5944_v15  ;;  %v1245_v58 = vld [vmem:[#allocation2 + $0xc1] sm:$0xff] }
 0x11a   : > { %1522 = vrot.lane.b32.xlu1 %v1453_v57, %s5100_s20  ;;  %v1396_v57 = vpop.permute.xlu1 %1395  ;;  %1027 = vst.msk [vmem:[#allocation3 + $0xe8] sm:$0xff] %vm306_vm0, %v995_v51  ;;  %1013 = vst.msk [vmem:[#allocation3 + $0x78] sm:$0xff] %vm306_vm0, %v981_v59  ;;  %v983_v61 = vmul.f32 %v5484_v7, %v5942_v6  ;;  %v1454_v51 = vmul.f32 %v5531_v27, %v1229_v49  ;;  %v1470_v12 = vmul.f32 %v1401_v16, %v1245_v58  ;;  %v1055_v7 = vld [vmem:[#allocation2 + $0xd8] sm:$0xff]  ;;  %v1230_v62 = vld [vmem:[#allocation2 + $0x49] sm:$0xff] }
 0x11b   : > { %1138 = vrot.lane.b32.xlu0 %v1052_v55, %s5099_s25  ;;  %v1469_v11 = vmul.f32 %v1396_v57, %v1244_v9  ;;  %1029 = vst.msk [vmem:[#allocation3 + $0xf8] sm:$0xff] %vm306_vm0, %v997_v13  ;;  %1028 = vst.msk [vmem:[#allocation3 + $0xf0] sm:$0xff] %vm306_vm0, %v996_v60  ;;  %v1039_v9 = vld [vmem:[#allocation2 + $0x58] sm:$0xff]  ;;  %v1038_v27 = vld [vmem:[#allocation2 + $0x50] sm:$0xff]  ;;  %v1455_v49 = vmul.f32 %v5533_v28, %v1230_v62 }
 0x11c   : > { %1015 = vst.msk [vmem:[#allocation3 + $0x88] sm:$0xff] %vm306_vm0, %v983_v61  ;;  %1014 = vst.msk [vmem:[#allocation3 + $0x80] sm:$0xff] %vm306_vm0, %v982_v48  ;;  %v1246_v55 = vld [vmem:[#allocation2 + $0xc9] sm:$0xff]  ;;  %v1231_v13 = vld [vmem:[#allocation2 + $0x51] sm:$0xff] }
 0x11d   : > { %v1054_v59 = vld [vmem:[#allocation2 + $0xd0] sm:$0xff]  ;;  %v1456_v60 = vmul.f32 %v5535_v29, %v1231_v13  ;;  %v1041_v48 = vld [vmem:[#allocation2 + $0x68] sm:$0xff]  ;;  %v1232_v16 = vld [vmem:[#allocation2 + $0x59] sm:$0xff] }
 0x11e   : > { %1554 = vrot.lane.b32.xlu1 %v1469_v11, %s5100_s20  ;;  %v1406_v14 = vpop.permute.xlu1 %1405  ;;  %v1411_v11 = vpop.permute.xlu0 %1410  ;;  %v1247_v61 = vld [vmem:[#allocation2 + $0xd1] sm:$0xff]  ;;  %v1057_v28 = vld [vmem:[#allocation2 + $0xe8] sm:$0xff]  ;;  %v1040_v58 = vld [vmem:[#allocation2 + $0x60] sm:$0xff] }
 0x11f   : > { %1524 = vrot.lane.b32.xlu0 %v1454_v51, %s5100_s20  ;;  %v1471_v57 = vmul.f32 %v1406_v14, %v1246_v55  ;;  %v1472_v51 = vmul.f32 %v1411_v11, %v1247_v61  ;;  %v1233_v62 = vld [vmem:[#allocation2 + $0x61] sm:$0xff]  ;;  %v1043_v14 = vld [vmem:[#allocation2 + $0x78] sm:$0xff]  ;;  %v1234_v11 = vld [vmem:[#allocation2 + $0x69] sm:$0xff] }
 0x120   : > { %v1458_v55 = vmul.f32 %v5539_v31, %v1233_v62  ;;  %v1042_v61 = vld [vmem:[#allocation2 + $0x70] sm:$0xff] }
 0x122   : > { %1112 = vrot.lane.b32.xlu1 %v1039_v9, %s5099_s25  ;;  %v1421_v29 = vpop.permute.xlu0 %1420  ;;  %v1457_v9 = vmul.f32 %v5537_v30, %v1232_v16  ;;  %v1059_v30 = vld [vmem:[#allocation2 + $0xf8] sm:$0xff] }
 0x123   : > { %1556 = vrot.lane.b32.xlu0 %v1470_v12, %s5100_s20  ;;  %v1248_v12 = vld [vmem:[#allocation2 + $0xd9] sm:$0xff]  ;;  %v1235_v16 = vld [vmem:[#allocation2 + $0x71] sm:$0xff] }
 0x126   : > { %1144 = vrot.lane.b32.xlu1 %v1055_v7, %s5099_s25  ;;  %v1056_v7 = vld [vmem:[#allocation2 + $0xe0] sm:$0xff]  ;;  %v1431_v13 = vpop.permute.xlu0 %1430 }
 0x127   : > { %1110 = vrot.lane.b32.xlu0 %v1038_v27, %s5099_s25  ;;  %v1416_v27 = vpop.permute.xlu1 %1415 }
 0x12a   : > { %1526 = vrot.lane.b32.xlu1 %v1455_v49, %s5100_s20  ;;  %v1473_v49 = vmul.f32 %v1416_v27, %v1248_v12  ;;  %v1251_v12 = vld [vmem:[#allocation2 + $0xf1] sm:$0xff]  ;;  %v1061_v27 = vld [vmem:[#allocation2 + $0x108] sm:$0xff] }
 0x12b   : > { %1142 = vrot.lane.b32.xlu0 %v1054_v59, %s5099_s25  ;;  %v1249_v59 = vld [vmem:[#allocation2 + $0xe1] sm:$0xff] }
 0x12e   : > { %1558 = vrot.lane.b32.xlu1 %v1471_v57, %s5100_s20  ;;  %v1474_v57 = vmul.f32 %v1421_v29, %v1249_v59 }
 0x12f   : > { %1528 = vrot.lane.b32.xlu0 %v1456_v60, %s5100_s20  ;;  %v1441_v60 = vpop.permute.xlu0 %1440 }
 0x132   : > { %1116 = vrot.lane.b32.xlu1 %v1041_v48, %s5099_s25  ;;  %v1459_v48 = vmul.f32 %v5560_v40, %v1234_v11  ;;  %v1476_v40 = vmul.f32 %v1431_v13, %v1251_v12  ;;  %v1237_v13 = vld [vmem:[#allocation2 + $0x81] sm:$0xff]  ;;  %v1238_v12 = vld [vmem:[#allocation2 + $0x89] sm:$0xff] }
 0x133   : > { %1560 = vrot.lane.b32.xlu0 %v1472_v51, %s5100_s20  ;;  %v1250_v51 = vld [vmem:[#allocation2 + $0xe9] sm:$0xff]  ;;  %v7489_v11 = vld [vmem:[#allocation12_spill] sm:$0xff] }
 0x136   : > { %1148 = vrot.lane.b32.xlu1 %v1057_v28, %s5099_s25  ;;  %v1058_v28 = vld [vmem:[#allocation2 + $0xf0] sm:$0xff] }
 0x137   : > { %1114 = vrot.lane.b32.xlu0 %v1040_v58, %s5099_s25  ;;  %v1426_v58 = vpop.permute.xlu1 %1425 }
 0x138   : > { %v1475_v29 = vmul.f32 %v1426_v58, %v1250_v51 }
 0x13a   : > { %1530 = vrot.lane.b32.xlu1 %v1457_v9, %s5100_s20  ;;  %v1460_v9 = vmul.f32 %v5558_v39, %v1235_v16  ;;  %v1240_v16 = vld [vmem:[#allocation2 + $0x99] sm:$0xff] }
 0x13b   : > { %1146 = vrot.lane.b32.xlu0 %v1056_v7, %s5099_s25  ;;  %v1045_v7 = vld [vmem:[#allocation2 + $0x88] sm:$0xff]  ;;  %v1436_v62 = vpop.permute.xlu1 %1435 }
 0x13e   : > { %1562 = vrot.lane.b32.xlu1 %v1473_v49, %s5100_s20  ;;  %v1236_v49 = vld [vmem:[#allocation2 + $0x79] sm:$0xff] }
 0x13f   : > { %1532 = vrot.lane.b32.xlu0 %v1458_v55, %s5100_s20  ;;  %v1044_v55 = vld [vmem:[#allocation2 + $0x80] sm:$0xff]  ;;  %v1446_v39 = vpop.permute.xlu1 %1445  ;;  %v1461_v59 = vmul.f32 %v5620_v46, %v1236_v49  ;;  %v1047_v46 = vld [vmem:[#allocation2 + $0x98] sm:$0xff] }
 0x142   : > { %1120 = vrot.lane.b32.xlu1 %v1043_v14, %s5099_s25  ;;  %v1252_v14 = vld [vmem:[#allocation2 + $0xf9] sm:$0xff] }
 0x143   : > { %1564 = vrot.lane.b32.xlu0 %v1474_v57, %s5100_s20  ;;  %v1060_v57 = vld [vmem:[#allocation2 + $0x100] sm:$0xff] }
 0x146   : > { %1152 = vrot.lane.b32.xlu1 %v1059_v30, %s5099_s25  ;;  %v1477_v30 = vmul.f32 %v1436_v62, %v1252_v14 }
 0x147   : > { %1118 = vrot.lane.b32.xlu0 %v1042_v61, %s5099_s25  ;;  %v1513_v31 = vpop.permute.xlu0 %1512  ;;  %v1462_v61 = vmul.f32 %v7489_v11, %v1237_v13  ;;  %v6031_v13 = vld [vmem:[%s7405_s7 + $0x28] sm:$0xff] }
 0x148   : > { %1609 = vst.msk [vmem:[#allocation3] sm:$0xff] %vm1608_vm3, %v1513_v31  ;;  %v1253_v31 = vld [vmem:[#allocation2 + $0x101] sm:$0xff] }
 0x14a   : > { %1534 = vrot.lane.b32.xlu1 %v1459_v48, %s5100_s20  ;;  %v5998_v48 = vpop.permute.xlu1 %1712 }
 0x14b   : > { %1150 = vrot.lane.b32.xlu0 %v1058_v28, %s5099_s25  ;;  %v1478_v28 = vmul.f32 %v1441_v60, %v1253_v31  ;;  %v1463_v60 = vmul.f32 %v5694_v44, %v1238_v12  ;;  %v6064_v12 = vld [vmem:[%s7405_s7 + $0x50] sm:$0xff] }
 0x14e   : > { %1566 = vrot.lane.b32.xlu1 %v1475_v29, %s5100_s20  ;;  %v6006_v58 = vpop.permute.xlu1 %1722  ;;  %v1465_v29 = vmul.f32 %v5775_v17, %v1240_v16  ;;  %v6059_v16 = vld [vmem:[%s7405_s7 + $0x48] sm:$0xff] }
 0x14f   : > { %1536 = vrot.lane.b32.xlu0 %v1460_v9, %s5100_s20 }
 0x152   : > { %1124 = vrot.lane.b32.xlu1 %v1045_v7, %s5099_s25  ;;  %v1046_v7 = vld [vmem:[#allocation2 + $0x90] sm:$0xff] }
 0x153   : > { %1568 = vrot.lane.b32.xlu0 %v1476_v40, %s5100_s20  ;;  %v1239_v40 = vld [vmem:[#allocation2 + $0x91] sm:$0xff] }
 0x156   : > { %1156 = vrot.lane.b32.xlu1 %v1061_v27, %s5099_s25  ;;  %v1254_v27 = vld [vmem:[#allocation2 + $0x109] sm:$0xff] }
 0x157   : > { %1122 = vrot.lane.b32.xlu0 %v1044_v55, %s5099_s25  ;;  %v7490_v55 = vld [vmem:[#allocation17_spill] sm:$0xff]  ;;  %v1479_v17 = vmul.f32 %v1446_v39, %v1254_v27 }
 0x158   : > { %v6001_v51 = vpop.permute.xlu0 %1707 }
 0x15a   : > { %1538 = vrot.lane.b32.xlu1 %v1461_v59, %s5100_s20  ;;  %v1464_v59 = vmul.f32 %v7490_v55, %v1239_v40  ;;  %v6073_v40 = vld [vmem:[%s7405_s7 + $0x58] sm:$0xff] }
 0x15b   : > { %1154 = vrot.lane.b32.xlu0 %v1060_v57, %s5099_s25  ;;  %v6022_v57 = vld [vmem:[%s7405_s7 + $0x20] sm:$0xff] }
 0x15c   : > { %v6009_v9 = vpop.permute.xlu0 %1717 }
 0x15e   : > { %1570 = vrot.lane.b32.xlu1 %v1477_v30, %s5100_s20  ;;  %v6036_v30 = vld [vmem:[%s7405_s7 + $0x30] sm:$0xff] }
 0x15f   : > { %1540 = vrot.lane.b32.xlu0 %v1462_v61, %s5100_s20  ;;  %v6045_v61 = vld [vmem:[%s7405_s7 + $0x38] sm:$0xff] }
 0x162   : > { %1128 = vrot.lane.b32.xlu1 %v1047_v46, %s5099_s25  ;;  %v6050_v46 = vld [vmem:[%s7405_s7 + $0x40] sm:$0xff] }
 0x163   : > { %1572 = vrot.lane.b32.xlu0 %v1478_v28, %s5100_s20 }
 0x166   : > { %1546 = vrot.lane.b32.xlu1 %v1465_v29, %s5100_s20 }
 0x167   : > { %1126 = vrot.lane.b32.xlu0 %v1046_v7, %s5099_s25  ;;  %v1101_v62 = vpop.permute.xlu1 %1100  ;;  %s5101_s25 = smov 12  }
 0x168   : > { %1194 = vst.msk [vmem:[#allocation3 + $0x18] sm:$0xff] %vm1190_vm2, %v1101_v62  ;;  %v1099_v49 = vpop.permute.xlu0 %1098 }
 0x169   : > { %1193 = vst.msk [vmem:[#allocation3 + $0x10] sm:$0xff] %vm1190_vm2, %v1099_v49  ;;  %v1686_v49 = vld [vmem:[%s7405_s7 + $0x68] sm:$0xff] }
 0x16a   : > { %1542 = vrot.lane.b32.xlu1 %v1463_v60, %s5100_s20  ;;  %v1685_v60 = vld [vmem:[%s7405_s7 + $0x60] sm:$0xff] }
 0x16b   : > { %1544 = vrot.lane.b32.xlu0 %v1464_v59, %s5100_s20  ;;  %v1133_v14 = vpop.permute.xlu1 %1132  ;;  %v1687_v59 = vld [vmem:[%s7405_s7 + $0x70] sm:$0xff] }
 0x16c   : > { %1210 = vst.msk [vmem:[#allocation3 + $0x98] sm:$0xff] %vm1190_vm2, %v1133_v14  ;;  %v1131_v44 = vpop.permute.xlu0 %1130  ;;  %v1688_v14 = vld [vmem:[%s7405_s7 + $0x78] sm:$0xff] }
 0x16d   : > { %1209 = vst.msk [vmem:[#allocation3 + $0x90] sm:$0xff] %vm1190_vm2, %v1131_v44 }
 0x16e   : > { %1574 = vrot.lane.b32.xlu1 %v1479_v17, %s5100_s20 }
 0x16f   : > { %1727 = vperm.xlu0 %5054, %v6022_v57   ;;  %v1515_v39 = vpop.permute.xlu1 %1514 }
 0x170   : > { %1610 = vst.msk [vmem:[#allocation3 + $0x8] sm:$0xff] %vm1608_vm3, %v1515_v39  ;;  %v1689_v39 = vld [vmem:[%s7405_s7 + $0x80] sm:$0xff] }
 0x171   : > { %v1517_v11 = vpop.permute.xlu0 %1516 }
 0x172   : > { %1611 = vst.msk [vmem:[#allocation3 + $0x10] sm:$0xff] %vm1608_vm3, %v1517_v11  ;;  %1732 = vperm.xlu1 %5055, %v6031_v13  }
 0x173   : > { %1737 = vperm.xlu0 %5054, %v6036_v30   ;;  %v1105_v31 = vpop.permute.xlu1 %1104 }
 0x174   : > { %1196 = vst.msk [vmem:[#allocation3 + $0x28] sm:$0xff] %vm1190_vm2, %v1105_v31  ;;  %v1690_v31 = vld [vmem:[%s7405_s7 + $0x88] sm:$0xff] }
 0x175   : > { %v1549_v28 = vpop.permute.xlu0 %1548 }
 0x176   : > { %1627 = vst.msk [vmem:[#allocation3 + $0x90] sm:$0xff] %vm1608_vm3, %v1549_v28  ;;  %1742 = vperm.xlu1 %5055, %v6045_v61  }
 0x177   : > { %1747 = vperm.xlu0 %5054, %v6050_v46   ;;  %v1137_v29 = vpop.permute.xlu1 %1136 }
 0x178   : > { %1212 = vst.msk [vmem:[#allocation3 + $0xa8] sm:$0xff] %vm1190_vm2, %v1137_v29  ;;  %v1691_v29 = vld [vmem:[%s7405_s7 + $0x90] sm:$0xff] }
 0x179   : > { %v1103_v7 = vpop.permute.xlu0 %1102 }
 0x17a   : > { %1195 = vst.msk [vmem:[#allocation3 + $0x20] sm:$0xff] %vm1190_vm2, %v1103_v7  ;;  %1752 = vperm.xlu1 %5055, %v6059_v16  }
 0x17b   : > { %1757 = vperm.xlu0 %5054, %v6064_v12  }
 0x17c   : > { %v1519_v62 = vpop.permute.xlu1 %1518 }
 0x17d   : > { %1612 = vst.msk [vmem:[#allocation3 + $0x18] sm:$0xff] %vm1608_vm3, %v1519_v62  ;;  %v1135_v27 = vpop.permute.xlu0 %1134  ;;  %v1692_v62 = vld [vmem:[%s7405_s7 + $0x98] sm:$0xff] }
 0x17e   : > { %1211 = vst.msk [vmem:[#allocation3 + $0xa0] sm:$0xff] %vm1190_vm2, %v1135_v27  ;;  %1762 = vperm.xlu1 %5055, %v6073_v40   ;;  %v1693_v27 = vld [vmem:[%s7405_s7 + $0xa0] sm:$0xff] }
 0x17f   : > { %1767 = vperm.xlu0 %5054, %v1685_v60  }
 0x180   : > { %v1551_v55 = vpop.permute.xlu1 %1550 }
 0x181   : > { %1628 = vst.msk [vmem:[#allocation3 + $0x98] sm:$0xff] %vm1608_vm3, %v1551_v55  ;;  %v1521_v17 = vpop.permute.xlu0 %1520  ;;  %v1694_v55 = vld [vmem:[%s7405_s7 + $0xa8] sm:$0xff] }
 0x182   : > { %1613 = vst.msk [vmem:[#allocation3 + $0x20] sm:$0xff] %vm1608_vm3, %v1521_v17  ;;  %1772 = vperm.xlu1 %5055, %v1686_v49   ;;  %v1695_v17 = vld [vmem:[%s7405_s7 + $0xb0] sm:$0xff] }
 0x183   : > { %1777 = vperm.xlu0 %5054, %v1687_v59  }
 0x184   : > { %v1109_v44 = vpop.permute.xlu1 %1108 }
 0x185   : > { %1198 = vst.msk [vmem:[#allocation3 + $0x38] sm:$0xff] %vm1190_vm2, %v1109_v44  ;;  %v1553_v11 = vpop.permute.xlu0 %1552  ;;  %v1696_v44 = vld [vmem:[%s7405_s7 + $0xb8] sm:$0xff] }
 0x186   : > { %1629 = vst.msk [vmem:[#allocation3 + $0xa0] sm:$0xff] %vm1608_vm3, %v1553_v11  ;;  %1782 = vperm.xlu1 %5055, %v1688_v14   ;;  %v1697_v11 = vld [vmem:[%s7405_s7 + $0xc0] sm:$0xff] }
 0x187   : > { %1787 = vperm.xlu0 %5054, %v1689_v39  }
 0x188   : > { %v1141_v28 = vpop.permute.xlu1 %1140 }
 0x189   : > { %1214 = vst.msk [vmem:[#allocation3 + $0xb8] sm:$0xff] %vm1190_vm2, %v1141_v28  ;;  %v1107_v7 = vpop.permute.xlu0 %1106  ;;  %v1698_v28 = vld [vmem:[%s7405_s7 + $0xc8] sm:$0xff] }
 0x18a   : > { %1197 = vst.msk [vmem:[#allocation3 + $0x30] sm:$0xff] %vm1190_vm2, %v1107_v7  ;;  %1792 = vperm.xlu1 %5055, %v1690_v31   ;;  %v1699_v7 = vld [vmem:[%s7405_s7 + $0xd0] sm:$0xff] }
 0x18b   : > { %1797 = vperm.xlu0 %5054, %v1691_v29  }
 0x18c   : > { %v1523_v60 = vpop.permute.xlu1 %1522 }
 0x18d   : > { %1614 = vst.msk [vmem:[#allocation3 + $0x28] sm:$0xff] %vm1608_vm3, %v1523_v60  ;;  %v1139_v49 = vpop.permute.xlu0 %1138  ;;  %v1700_v60 = vld [vmem:[%s7405_s7 + $0xd8] sm:$0xff] }
 0x18e   : > { %1213 = vst.msk [vmem:[#allocation3 + $0xb0] sm:$0xff] %vm1190_vm2, %v1139_v49  ;;  %1802 = vperm.xlu1 %5055, %v1692_v62   ;;  %v1701_v49 = vld [vmem:[%s7405_s7 + $0xe0] sm:$0xff] }
 0x18f   : > { %1807 = vperm.xlu0 %5054, %v1693_v27  }
 0x190   : > { %v1555_v59 = vpop.permute.xlu1 %1554 }
 0x191   : > { %1630 = vst.msk [vmem:[#allocation3 + $0xa8] sm:$0xff] %vm1608_vm3, %v1555_v59  ;;  %v1525_v14 = vpop.permute.xlu0 %1524  ;;  %v1702_v59 = vld [vmem:[%s7405_s7 + $0xe8] sm:$0xff] }
 0x192   : > { %1615 = vst.msk [vmem:[#allocation3 + $0x30] sm:$0xff] %vm1608_vm3, %v1525_v14  ;;  %1812 = vperm.xlu1 %5055, %v1694_v55   ;;  %v1703_v14 = vld [vmem:[%s7405_s7 + $0xf0] sm:$0xff] }
 0x193   : > { %1817 = vperm.xlu0 %5054, %v1695_v17  }
 0x194   : > { %v1113_v39 = vpop.permute.xlu1 %1112 }
 0x195   : > { %1200 = vst.msk [vmem:[#allocation3 + $0x48] sm:$0xff] %vm1190_vm2, %v1113_v39  ;;  %v1557_v31 = vpop.permute.xlu0 %1556  ;;  %v1704_v39 = vld [vmem:[%s7405_s7 + $0xf8] sm:$0xff] }
 0x196   : > { %1631 = vst.msk [vmem:[#allocation3 + $0xb0] sm:$0xff] %vm1608_vm3, %v1557_v31  ;;  %1822 = vperm.xlu1 %5055, %v1696_v44   ;;  %v1865_v31 = vmul.f32 %v6001_v51, %v5658_v32  ;;  %v1868_v32 = vmul.f32 %v6006_v58, %v5699_v19 }
 0x197   : > { %1827 = vperm.xlu0 %5054, %v1697_v11  }
 0x198   : > { %v1145_v29 = vpop.permute.xlu1 %1144 }
 0x199   : > { %1216 = vst.msk [vmem:[#allocation3 + $0xc8] sm:$0xff] %vm1190_vm2, %v1145_v29  ;;  %v1111_v62 = vpop.permute.xlu0 %1110  ;;  %v1866_v29 = vmul.f32 %v5998_v48, %v5654_v0 }
 0x19a   : > { %1199 = vst.msk [vmem:[#allocation3 + $0x40] sm:$0xff] %vm1190_vm2, %v1111_v62  ;;  %1832 = vperm.xlu1 %5055, %v1698_v28   ;;  %v1867_v62 = vmul.f32 %v6009_v9, %v5701_v35 }
 0x19b   : > { %1837 = vperm.xlu0 %5054, %v1699_v7  }
 0x19c   : > { %v1527_v27 = vpop.permute.xlu1 %1526 }
 0x19d   : > { %1616 = vst.msk [vmem:[#allocation3 + $0x38] sm:$0xff] %vm1608_vm3, %v1527_v27  ;;  %v1143_v55 = vpop.permute.xlu0 %1142 }
 0x19e   : > { %1215 = vst.msk [vmem:[#allocation3 + $0xc0] sm:$0xff] %vm1190_vm2, %v1143_v55  ;;  %1842 = vperm.xlu1 %5055, %v1700_v60  }
 0x19f   : > { %1847 = vperm.xlu0 %5054, %v1701_v49  }
 0x1a0   : > { %v1559_v17 = vpop.permute.xlu1 %1558 }
 0x1a1   : > { %1632 = vst.msk [vmem:[#allocation3 + $0xb8] sm:$0xff] %vm1608_vm3, %v1559_v17  ;;  %v1529_v44 = vpop.permute.xlu0 %1528 }
 0x1a2   : > { %1617 = vst.msk [vmem:[#allocation3 + $0x40] sm:$0xff] %vm1608_vm3, %v1529_v44  ;;  %1852 = vperm.xlu1 %5055, %v1702_v59  }
 0x1a3   : > { %1857 = vperm.xlu0 %5054, %v1703_v14  }
 0x1a4   : > { %v1117_v11 = vpop.permute.xlu1 %1116 }
 0x1a5   : > { %1202 = vst.msk [vmem:[#allocation3 + $0x58] sm:$0xff] %vm1190_vm2, %v1117_v11  ;;  %v1561_v28 = vpop.permute.xlu0 %1560 }
 0x1a6   : > { %1633 = vst.msk [vmem:[#allocation3 + $0xc0] sm:$0xff] %vm1608_vm3, %v1561_v28  ;;  %1862 = vperm.xlu1 %5055, %v1704_v39  }
 0x1a7   : > { %1929 = vrot.lane.b32.xlu0 %v1865_v31, %s5101_s25 }
 0x1a8   : > { %v1149_v7 = vpop.permute.xlu1 %1148 }
 0x1a9   : > { %1218 = vst.msk [vmem:[#allocation3 + $0xd8] sm:$0xff] %vm1190_vm2, %v1149_v7  ;;  %v1115_v60 = vpop.permute.xlu0 %1114 }
 0x1aa   : > { %1201 = vst.msk [vmem:[#allocation3 + $0x50] sm:$0xff] %vm1190_vm2, %v1115_v60  ;;  %1931 = vrot.lane.b32.xlu1 %v1866_v29, %s5101_s25 }
 0x1ab   : > { %1933 = vrot.lane.b32.xlu0 %v1867_v62, %s5101_s25 }
 0x1ac   : > { %v1531_v51 = vpop.permute.xlu1 %1530 }
 0x1ad   : > { %1618 = vst.msk [vmem:[#allocation3 + $0x48] sm:$0xff] %vm1608_vm3, %v1531_v51  ;;  %v1147_v0 = vpop.permute.xlu0 %1146 }
 0x1ae   : > { %1217 = vst.msk [vmem:[#allocation3 + $0xd0] sm:$0xff] %vm1190_vm2, %v1147_v0  ;;  %1935 = vrot.lane.b32.xlu1 %v1868_v32, %s5101_s25 }
 0x1b0   : > { %v1563_v35 = vpop.permute.xlu1 %1562 }
 0x1b1   : > { %1634 = vst.msk [vmem:[#allocation3 + $0xc8] sm:$0xff] %vm1608_vm3, %v1563_v35  ;;  %v1533_v48 = vpop.permute.xlu0 %1532 }
 0x1b2   : > { %1619 = vst.msk [vmem:[#allocation3 + $0x50] sm:$0xff] %vm1608_vm3, %v1533_v48 }
 0x1b4   : > { %v1121_v9 = vpop.permute.xlu1 %1120 }
 0x1b5   : > { %1204 = vst.msk [vmem:[#allocation3 + $0x68] sm:$0xff] %vm1190_vm2, %v1121_v9  ;;  %v1565_v27 = vpop.permute.xlu0 %1564 }
 0x1b6   : > { %1635 = vst.msk [vmem:[#allocation3 + $0xd0] sm:$0xff] %vm1608_vm3, %v1565_v27 }
 0x1b8   : > { %v1153_v19 = vpop.permute.xlu1 %1152 }
 0x1b9   : > { %1220 = vst.msk [vmem:[#allocation3 + $0xe8] sm:$0xff] %vm1190_vm2, %v1153_v19  ;;  %v1119_v58 = vpop.permute.xlu0 %1118 }
 0x1ba   : > { %1203 = vst.msk [vmem:[#allocation3 + $0x60] sm:$0xff] %vm1190_vm2, %v1119_v58 }
 0x1bc   : > { %v1535_v49 = vpop.permute.xlu1 %1534 }
 0x1bd   : > { %1620 = vst.msk [vmem:[#allocation3 + $0x58] sm:$0xff] %vm1608_vm3, %v1535_v49  ;;  %v1151_v55 = vpop.permute.xlu0 %1150 }
 0x1be   : > { %1219 = vst.msk [vmem:[#allocation3 + $0xe0] sm:$0xff] %vm1190_vm2, %v1151_v55 }
 0x1c0   : > { %v1567_v59 = vpop.permute.xlu1 %1566 }
 0x1c1   : > { %1636 = vst.msk [vmem:[#allocation3 + $0xd8] sm:$0xff] %vm1608_vm3, %v1567_v59  ;;  %v1537_v17 = vpop.permute.xlu0 %1536 }
 0x1c2   : > { %1621 = vst.msk [vmem:[#allocation3 + $0x60] sm:$0xff] %vm1608_vm3, %v1537_v17 }
 0x1c4   : > { %v1125_v14 = vpop.permute.xlu1 %1124 }
 0x1c5   : > { %1206 = vst.msk [vmem:[#allocation3 + $0x78] sm:$0xff] %vm1190_vm2, %v1125_v14  ;;  %v1569_v44 = vpop.permute.xlu0 %1568 }
 0x1c6   : > { %1637 = vst.msk [vmem:[#allocation3 + $0xe0] sm:$0xff] %vm1608_vm3, %v1569_v44 }
 0x1c8   : > { %v1157_v39 = vpop.permute.xlu1 %1156 }
 0x1c9   : > { %1222 = vst.msk [vmem:[#allocation3 + $0xf8] sm:$0xff] %vm1190_vm2, %v1157_v39  ;;  %v1123_v11 = vpop.permute.xlu0 %1122 }
 0x1ca   : > { %1205 = vst.msk [vmem:[#allocation3 + $0x70] sm:$0xff] %vm1190_vm2, %v1123_v11 }
 0x1cc   : > { %v1539_v31 = vpop.permute.xlu1 %1538 }
 0x1cd   : > { %1622 = vst.msk [vmem:[#allocation3 + $0x68] sm:$0xff] %vm1608_vm3, %v1539_v31  ;;  %v1155_v28 = vpop.permute.xlu0 %1154 }
 0x1ce   : > { %1221 = vst.msk [vmem:[#allocation3 + $0xf0] sm:$0xff] %vm1190_vm2, %v1155_v28 }
 0x1d0   : > { %v1571_v29 = vpop.permute.xlu1 %1570 }
 0x1d1   : > { %1638 = vst.msk [vmem:[#allocation3 + $0xe8] sm:$0xff] %vm1608_vm3, %v1571_v29  ;;  %v1541_v7 = vpop.permute.xlu0 %1540 }
 0x1d2   : > { %1623 = vst.msk [vmem:[#allocation3 + $0x70] sm:$0xff] %vm1608_vm3, %v1541_v7 }
 0x1d4   : > { %v1129_v62 = vpop.permute.xlu1 %1128 }
 0x1d5   : > { %1208 = vst.msk [vmem:[#allocation3 + $0x88] sm:$0xff] %vm1190_vm2, %v1129_v62  ;;  %v1573_v60 = vpop.permute.xlu0 %1572 }
 0x1d6   : > { %1639 = vst.msk [vmem:[#allocation3 + $0xf0] sm:$0xff] %vm1608_vm3, %v1573_v60 }
 0x1d8   : > { %v1547_v32 = vpop.permute.xlu1 %1546 }
 0x1d9   : > { %1626 = vst.msk [vmem:[#allocation3 + $0x88] sm:$0xff] %vm1608_vm3, %v1547_v32  ;;  %v1127_v51 = vpop.permute.xlu0 %1126  ;;  %v5056_v32 = vld [vmem:[#allocation2 + $0xa7] sm:$0xff] }
 0x1da   : > { %1207 = vst.msk [vmem:[#allocation3 + $0x80] sm:$0xff] %vm1190_vm2, %v1127_v51 }
 0x1dc   : > { %v1543_v0 = vpop.permute.xlu1 %1542 }
 0x1dd   : > { %1624 = vst.msk [vmem:[#allocation3 + $0x78] sm:$0xff] %vm1608_vm3, %v1543_v0  ;;  %v1545_v35 = vpop.permute.xlu0 %1544 }
 0x1de   : > { %1625 = vst.msk [vmem:[#allocation3 + $0x80] sm:$0xff] %vm1608_vm3, %v1545_v35 }
 0x1e0   : > { %v1575_v48 = vpop.permute.xlu1 %1574 }
 0x1e1   : > { %1640 = vst.msk [vmem:[#allocation3 + $0xf8] sm:$0xff] %vm1608_vm3, %v1575_v48 }
 0x1ee   : > { %v1728_v9 = vpop.permute.xlu0 %1727 }
 0x1ef   : > { %v1869_v27 = vmul.f32 %v1728_v9, %v5838_v34 }
 0x1f1   : > { %v1733_v19 = vpop.permute.xlu1 %1732  ;;  %1937 = vrot.lane.b32.xlu0 %v1869_v27, %s5101_s25 }
 0x1f2   : > { %v1870_v58 = vmul.f32 %v1733_v19, %v5815_v63  ;;  %v1738_v49 = vpop.permute.xlu0 %1737 }
 0x1f3   : > { %v1871_v55 = vmul.f32 %v1738_v49, %v5869_v38 }
 0x1f4   : > { %1939 = vrot.lane.b32.xlu1 %v1870_v58, %s5101_s25 }
 0x1f5   : > { %v1743_v59 = vpop.permute.xlu1 %1742  ;;  %1941 = vrot.lane.b32.xlu0 %v1871_v55, %s5101_s25 }
 0x1f6   : > { %v1872_v17 = vmul.f32 %v1743_v59, %v5861_v50  ;;  %v1748_v14 = vpop.permute.xlu0 %1747 }
 0x1f7   : > { %v1873_v44 = vmul.f32 %v1748_v14, %v5889_v18 }
 0x1f8   : > { %1943 = vrot.lane.b32.xlu1 %v1872_v17, %s5101_s25 }
 0x1f9   : > { %v1753_v34 = vpop.permute.xlu1 %1752  ;;  %1945 = vrot.lane.b32.xlu0 %v1873_v44, %s5101_s25  ;;  %v1671_v44 = vld [vmem:[#allocation2 + $0x10f] sm:$0xff] }
 0x1fa   : > { %v1874_v63 = vmul.f32 %v1753_v34, %v5873_v53  ;;  %v1758_v39 = vpop.permute.xlu0 %1757 }
 0x1fb   : > { %v1875_v38 = vmul.f32 %v1758_v39, %v5907_v20 }
 0x1fc   : > { %1947 = vrot.lane.b32.xlu1 %v1874_v63, %s5101_s25  ;;  %v1672_v63 = vld [vmem:[#allocation2 + $0x117] sm:$0xff] }
 0x1fd   : > { %v1763_v11 = vpop.permute.xlu1 %1762  ;;  %1949 = vrot.lane.b32.xlu0 %v1875_v38, %s5101_s25 }
 0x1fe   : > { %v1876_v50 = vmul.f32 %v1763_v11, %v5893_v10  ;;  %v1768_v31 = vpop.permute.xlu0 %1767 }
 0x1ff   : > { %v1877_v18 = vmul.f32 %v1768_v31, %v5922_v26  ;;  %v7493_v31 = vld [vmem:[#allocation4_spill] sm:$0xff] }
 0x200   : > { %1951 = vrot.lane.b32.xlu1 %v1876_v50, %s5101_s25 }
 0x201   : > { %v1773_v28 = vpop.permute.xlu1 %1772  ;;  %1953 = vrot.lane.b32.xlu0 %v1877_v18, %s5101_s25  ;;  %v7494_v18 = vmax.f32 %v7493_v31, 0.0 }
 0x202   : > { %v1878_v53 = vmul.f32 %v1773_v28, %v5918_v1  ;;  %v1778_v29 = vpop.permute.xlu0 %1777 }
 0x203   : > { %v1879_v20 = vmul.f32 %v1778_v29, %v5944_v15 }
 0x204   : > { %1955 = vrot.lane.b32.xlu1 %v1878_v53, %s5101_s25  ;;  %v7495_v53 = vld [vmem:[#allocation10_spill] sm:$0xff] }
 0x205   : > { %v1783_v7 = vpop.permute.xlu1 %1782  ;;  %1957 = vrot.lane.b32.xlu0 %v1879_v20, %s5101_s25  ;;  %v7496_v29 = vmax.f32 %v7495_v53, 0.0  ;;  %v7497_v20 = vld [vmem:[#allocation8_spill] sm:$0xff]  ;;  %v4623_v53 = vld [vmem:[%s7405_s7 + $0x108] sm:$0xff] }
 0x206   : > { %v1880_v10 = vmul.f32 %v1783_v7, %v5942_v6  ;;  %v1788_v62 = vpop.permute.xlu0 %1787  ;;  %v7498_v7 = vmax.f32 %v7497_v20, 0.0  ;;  %v2668_v20 = vld [vmem:[%s7405_s7] sm:$0xff] }
 0x207   : > { %v1881_v26 = vmul.f32 %v1788_v62, %v5851_v23 }
 0x208   : > { %1959 = vrot.lane.b32.xlu1 %v1880_v10, %s5101_s25  ;;  %v7499_v10 = vld [vmem:[#allocation15_spill] sm:$0xff] }
 0x209   : > { %v1793_v60 = vpop.permute.xlu1 %1792  ;;  %1961 = vrot.lane.b32.xlu0 %v1881_v26, %s5101_s25  ;;  %v7500_v62 = vmax.f32 %v7499_v10, 0.0  ;;  %v7501_v26 = vld [vmem:[#allocation13_spill] sm:$0xff] }
 0x20a   : > { %v1882_v1 = vmul.f32 %v5056_v32, %v1793_v60  ;;  %v1798_v51 = vpop.permute.xlu0 %1797  ;;  %v7502_v60 = vmax.f32 %v7501_v26, 0.0  ;;  %v7503_v32 = vmax.f32 %v5651_v21, 0.0  ;;  %v2669_v10 = vld [vmem:[%s7405_s7 + $0x8] sm:$0xff] }
 0x20b   : > { %v1883_v15 = vmul.f32 %v1798_v51, %v5779_v43  ;;  %v7505_v51 = vmax.f32 %v5690_v36, 0.0  ;;  %v7512_v36 = vmax.f32 %v5755_v45, 0.0 }
 0x20c   : > { %1963 = vrot.lane.b32.xlu1 %v1882_v1, %s5101_s25  ;;  %v7504_v1 = vmax.f32 %v5635_v42, 0.0  ;;  %v7511_v42 = vmax.f32 %v5768_v3, 0.0 }
 0x20d   : > { %v1803_v0 = vpop.permute.xlu1 %1802  ;;  %1965 = vrot.lane.b32.xlu0 %v1883_v15, %s5101_s25  ;;  %v7506_v15 = vmax.f32 %v5671_v37, 0.0  ;;  %v7513_v37 = vmax.f32 %v5805_v52, 0.0 }
 0x20e   : > { %v1884_v6 = vmul.f32 %v1803_v0, %v5741_v22  ;;  %v1808_v35 = vpop.permute.xlu0 %1807  ;;  %v7507_v0 = vld [vmem:[#allocation24_spill] sm:$0xff] }
 0x20f   : > { %v1885_v23 = vmul.f32 %v1808_v35, %v5849_v24  ;;  %v7509_v35 = vld [vmem:[#allocation22_spill] sm:$0xff] }
 0x210   : > { %1967 = vrot.lane.b32.xlu1 %v1884_v6, %s5101_s25  ;;  %v7508_v6 = vmax.f32 %v7507_v0, 0.0  ;;  %v7510_v21 = vmax.f32 %v7509_v35, 0.0  ;;  %v2670_v0 = vld [vmem:[%s7405_s7 + $0x10] sm:$0xff]  ;;  %v2671_v35 = vld [vmem:[%s7405_s7 + $0x18] sm:$0xff] }
 0x211   : > { %v1813_v48 = vpop.permute.xlu1 %1812  ;;  %1969 = vrot.lane.b32.xlu0 %v1885_v23, %s5101_s25  ;;  %v7514_v23 = vmax.f32 %v5792_v33, 0.0 }
 0x212   : > { %v1886_v9 = vmul.f32 %v1813_v48, %v5836_v41  ;;  %v1818_v27 = vpop.permute.xlu0 %1817  ;;  %v7515_v48 = vld [vmem:[#allocation7_spill] sm:$0xff] }
 0x213   : > { %v1887_v43 = vmul.f32 %v1818_v27, %v5871_v2  ;;  %v7517_v27 = vld [vmem:[#allocation5_spill] sm:$0xff] }
 0x214   : > { %1971 = vrot.lane.b32.xlu1 %v1886_v9, %s5101_s25  ;;  %v7516_v9 = vmax.f32 %v7515_v48, 0.0  ;;  %v7518_v3 = vmax.f32 %v7517_v27, 0.0  ;;  %v4627_v48 = vld [vmem:[%s7405_s7 + $0x128] sm:$0xff] }
 0x215   : > { %v1823_v19 = vpop.permute.xlu1 %1822  ;;  %1973 = vrot.lane.b32.xlu0 %v1887_v43, %s5101_s25  ;;  %v7519_v43 = vld [vmem:[#allocation11_spill] sm:$0xff] }
 0x216   : > { %v1888_v22 = vmul.f32 %v1823_v19, %v5863_v47  ;;  %v1828_v58 = vpop.permute.xlu0 %1827  ;;  %v7520_v45 = vmax.f32 %v7519_v43, 0.0  ;;  %v7521_v19 = vld [vmem:[#allocation9_spill] sm:$0xff] }
 0x217   : > { %v1889_v24 = vmul.f32 %v1828_v58, %v5891_v56  ;;  %v7522_v52 = vmax.f32 %v7521_v19, 0.0  ;;  %v7525_v58 = vld [vmem:[#allocation14_spill] sm:$0xff] }
 0x218   : > { %1975 = vrot.lane.b32.xlu1 %v1888_v22, %s5101_s25  ;;  %v7523_v22 = vld [vmem:[#allocation16_spill] sm:$0xff] }
 0x219   : > { %v1833_v49 = vpop.permute.xlu1 %1832  ;;  %1977 = vrot.lane.b32.xlu0 %v1889_v24, %s5101_s25  ;;  %v7524_v33 = vmax.f32 %v7523_v22, 0.0  ;;  %v7526_v24 = vmax.f32 %v7525_v58, 0.0 }
 0x21a   : > { %v1890_v41 = vmul.f32 %v1833_v49, %v5882_v5  ;;  %v1838_v55 = vpop.permute.xlu0 %1837  ;;  %v7527_v49 = vld [vmem:[#allocation19_spill] sm:$0xff] }
 0x21b   : > { %v1891_v2 = vmul.f32 %v1838_v55, %v5909_v25  ;;  %v7529_v55 = vld [vmem:[#allocation18_spill] sm:$0xff] }
 0x21c   : > { %1979 = vrot.lane.b32.xlu1 %v1890_v41, %s5101_s25  ;;  %v7528_v41 = vmax.f32 %v7527_v49, 0.0 }
 0x21d   : > { %v1843_v59 = vpop.permute.xlu1 %1842  ;;  %1981 = vrot.lane.b32.xlu0 %v1891_v2, %s5101_s25  ;;  %v7530_v2 = vmax.f32 %v7529_v55, 0.0 }
 0x21e   : > { %v1892_v47 = vmul.f32 %v1843_v59, %v5905_v4  ;;  %v1848_v17 = vpop.permute.xlu0 %1847  ;;  %v7531_v59 = vld [vmem:[#allocation21_spill] sm:$0xff] }
 0x21f   : > { %v1893_v56 = vmul.f32 %v1848_v17, %v5934_v54  ;;  %v7533_v17 = vld [vmem:[#allocation20_spill] sm:$0xff] }
 0x220   : > { %1983 = vrot.lane.b32.xlu1 %v1892_v47, %s5101_s25  ;;  %v7532_v47 = vmax.f32 %v7531_v59, 0.0 }
 0x221   : > { %v1853_v14 = vpop.permute.xlu1 %1852  ;;  %1985 = vrot.lane.b32.xlu0 %v1893_v56, %s5101_s25  ;;  %v7534_v56 = vmax.f32 %v7533_v17, 0.0 }
 0x222   : > { %v1894_v5 = vmul.f32 %v1853_v14, %v5920_v8  ;;  %v1858_v34 = vpop.permute.xlu0 %1857  ;;  %v7491_v8 = vld [vmem:[#allocation6_spill] sm:$0xff]  ;;  %v7535_v14 = vld [vmem:[#allocation25_spill] sm:$0xff] }
 0x223   : > { %v1895_v25 = vmul.f32 %v1858_v34, %v1671_v44  ;;  %v7492_v11 = vmax.f32 %v7491_v8, 0.0  ;;  %v7537_v44 = vld [vmem:[#allocation23_spill] sm:$0xff] }
 0x224   : > { %1987 = vrot.lane.b32.xlu1 %v1894_v5, %s5101_s25  ;;  %v7536_v5 = vmax.f32 %v7535_v14, 0.0  ;;  %v7538_v34 = vmax.f32 %v7537_v44, 0.0 }
 0x225   : > { %v1863_v39 = vpop.permute.xlu1 %1862  ;;  %1989 = vrot.lane.b32.xlu0 %v1895_v25, %s5101_s25  ;;  %v7539_v25 = vld [vmem:[#allocation27_spill] sm:$0xff] }
 0x226   : > { %v1896_v4 = vmul.f32 %v1863_v39, %v1672_v63  ;;  %v1930_v38 = vpop.permute.xlu0 %1929  ;;  %v7540_v63 = vmax.f32 %v7539_v25, 0.0 }
 0x227   : > { %2026 = vst.msk [vmem:[#allocation3] sm:$0xff] %vm2025_vm4, %v1930_v38 }
 0x228   : > { %1991 = vrot.lane.b32.xlu1 %v1896_v4, %s5101_s25  ;;  %v7541_v4 = vld [vmem:[#allocation26_spill] sm:$0xff] }
 0x229   : > { %v1932_v54 = vpop.permute.xlu1 %1931  ;;  %2090 = vrot.lane.b32.xlu0 %v7492_v11, %s5102_s29  ;;  %v7542_v38 = vmax.f32 %v7541_v4, 0.0 }
 0x22a   : > { %2027 = vst.msk [vmem:[#allocation3 + $0x8] sm:$0xff] %vm2025_vm4, %v1932_v54  ;;  %v1934_v50 = vpop.permute.xlu0 %1933  ;;  %v7543_v54 = vld [vmem:[#allocation29_spill] sm:$0xff] }
 0x22b   : > { %2028 = vst.msk [vmem:[#allocation3 + $0x10] sm:$0xff] %vm2025_vm4, %v1934_v50  ;;  %v7544_v8 = vmax.f32 %v7543_v54, 0.0  ;;  %v4622_v50 = vld [vmem:[%s7405_s7 + $0x100] sm:$0xff] }
 0x22c   : > { %2092 = vrot.lane.b32.xlu1 %v7494_v18, %s5102_s29  ;;  %v7545_v18 = vld [vmem:[#allocation28_spill] sm:$0xff] }
 0x22d   : > { %v1936_v28 = vpop.permute.xlu1 %1935  ;;  %2094 = vrot.lane.b32.xlu0 %v7496_v29, %s5102_s29 }
 0x22e   : > { %2029 = vst.msk [vmem:[#allocation3 + $0x18] sm:$0xff] %vm2025_vm4, %v1936_v28  ;;  %v7546_v28 = vmax.f32 %v7545_v18, 0.0  ;;  %v4637_v18 = vld [vmem:[%s7405_s7 + $0x178] sm:$0xff] }
 0x230   : > { %2096 = vrot.lane.b32.xlu1 %v7498_v7, %s5102_s29 }
 0x231   : > { %2098 = vrot.lane.b32.xlu0 %v7500_v62, %s5102_s29 }
 0x234   : > { %2100 = vrot.lane.b32.xlu1 %v7502_v60, %s5102_s29  ;;  %v4624_v60 = vld [vmem:[%s7405_s7 + $0x110] sm:$0xff] }
 0x235   : > { %2102 = vrot.lane.b32.xlu0 %v7503_v32, %s5102_s29 }
 0x238   : > { %2104 = vrot.lane.b32.xlu1 %v7504_v1, %s5102_s29 }
 0x239   : > { %2106 = vrot.lane.b32.xlu0 %v7505_v51, %s5102_s29  ;;  %v4625_v51 = vld [vmem:[%s7405_s7 + $0x118] sm:$0xff] }
 0x23c   : > { %2108 = vrot.lane.b32.xlu1 %v7506_v15, %s5102_s29 }
 0x23d   : > { %2110 = vrot.lane.b32.xlu0 %v7508_v6, %s5102_s29 }
 0x240   : > { %2112 = vrot.lane.b32.xlu1 %v7510_v21, %s5102_s29 }
 0x241   : > { %2114 = vrot.lane.b32.xlu0 %v7511_v42, %s5102_s29 }
 0x244   : > { %2116 = vrot.lane.b32.xlu1 %v7512_v36, %s5102_s29  ;;  %v4626_v36 = vld [vmem:[%s7405_s7 + $0x120] sm:$0xff] }
 0x245   : > { %2118 = vrot.lane.b32.xlu0 %v7513_v37, %s5102_s29 }
 0x248   : > { %2120 = vrot.lane.b32.xlu1 %v7514_v23, %s5102_s29 }
 0x249   : > { %2122 = vrot.lane.b32.xlu0 %v7516_v9, %s5102_s29 }
 0x24c   : > { %2124 = vrot.lane.b32.xlu1 %v7518_v3, %s5102_s29 }
 0x24d   : > { %2126 = vrot.lane.b32.xlu0 %v7520_v45, %s5102_s29  ;;  %v4628_v45 = vld [vmem:[%s7405_s7 + $0x130] sm:$0xff] }
 0x250   : > { %2128 = vrot.lane.b32.xlu1 %v7522_v52, %s5102_s29 }
 0x251   : > { %2130 = vrot.lane.b32.xlu0 %v7524_v33, %s5102_s29 }
 0x254   : > { %2132 = vrot.lane.b32.xlu1 %v7526_v24, %s5102_s29  ;;  %v4630_v24 = vld [vmem:[%s7405_s7 + $0x140] sm:$0xff] }
 0x255   : > { %2134 = vrot.lane.b32.xlu0 %v7528_v41, %s5102_s29 }
 0x258   : > { %2136 = vrot.lane.b32.xlu1 %v7530_v2, %s5102_s29 }
 0x259   : > { %2138 = vrot.lane.b32.xlu0 %v7532_v47, %s5102_s29  ;;  %v4632_v47 = vld [vmem:[%s7405_s7 + $0x150] sm:$0xff] }
 0x25c   : > { %2140 = vrot.lane.b32.xlu1 %v7534_v56, %s5102_s29 }
 0x25d   : > { %2142 = vrot.lane.b32.xlu0 %v7536_v5, %s5102_s29 }
 0x260   : > { %2144 = vrot.lane.b32.xlu1 %v7538_v34, %s5102_s29  ;;  %v4634_v34 = vld [vmem:[%s7405_s7 + $0x160] sm:$0xff] }
 0x261   : > { %2146 = vrot.lane.b32.xlu0 %v7540_v63, %s5102_s29 }
 0x263   : > { %v1938_v39 = vpop.permute.xlu0 %1937 }
 0x264   : > { %2030 = vst.msk [vmem:[#allocation3 + $0x20] sm:$0xff] %vm2025_vm4, %v1938_v39  ;;  %2148 = vrot.lane.b32.xlu1 %v7542_v38, %s5102_s29  ;;  %v2681_v38 = vld [vmem:[%s7405_s7 + $0x68] sm:$0xff] }
 0x265   : > { %2150 = vrot.lane.b32.xlu0 %v7544_v8, %s5102_s29 }
 0x266   : > { %v1940_v11 = vpop.permute.xlu1 %1939 }
 0x267   : > { %2031 = vst.msk [vmem:[#allocation3 + $0x28] sm:$0xff] %vm2025_vm4, %v1940_v11  ;;  %v1942_v31 = vpop.permute.xlu0 %1941  ;;  %v4636_v11 = vld [vmem:[%s7405_s7 + $0x170] sm:$0xff] }
 0x268   : > { %2032 = vst.msk [vmem:[#allocation3 + $0x30] sm:$0xff] %vm2025_vm4, %v1942_v31  ;;  %2152 = vrot.lane.b32.xlu1 %v7546_v28, %s5102_s29 }
 0x269   : > { %2285 = vperm.xlu0 %5054, %v4622_v50  }
 0x26a   : > { %v1944_v29 = vpop.permute.xlu1 %1943 }
 0x26b   : > { %2033 = vst.msk [vmem:[#allocation3 + $0x38] sm:$0xff] %vm2025_vm4, %v1944_v29  ;;  %v1946_v7 = vpop.permute.xlu0 %1945 }
 0x26c   : > { %2034 = vst.msk [vmem:[#allocation3 + $0x40] sm:$0xff] %vm2025_vm4, %v1946_v7  ;;  %2290 = vperm.xlu1 %5055, %v4623_v53  }
 0x26d   : > { %2702 = vperm.xlu0 %5054, %v2668_v20   ;;  %v2683_v20 = vld [vmem:[%s7405_s7 + $0x78] sm:$0xff] }
 0x26e   : > { %v1948_v62 = vpop.permute.xlu1 %1947 }
 0x26f   : > { %2035 = vst.msk [vmem:[#allocation3 + $0x48] sm:$0xff] %vm2025_vm4, %v1948_v62  ;;  %v1950_v26 = vpop.permute.xlu0 %1949  ;;  %v4638_v62 = vld [vmem:[%s7405_s7 + $0x180] sm:$0xff] }
 0x270   : > { %2036 = vst.msk [vmem:[#allocation3 + $0x50] sm:$0xff] %vm2025_vm4, %v1950_v26  ;;  %2707 = vperm.xlu1 %5055, %v2669_v10  }
 0x271   : > { %3312 = vperm.xlu0 %5054, %v4622_v50  }
 0x272   : > { %v1952_v32 = vpop.permute.xlu1 %1951 }
 0x273   : > { %2037 = vst.msk [vmem:[#allocation3 + $0x58] sm:$0xff] %vm2025_vm4, %v1952_v32  ;;  %v1954_v1 = vpop.permute.xlu0 %1953  ;;  %v4639_v32 = vld [vmem:[%s7405_s7 + $0x188] sm:$0xff] }
 0x274   : > { %2038 = vst.msk [vmem:[#allocation3 + $0x60] sm:$0xff] %vm2025_vm4, %v1954_v1  ;;  %2295 = vperm.xlu1 %5055, %v4624_v60  }
 0x275   : > { %3317 = vperm.xlu0 %5054, %v4623_v53   ;;  %v2682_v53 = vld [vmem:[%s7405_s7 + $0x70] sm:$0xff] }
 0x276   : > { %v1956_v15 = vpop.permute.xlu1 %1955 }
 0x277   : > { %2039 = vst.msk [vmem:[#allocation3 + $0x68] sm:$0xff] %vm2025_vm4, %v1956_v15  ;;  %v1958_v6 = vpop.permute.xlu0 %1957 }
 0x278   : > { %2040 = vst.msk [vmem:[#allocation3 + $0x70] sm:$0xff] %vm2025_vm4, %v1958_v6  ;;  %2300 = vperm.xlu1 %5055, %v4625_v51  }
 0x279   : > { %2712 = vperm.xlu0 %5054, %v2670_v0   ;;  %v2685_v0 = vld [vmem:[%s7405_s7 + $0x88] sm:$0xff] }
 0x27a   : > { %v1960_v21 = vpop.permute.xlu1 %1959 }
 0x27b   : > { %2041 = vst.msk [vmem:[#allocation3 + $0x78] sm:$0xff] %vm2025_vm4, %v1960_v21  ;;  %v1962_v42 = vpop.permute.xlu0 %1961  ;;  %v4640_v21 = vld [vmem:[%s7405_s7 + $0x190] sm:$0xff] }
 0x27c   : > { %2042 = vst.msk [vmem:[#allocation3 + $0x80] sm:$0xff] %vm2025_vm4, %v1962_v42  ;;  %2717 = vperm.xlu1 %5055, %v2671_v35  }
 0x27d   : > { %3322 = vperm.xlu0 %5054, %v4624_v60  }
 0x27e   : > { %v1964_v37 = vpop.permute.xlu1 %1963 }
 0x27f   : > { %2043 = vst.msk [vmem:[#allocation3 + $0x88] sm:$0xff] %vm2025_vm4, %v1964_v37  ;;  %v1966_v23 = vpop.permute.xlu0 %1965  ;;  %v4641_v37 = vld [vmem:[%s7405_s7 + $0x198] sm:$0xff] }
 0x280   : > { %2044 = vst.msk [vmem:[#allocation3 + $0x90] sm:$0xff] %vm2025_vm4, %v1966_v23  ;;  %2305 = vperm.xlu1 %5055, %v4626_v36  }
 0x281   : > { %3327 = vperm.xlu0 %5054, %v4625_v51   ;;  %v2684_v51 = vld [vmem:[%s7405_s7 + $0x80] sm:$0xff] }
 0x282   : > { %v1968_v9 = vpop.permute.xlu1 %1967 }
 0x283   : > { %2045 = vst.msk [vmem:[#allocation3 + $0x98] sm:$0xff] %vm2025_vm4, %v1968_v9  ;;  %v1970_v27 = vpop.permute.xlu0 %1969 }
 0x284   : > { %2046 = vst.msk [vmem:[#allocation3 + $0xa0] sm:$0xff] %vm2025_vm4, %v1970_v27  ;;  %2310 = vperm.xlu1 %5055, %v4627_v48   ;;  %v2687_v27 = vld [vmem:[%s7405_s7 + $0x98] sm:$0xff] }
 0x285   : > { %2722 = vperm.xlu0 %5054, %v6022_v57   ;;  %v4629_v57 = vld [vmem:[%s7405_s7 + $0x138] sm:$0xff] }
 0x286   : > { %v1972_v3 = vpop.permute.xlu1 %1971 }
 0x287   : > { %2047 = vst.msk [vmem:[#allocation3 + $0xa8] sm:$0xff] %vm2025_vm4, %v1972_v3  ;;  %v1974_v43 = vpop.permute.xlu0 %1973 }
 0x288   : > { %2048 = vst.msk [vmem:[#allocation3 + $0xb0] sm:$0xff] %vm2025_vm4, %v1974_v43  ;;  %2727 = vperm.xlu1 %5055, %v6031_v13   ;;  %v4642_v43 = vld [vmem:[%s7405_s7 + $0x1a0] sm:$0xff] }
 0x289   : > { %3332 = vperm.xlu0 %5054, %v4626_v36  }
 0x28a   : > { %v1976_v19 = vpop.permute.xlu1 %1975 }
 0x28b   : > { %2049 = vst.msk [vmem:[#allocation3 + $0xb8] sm:$0xff] %vm2025_vm4, %v1976_v19  ;;  %v1978_v52 = vpop.permute.xlu0 %1977  ;;  %v2688_v19 = vld [vmem:[%s7405_s7 + $0xa0] sm:$0xff] }
 0x28c   : > { %2050 = vst.msk [vmem:[#allocation3 + $0xc0] sm:$0xff] %vm2025_vm4, %v1978_v52  ;;  %2315 = vperm.xlu1 %5055, %v4628_v45   ;;  %v2689_v52 = vld [vmem:[%s7405_s7 + $0xa8] sm:$0xff] }
 0x28d   : > { %3337 = vperm.xlu0 %5054, %v4627_v48   ;;  %v2686_v48 = vld [vmem:[%s7405_s7 + $0x90] sm:$0xff] }
 0x28e   : > { %v1980_v22 = vpop.permute.xlu1 %1979 }
 0x28f   : > { %2051 = vst.msk [vmem:[#allocation3 + $0xc8] sm:$0xff] %vm2025_vm4, %v1980_v22  ;;  %v1982_v13 = vpop.permute.xlu0 %1981  ;;  %v4644_v22 = vld [vmem:[%s7405_s7 + $0x1b0] sm:$0xff] }
 0x290   : > { %2052 = vst.msk [vmem:[#allocation3 + $0xd0] sm:$0xff] %vm2025_vm4, %v1982_v13  ;;  %2320 = vperm.xlu1 %5055, %v4629_v57  }
 0x291   : > { %2732 = vperm.xlu0 %5054, %v6036_v30   ;;  %v4631_v30 = vld [vmem:[%s7405_s7 + $0x148] sm:$0xff] }
 0x292   : > { %v1984_v33 = vpop.permute.xlu1 %1983 }
 0x293   : > { %2053 = vst.msk [vmem:[#allocation3 + $0xd8] sm:$0xff] %vm2025_vm4, %v1984_v33  ;;  %v1986_v58 = vpop.permute.xlu0 %1985 }
 0x294   : > { %2054 = vst.msk [vmem:[#allocation3 + $0xe0] sm:$0xff] %vm2025_vm4, %v1986_v58  ;;  %2737 = vperm.xlu1 %5055, %v6045_v61   ;;  %v4645_v58 = vld [vmem:[%s7405_s7 + $0x1b8] sm:$0xff] }
 0x295   : > { %3342 = vperm.xlu0 %5054, %v4628_v45   ;;  %v4643_v45 = vld [vmem:[%s7405_s7 + $0x1a8] sm:$0xff] }
 0x296   : > { %v1988_v49 = vpop.permute.xlu1 %1987 }
 0x297   : > { %2055 = vst.msk [vmem:[#allocation3 + $0xe8] sm:$0xff] %vm2025_vm4, %v1988_v49  ;;  %v1990_v41 = vpop.permute.xlu0 %1989 }
 0x298   : > { %2056 = vst.msk [vmem:[#allocation3 + $0xf0] sm:$0xff] %vm2025_vm4, %v1990_v41  ;;  %2325 = vperm.xlu1 %5055, %v4630_v24  }
 0x299   : > { %3347 = vperm.xlu0 %5054, %v4629_v57  }
 0x29a   : > { %v1992_v55 = vpop.permute.xlu1 %1991 }
 0x29b   : > { %2057 = vst.msk [vmem:[#allocation3 + $0xf8] sm:$0xff] %vm2025_vm4, %v1992_v55  ;;  %v2091_v61 = vpop.permute.xlu0 %2090 }
 0x29c   : > { %2187 = vst.msk [vmem:[#allocation3] sm:$0xff] %vm2186_vm5, %v2091_v61  ;;  %2330 = vperm.xlu1 %5055, %v4631_v30  }
 0x29d   : > { %2742 = vperm.xlu0 %5054, %v6050_v46   ;;  %v4633_v46 = vld [vmem:[%s7405_s7 + $0x158] sm:$0xff] }
 0x29e   : > { %v2093_v2 = vpop.permute.xlu1 %2092 }
 0x29f   : > { %2188 = vst.msk [vmem:[#allocation3 + $0x8] sm:$0xff] %vm2186_vm5, %v2093_v2  ;;  %v2095_v59 = vpop.permute.xlu0 %2094  ;;  %v4646_v2 = vld [vmem:[%s7405_s7 + $0x1c0] sm:$0xff] }
 0x2a0   : > { %2189 = vst.msk [vmem:[#allocation3 + $0x10] sm:$0xff] %vm2186_vm5, %v2095_v59  ;;  %2747 = vperm.xlu1 %5055, %v6059_v16  }
 0x2a1   : > { %3352 = vperm.xlu0 %5054, %v4630_v24   ;;  %v2690_v24 = vld [vmem:[%s7405_s7 + $0xb0] sm:$0xff] }
 0x2a2   : > { %v2097_v17 = vpop.permute.xlu1 %2096 }
 0x2a3   : > { %2190 = vst.msk [vmem:[#allocation3 + $0x18] sm:$0xff] %vm2186_vm5, %v2097_v17  ;;  %v2099_v56 = vpop.permute.xlu0 %2098  ;;  %v4647_v17 = vld [vmem:[%s7405_s7 + $0x1c8] sm:$0xff] }
 0x2a4   : > { %2191 = vst.msk [vmem:[#allocation3 + $0x20] sm:$0xff] %vm2186_vm5, %v2099_v56  ;;  %2335 = vperm.xlu1 %5055, %v4632_v47   ;;  %v2692_v56 = vld [vmem:[%s7405_s7 + $0xc0] sm:$0xff] }
 0x2a5   : > { %3357 = vperm.xlu0 %5054, %v4631_v30   ;;  %v2691_v30 = vld [vmem:[%s7405_s7 + $0xb8] sm:$0xff] }
 0x2a6   : > { %v2101_v14 = vpop.permute.xlu1 %2100 }
 0x2a7   : > { %2192 = vst.msk [vmem:[#allocation3 + $0x28] sm:$0xff] %vm2186_vm5, %v2101_v14  ;;  %v2103_v16 = vpop.permute.xlu0 %2102 }
 0x2a8   : > { %2193 = vst.msk [vmem:[#allocation3 + $0x30] sm:$0xff] %vm2186_vm5, %v2103_v16  ;;  %2340 = vperm.xlu1 %5055, %v4633_v46   ;;  %v2693_v16 = vld [vmem:[%s7405_s7 + $0xc8] sm:$0xff] }
 0x2a9   : > { %2752 = vperm.xlu0 %5054, %v6064_v12   ;;  %v4635_v12 = vld [vmem:[%s7405_s7 + $0x168] sm:$0xff] }
 0x2aa   : > { %v2105_v5 = vpop.permute.xlu1 %2104 }
 0x2ab   : > { %2194 = vst.msk [vmem:[#allocation3 + $0x38] sm:$0xff] %vm2186_vm5, %v2105_v5  ;;  %v2107_v44 = vpop.permute.xlu0 %2106 }
 0x2ac   : > { %2195 = vst.msk [vmem:[#allocation3 + $0x40] sm:$0xff] %vm2186_vm5, %v2107_v44  ;;  %2757 = vperm.xlu1 %5055, %v6073_v40   ;;  %v2680_v40 = vld [vmem:[%s7405_s7 + $0x60] sm:$0xff] }
 0x2ad   : > { %3362 = vperm.xlu0 %5054, %v4632_v47  }
 0x2ae   : > { %v2109_v25 = vpop.permute.xlu1 %2108 }
 0x2af   : > { %2196 = vst.msk [vmem:[#allocation3 + $0x48] sm:$0xff] %vm2186_vm5, %v2109_v25  ;;  %v2111_v63 = vpop.permute.xlu0 %2110 }
 0x2b0   : > { %2197 = vst.msk [vmem:[#allocation3 + $0x50] sm:$0xff] %vm2186_vm5, %v2111_v63  ;;  %2345 = vperm.xlu1 %5055, %v4634_v34  }
 0x2b1   : > { %3367 = vperm.xlu0 %5054, %v4633_v46  }
 0x2b2   : > { %v2113_v39 = vpop.permute.xlu1 %2112 }
 0x2b3   : > { %2198 = vst.msk [vmem:[#allocation3 + $0x58] sm:$0xff] %vm2186_vm5, %v2113_v39  ;;  %v2115_v4 = vpop.permute.xlu0 %2114  ;;  %v2694_v39 = vld [vmem:[%s7405_s7 + $0xd0] sm:$0xff] }
 0x2b4   : > { %2199 = vst.msk [vmem:[#allocation3 + $0x60] sm:$0xff] %vm2186_vm5, %v2115_v4  ;;  %2350 = vperm.xlu1 %5055, %v4635_v12  }
 0x2b5   : > { %2762 = vperm.xlu0 %5054, %v2680_v40  }
 0x2b6   : > { %v2117_v54 = vpop.permute.xlu1 %2116 }
 0x2b7   : > { %2200 = vst.msk [vmem:[#allocation3 + $0x68] sm:$0xff] %vm2186_vm5, %v2117_v54  ;;  %v2119_v8 = vpop.permute.xlu0 %2118 }
 0x2b8   : > { %2201 = vst.msk [vmem:[#allocation3 + $0x70] sm:$0xff] %vm2186_vm5, %v2119_v8  ;;  %2767 = vperm.xlu1 %5055, %v2681_v38   ;;  %v2695_v38 = vld [vmem:[%s7405_s7 + $0xd8] sm:$0xff] }
 0x2b9   : > { %3372 = vperm.xlu0 %5054, %v4634_v34   ;;  %v4648_v34 = vld [vmem:[%s7405_s7 + $0x1d0] sm:$0xff] }
 0x2ba   : > { %v2121_v50 = vpop.permute.xlu1 %2120 }
 0x2bb   : > { %2202 = vst.msk [vmem:[#allocation3 + $0x78] sm:$0xff] %vm2186_vm5, %v2121_v50  ;;  %v2123_v31 = vpop.permute.xlu0 %2122 }
 0x2bc   : > { %2203 = vst.msk [vmem:[#allocation3 + $0x80] sm:$0xff] %vm2186_vm5, %v2123_v31  ;;  %2355 = vperm.xlu1 %5055, %v4636_v11  }
 0x2bd   : > { %3377 = vperm.xlu0 %5054, %v4635_v12   ;;  %v4649_v12 = vld [vmem:[%s7405_s7 + $0x1d8] sm:$0xff] }
 0x2be   : > { %v2125_v28 = vpop.permute.xlu1 %2124 }
 0x2bf   : > { %2204 = vst.msk [vmem:[#allocation3 + $0x88] sm:$0xff] %vm2186_vm5, %v2125_v28  ;;  %v2127_v29 = vpop.permute.xlu0 %2126  ;;  %v2696_v28 = vld [vmem:[%s7405_s7 + $0xe0] sm:$0xff] }
 0x2c0   : > { %2205 = vst.msk [vmem:[#allocation3 + $0x90] sm:$0xff] %vm2186_vm5, %v2127_v29  ;;  %2360 = vperm.xlu1 %5055, %v4637_v18  }
 0x2c1   : > { %2772 = vperm.xlu0 %5054, %v2682_v53  }
 0x2c2   : > { %v2129_v7 = vpop.permute.xlu1 %2128 }
 0x2c3   : > { %2206 = vst.msk [vmem:[#allocation3 + $0x98] sm:$0xff] %vm2186_vm5, %v2129_v7  ;;  %v2131_v10 = vpop.permute.xlu0 %2130 }
 0x2c4   : > { %2207 = vst.msk [vmem:[#allocation3 + $0xa0] sm:$0xff] %vm2186_vm5, %v2131_v10  ;;  %2777 = vperm.xlu1 %5055, %v2683_v20   ;;  %v2697_v20 = vld [vmem:[%s7405_s7 + $0xe8] sm:$0xff] }
 0x2c5   : > { %3382 = vperm.xlu0 %5054, %v4636_v11   ;;  %v4650_v11 = vld [vmem:[%s7405_s7 + $0x1e0] sm:$0xff] }
 0x2c6   : > { %v2133_v26 = vpop.permute.xlu1 %2132 }
 0x2c7   : > { %2208 = vst.msk [vmem:[#allocation3 + $0xa8] sm:$0xff] %vm2186_vm5, %v2133_v26  ;;  %v2135_v60 = vpop.permute.xlu0 %2134 }
 0x2c8   : > { %2209 = vst.msk [vmem:[#allocation3 + $0xb0] sm:$0xff] %vm2186_vm5, %v2135_v60  ;;  %2365 = vperm.xlu1 %5055, %v4638_v62  }
 0x2c9   : > { %3387 = vperm.xlu0 %5054, %v4637_v18   ;;  %v4651_v18 = vld [vmem:[%s7405_s7 + $0x1e8] sm:$0xff] }
 0x2ca   : > { %v2137_v1 = vpop.permute.xlu1 %2136 }
 0x2cb   : > { %2210 = vst.msk [vmem:[#allocation3 + $0xb8] sm:$0xff] %vm2186_vm5, %v2137_v1  ;;  %v2139_v15 = vpop.permute.xlu0 %2138  ;;  %v2698_v1 = vld [vmem:[%s7405_s7 + $0xf0] sm:$0xff] }
 0x2cc   : > { %2211 = vst.msk [vmem:[#allocation3 + $0xc0] sm:$0xff] %vm2186_vm5, %v2139_v15  ;;  %2370 = vperm.xlu1 %5055, %v4639_v32  }
 0x2cd   : > { %2782 = vperm.xlu0 %5054, %v2684_v51  }
 0x2ce   : > { %v2141_v6 = vpop.permute.xlu1 %2140 }
 0x2cf   : > { %2212 = vst.msk [vmem:[#allocation3 + $0xc8] sm:$0xff] %vm2186_vm5, %v2141_v6  ;;  %v2143_v35 = vpop.permute.xlu0 %2142 }
 0x2d0   : > { %2213 = vst.msk [vmem:[#allocation3 + $0xd0] sm:$0xff] %vm2186_vm5, %v2143_v35  ;;  %2787 = vperm.xlu1 %5055, %v2685_v0   ;;  %v2699_v0 = vld [vmem:[%s7405_s7 + $0xf8] sm:$0xff] }
 0x2d1   : > { %3392 = vperm.xlu0 %5054, %v4638_v62   ;;  %v4652_v62 = vld [vmem:[%s7405_s7 + $0x1f0] sm:$0xff] }
 0x2d2   : > { %v2145_v42 = vpop.permute.xlu1 %2144 }
 0x2d3   : > { %2214 = vst.msk [vmem:[#allocation3 + $0xd8] sm:$0xff] %vm2186_vm5, %v2145_v42  ;;  %v2147_v36 = vpop.permute.xlu0 %2146 }
 0x2d4   : > { %2215 = vst.msk [vmem:[#allocation3 + $0xe0] sm:$0xff] %vm2186_vm5, %v2147_v36  ;;  %2375 = vperm.xlu1 %5055, %v4640_v21  }
 0x2d5   : > { %3397 = vperm.xlu0 %5054, %v4639_v32   ;;  %v4653_v32 = vld [vmem:[%s7405_s7 + $0x1f8] sm:$0xff] }
 0x2d6   : > { %v2149_v23 = vpop.permute.xlu1 %2148 }
 0x2d7   : > { %2216 = vst.msk [vmem:[#allocation3 + $0xe8] sm:$0xff] %vm2186_vm5, %v2149_v23  ;;  %v2151_v9 = vpop.permute.xlu0 %2150  ;;  %v2220_v23 = vld [vmem:[#allocation2 + $0x29] sm:$0xff] }
 0x2d8   : > { %2217 = vst.msk [vmem:[#allocation3 + $0xf0] sm:$0xff] %vm2186_vm5, %v2151_v9  ;;  %2380 = vperm.xlu1 %5055, %v4641_v37   ;;  %v2636_v9 = vld [vmem:[#allocation2 + $0x2f] sm:$0xff] }
 0x2d9   : > { %2792 = vperm.xlu0 %5054, %v2686_v48  }
 0x2da   : > { %v2153_v3 = vpop.permute.xlu1 %2152 }
 0x2db   : > { %2218 = vst.msk [vmem:[#allocation3 + $0xf8] sm:$0xff] %vm2186_vm5, %v2153_v3 }
 0x2dc   : > { %2797 = vperm.xlu1 %5055, %v2687_v27  }
 0x2dd   : > { %3402 = vperm.xlu0 %5054, %v4640_v21   ;;  %v2219_v21 = vld [vmem:[#allocation2 + $0x21] sm:$0xff] }
 0x2e0   : > { %2385 = vperm.xlu1 %5055, %v4642_v43  }
 0x2e1   : > { %3407 = vperm.xlu0 %5054, %v4641_v37  }
 0x2e4   : > { %2390 = vperm.xlu1 %5055, %v4643_v45  }
 0x2e5   : > { %2802 = vperm.xlu0 %5054, %v2688_v19  }
 0x2e8   : > { %2807 = vperm.xlu1 %5055, %v2689_v52   ;;  %v6528_v57 = vpop.permute.xlu0 %2285 }
 0x2e9   : > { %3412 = vperm.xlu0 %5054, %v4642_v43   ;;  %v2443_v42 = vmul.f32 %v6528_v57, %v2219_v21  ;;  %v3248_v21 = vld [vmem:[#allocation2 + $0x41] sm:$0xff] }
 0x2eb   : > { %v6533_v13 = vpop.permute.xlu1 %2290 }
 0x2ec   : > { %2395 = vperm.xlu1 %5055, %v4644_v22   ;;  %v6535_v33 = vpop.permute.xlu0 %2702  ;;  %v2444_v48 = vmul.f32 %v6533_v13, %v2220_v23  ;;  %v3246_v13 = vld [vmem:[#allocation2 + $0x31] sm:$0xff] }
 0x2ed   : > { %3417 = vperm.xlu0 %5054, %v4643_v45   ;;  %v2860_v27 = vmul.f32 %v6535_v33, %v2636_v9  ;;  %v2637_v45 = vld [vmem:[#allocation2 + $0x37] sm:$0xff] }
 0x2ef   : > { %v6543_v49 = vpop.permute.xlu1 %2707 }
 0x2f0   : > { %2400 = vperm.xlu1 %5055, %v4645_v58   ;;  %v6545_v41 = vpop.permute.xlu0 %3312  ;;  %v2861_v19 = vmul.f32 %v6543_v49, %v2637_v45  ;;  %v3695_v49 = vld [vmem:[%s7401_s3] sm:$0xff] }
 0x2f1   : > { %2812 = vperm.xlu0 %5054, %v2690_v24   ;;  %v3470_v33 = vmul.f32 %v6545_v41, %v3246_v13  ;;  %v3054_v24 = vld [vmem:[#allocation2 + $0x38] sm:$0xff] }
 0x2f3   : > { %v6550_v55 = vpop.permute.xlu1 %2295 }
 0x2f4   : > { %2817 = vperm.xlu1 %5055, %v2691_v30   ;;  %v6552_v61 = vpop.permute.xlu0 %3317  ;;  %v2445_v41 = vmul.f32 %v3246_v13, %v6550_v55  ;;  %v3698_v55 = vld [vmem:[%s7401_s3 + $0x18] sm:$0xff]  ;;  %v2640_v13 = vld [vmem:[#allocation2 + $0x4f] sm:$0xff] }
 0x2f5   : > { %3422 = vperm.xlu0 %5054, %v4644_v22   ;;  %v3053_v22 = vld [vmem:[#allocation2 + $0x30] sm:$0xff] }
 0x2f7   : > { %v6557_v59 = vpop.permute.xlu1 %2300 }
 0x2f8   : > { %2405 = vperm.xlu1 %5055, %v4646_v2   ;;  %v6559_v47 = vpop.permute.xlu0 %2712 }
 0x2f9   : > { %3427 = vperm.xlu0 %5054, %v4645_v58  }
 0x2fb   : > { %v6567_v46 = vpop.permute.xlu1 %2717 }
 0x2fc   : > { %2410 = vperm.xlu1 %5055, %v4647_v17   ;;  %v6569_v14 = vpop.permute.xlu0 %3322 }
 0x2fd   : > { %2822 = vperm.xlu0 %5054, %v2692_v56  }
 0x2ff   : > { %v6574_v5 = vpop.permute.xlu1 %2305 }
 0x300   : > { %2827 = vperm.xlu1 %5055, %v2693_v16   ;;  %v6576_v44 = vpop.permute.xlu0 %3327  ;;  %v2447_v9 = vmul.f32 %v3248_v21, %v6574_v5 }
 0x301   : > { %3432 = vperm.xlu0 %5054, %v4646_v2   ;;  %v3696_v2 = vld [vmem:[%s7401_s3 + $0x8] sm:$0xff] }
 0x302   : > { %v5026_v56 = vpack.c.bf16 %v3696_v2, %v3695_v49 }
 0x303   : > { %v6581_v25 = vpop.permute.xlu1 %2310 }
 0x304   : > { %2415 = vperm.xlu1 %5055, %v4648_v34   ;;  %v6583_v63 = vpop.permute.xlu0 %2722  ;;  %5027 = vmatprep.subr.bf16.mxu1 %v5026_v56 }
 0x305   : > { %3437 = vperm.xlu0 %5054, %v4647_v17   ;;  %v3247_v17 = vld [vmem:[#allocation2 + $0x39] sm:$0xff]  ;;  %5029 = vmatpush3.bf16.msra.mxu1 %v5026_v56 }
 0x306   : > { %v3471_v16 = vmul.f32 %v6552_v61, %v3247_v17  ;;  %v2446_v61 = vmul.f32 %v3247_v17, %v6557_v59 }
 0x307   : > { %v6591_v40 = vpop.permute.xlu1 %2727 }
 0x308   : > { %2420 = vperm.xlu1 %5055, %v4649_v12   ;;  %v6593_v4 = vpop.permute.xlu0 %3332 }
 0x309   : > { %2832 = vperm.xlu0 %5054, %v2694_v39   ;;  %v3697_v39 = vld [vmem:[%s7401_s3 + $0x10] sm:$0xff] }
 0x30b   : > { %v6598_v54 = vpop.permute.xlu1 %2315 }
 0x30c   : > { %2837 = vperm.xlu1 %5055, %v2695_v38   ;;  %v6600_v8 = vpop.permute.xlu0 %3337  ;;  %v2638_v38 = vld [vmem:[#allocation2 + $0x3f] sm:$0xff] }
 0x30d   : > { %3442 = vperm.xlu0 %5054, %v4648_v34  }
 0x30f   : > { %v6605_v50 = vpop.permute.xlu1 %2320 }
 0x310   : > { %2425 = vperm.xlu1 %5055, %v4650_v11   ;;  %v6607_v31 = vpop.permute.xlu0 %2732 }
 0x311   : > { %3447 = vperm.xlu0 %5054, %v4649_v12  }
 0x313   : > { %v6615_v53 = vpop.permute.xlu1 %2737 }
 0x314   : > { %2430 = vperm.xlu1 %5055, %v4651_v18   ;;  %v6617_v29 = vpop.permute.xlu0 %3342 }
 0x315   : > { %2842 = vperm.xlu0 %5054, %v2696_v28  }
 0x317   : > { %v6622_v7 = vpop.permute.xlu1 %2325 }
 0x318   : > { %2847 = vperm.xlu1 %5055, %v2697_v20   ;;  %v6624_v10 = vpop.permute.xlu0 %3347 }
 0x319   : > { %3452 = vperm.xlu0 %5054, %v4650_v11   ;;  %v5030_v11 = vpack.c.bf16 %v3698_v55, %v3697_v39  ;;  %v3251_v55 = vld [vmem:[#allocation2 + $0x59] sm:$0xff] }
 0x31b   : > { %v6629_v26 = vpop.permute.xlu1 %2330  ;;  %5031 = vmatprep.subr.bf16.mxu1 %v5030_v11 }
 0x31c   : > { %2435 = vperm.xlu1 %5055, %v4652_v62   ;;  %v6631_v60 = vpop.permute.xlu0 %2742  ;;  %5033 = vmatpush3.bf16.msra.mxu1 %v5030_v11 }
 0x31d   : > { %3457 = vperm.xlu0 %5054, %v4651_v18   ;;  %v2862_v18 = vmul.f32 %v6559_v47, %v2638_v38 }
 0x31f   : > { %v6639_v51 = vpop.permute.xlu1 %2747 }
 0x320   : > { %2440 = vperm.xlu1 %5055, %v4653_v32   ;;  %v6641_v15 = vpop.permute.xlu0 %3352 }
 0x321   : > { %2852 = vperm.xlu0 %5054, %v2698_v1  }
 0x323   : > { %v6646_v6 = vpop.permute.xlu1 %2335 }
 0x324   : > { %2857 = vperm.xlu1 %5055, %v2699_v0   ;;  %v6648_v35 = vpop.permute.xlu0 %3357  ;;  %v3055_v0 = vld [vmem:[#allocation2 + $0x40] sm:$0xff] }
 0x325   : > { %3462 = vperm.xlu0 %5054, %v4652_v62   ;;  %v2639_v62 = vld [vmem:[#allocation2 + $0x47] sm:$0xff] }
 0x326   : > { %v2863_v59 = vmul.f32 %v6567_v46, %v2639_v62 }
 0x327   : > { %v6651_v36 = vpop.permute.xlu1 %2340 }
 0x328   : > { %3467 = vperm.xlu1 %5055, %v4653_v32   ;;  %v6653_v37 = vpop.permute.xlu0 %2752  ;;  %v3699_v32 = vld [vmem:[%s7401_s3 + $0x20] sm:$0xf] }
 0x329   : > { %2507 = vrot.lane.b32.xlu0 %v2443_v42, %s5103_s12  ;;  %4922 = vmatprep.subr.msk.mxu1 %vm3804_vm6, %v3699_v32  ;;  %v3472_v42 = vmul.f32 %v6569_v14, %v3248_v21 }
 0x32a   : > { %4923 = vmatpush3.msk.msra.mxu1 %vm3804_vm6, %v3699_v32 }
 0x32b   : > { %v6658_v3 = vpop.permute.xlu1 %2757 }
 0x32c   : > { %2509 = vrot.lane.b32.xlu1 %v2444_v48, %s5103_s12  ;;  %v6661_v43 = vpop.permute.xlu0 %3362  ;;  %v3056_v48 = vld [vmem:[#allocation2 + $0x48] sm:$0xff] }
 0x32d   : > { %2924 = vrot.lane.b32.xlu0 %v2860_v27, %s5104_s13  ;;  %v3249_v27 = vld [vmem:[#allocation2 + $0x49] sm:$0xff] }
 0x32e   : > { %v3473_v45 = vmul.f32 %v6576_v44, %v3249_v27  ;;  %v2448_v14 = vmul.f32 %v3249_v27, %v6581_v25  ;;  %v2641_v44 = vld [vmem:[#allocation2 + $0x57] sm:$0xff] }
 0x32f   : > { %v6665_v52 = vpop.permute.xlu1 %2345  ;;  %v2865_v49 = vmul.f32 %v6591_v40, %v2641_v44  ;;  %v3057_v25 = vld [vmem:[#allocation2 + $0x50] sm:$0xff] }
 0x330   : > { %2926 = vrot.lane.b32.xlu1 %v2861_v19, %s5104_s13  ;;  %v6668_v57 = vpop.permute.xlu0 %3367  ;;  %v2644_v44 = vld [vmem:[#allocation2 + $0x6f] sm:$0xff] }
 0x331   : > { %3117 = vrot.lane.b32.xlu0 %v3053_v22, %s5105_s14 }
 0x333   : > { %v6672_v58 = vpop.permute.xlu1 %2350 }
 0x334   : > { %3119 = vrot.lane.b32.xlu1 %v3054_v24, %s5105_s14  ;;  %v6675_v30 = vpop.permute.xlu0 %2762 }
 0x335   : > { %3534 = vrot.lane.b32.xlu0 %v3470_v33, %s5106_s15  ;;  %v2864_v33 = vmul.f32 %v6583_v63, %v2640_v13  ;;  %v3250_v63 = vld [vmem:[#allocation2 + $0x51] sm:$0xff] }
 0x336   : > { %v3474_v17 = vmul.f32 %v6593_v4, %v3250_v63  ;;  %v2449_v40 = vmul.f32 %v3250_v63, %v6598_v54  ;;  %v2450_v4 = vmul.f32 %v3251_v55, %v6605_v50  ;;  %v3059_v50 = vld [vmem:[#allocation2 + $0x60] sm:$0xff] }
 0x337   : > { %v6686_v34 = vpop.permute.xlu1 %2767 }
 0x338   : > { %2511 = vrot.lane.b32.xlu1 %v2445_v41, %s5103_s12  ;;  %v6689_v12 = vpop.permute.xlu0 %3372 }
 0x339   : > { %3536 = vrot.lane.b32.xlu0 %v3471_v16, %s5106_s15  ;;  %v3058_v16 = vld [vmem:[#allocation2 + $0x58] sm:$0xff] }
 0x33b   : > { %v6700_v28 = vpop.permute.xlu1 %2355 }
 0x33c   : > { %2513 = vrot.lane.b32.xlu1 %v2446_v61, %s5103_s12  ;;  %v6703_v20 = vpop.permute.xlu0 %3377  ;;  %v3475_v61 = vmul.f32 %v6600_v8, %v3251_v55  ;;  %v2643_v8 = vld [vmem:[#allocation2 + $0x67] sm:$0xff] }
 0x33d   : > { %2928 = vrot.lane.b32.xlu0 %v2862_v18, %s5104_s13  ;;  %v2642_v18 = vld [vmem:[#allocation2 + $0x5f] sm:$0xff] }
 0x33e   : > { %v2866_v62 = vmul.f32 %v6607_v31, %v2642_v18  ;;  %v3252_v31 = vld [vmem:[#allocation2 + $0x61] sm:$0xff]  ;;  %v3255_v18 = vld [vmem:[#allocation2 + $0x79] sm:$0xff] }
 0x33f   : > { %v6711_v47 = vpop.permute.xlu1 %2360 }
 0x340   : > { %2930 = vrot.lane.b32.xlu1 %v2863_v59, %s5104_s13  ;;  %v6714_v1 = vpop.permute.xlu0 %2772  ;;  %v2867_v59 = vmul.f32 %v6615_v53, %v2643_v8  ;;  %v2451_v53 = vmul.f32 %v3252_v31, %v6622_v7 }
 0x341   : > { %3121 = vrot.lane.b32.xlu0 %v3055_v0, %s5105_s14 }
 0x343   : > { %v6719_v23 = vpop.permute.xlu1 %2777 }
 0x344   : > { %3123 = vrot.lane.b32.xlu1 %v3056_v48, %s5105_s14  ;;  %v6722_v46 = vpop.permute.xlu0 %3382 }
 0x345   : > { %3538 = vrot.lane.b32.xlu0 %v3472_v42, %s5106_s15  ;;  %v3476_v42 = vmul.f32 %v6617_v29, %v3252_v31 }
 0x347   : > { %v6727_v19 = vpop.permute.xlu1 %2365 }
 0x348   : > { %2515 = vrot.lane.b32.xlu1 %v2447_v9, %s5103_s12  ;;  %v6730_v22 = vpop.permute.xlu0 %3387  ;;  %v3060_v9 = vld [vmem:[#allocation2 + $0x68] sm:$0xff] }
 0x349   : > { %3540 = vrot.lane.b32.xlu0 %v3473_v45, %s5106_s15  ;;  %v3253_v45 = vld [vmem:[#allocation2 + $0x69] sm:$0xff] }
 0x34a   : > { %v2452_v29 = vmul.f32 %v3253_v45, %v6629_v26  ;;  %v3061_v26 = vld [vmem:[#allocation2 + $0x70] sm:$0xff] }
 0x34b   : > { %v6735_v24 = vpop.permute.xlu1 %2370 }
 0x34c   : > { %2517 = vrot.lane.b32.xlu1 %v2448_v14, %s5103_s12  ;;  %v6738_v5 = vpop.permute.xlu0 %2782  ;;  %v3477_v14 = vmul.f32 %v6624_v10, %v3253_v45  ;;  %v2645_v10 = vld [vmem:[#allocation2 + $0x77] sm:$0xff] }
 0x34d   : > { %2932 = vrot.lane.b32.xlu0 %v2864_v33, %s5104_s13  ;;  %v2869_v63 = vmul.f32 %v6639_v51, %v2645_v10  ;;  %v3257_v10 = vld [vmem:[#allocation2 + $0x89] sm:$0xff] }
 0x34f   : > { %v6742_v2 = vpop.permute.xlu1 %2787 }
 0x350   : > { %2934 = vrot.lane.b32.xlu1 %v2865_v49, %s5104_s13  ;;  %v6745_v41 = vpop.permute.xlu0 %3392  ;;  %v2868_v49 = vmul.f32 %v6631_v60, %v2644_v44  ;;  %v3254_v60 = vld [vmem:[#allocation2 + $0x71] sm:$0xff]  ;;  %v3064_v44 = vld [vmem:[#allocation2 + $0x88] sm:$0xff] }
 0x351   : > { %3125 = vrot.lane.b32.xlu0 %v3057_v25, %s5105_s14  ;;  %v2453_v51 = vmul.f32 %v3254_v60, %v6646_v6 }
 0x353   : > { %v6749_v56 = vpop.permute.xlu1 %2375 }
 0x354   : > { %3127 = vrot.lane.b32.xlu1 %v3058_v16, %s5105_s14  ;;  %v6752_v39 = vpop.permute.xlu0 %3397 }
 0x355   : > { %3542 = vrot.lane.b32.xlu0 %v3474_v17, %s5106_s15 }
 0x357   : > { %v6757_v38 = vpop.permute.xlu1 %2380 }
 0x358   : > { %2519 = vrot.lane.b32.xlu1 %v2449_v40, %s5103_s12  ;;  %v6760_v11 = vpop.permute.xlu0 %2792  ;;  %v3478_v40 = vmul.f32 %v6641_v15, %v3254_v60  ;;  %v2454_v15 = vmul.f32 %v3255_v18, %v6651_v36  ;;  %v3063_v36 = vld [vmem:[#allocation2 + $0x80] sm:$0xff] }
 0x359   : > { %3544 = vrot.lane.b32.xlu0 %v3475_v61, %s5106_s15  ;;  %v3062_v61 = vld [vmem:[#allocation2 + $0x78] sm:$0xff] }
 0x35b   : > { %v6765_v32 = vpop.permute.xlu1 %2797 }
 0x35c   : > { %2521 = vrot.lane.b32.xlu1 %v2450_v4, %s5103_s12  ;;  %v6768_v54 = vpop.permute.xlu0 %3402 }
 0x35d   : > { %2936 = vrot.lane.b32.xlu0 %v2866_v62, %s5104_s13  ;;  %v3479_v62 = vmul.f32 %v6648_v35, %v3255_v18  ;;  %v2647_v35 = vld [vmem:[#allocation2 + $0x87] sm:$0xff] }
 0x35f   : > { %v6772_v0 = vpop.permute.xlu1 %2385 }
 0x360   : > { %2938 = vrot.lane.b32.xlu1 %v2867_v59, %s5104_s13  ;;  %v6775_v21 = vpop.permute.xlu0 %3407 }
 0x361   : > { %3129 = vrot.lane.b32.xlu0 %v3059_v50, %s5105_s14  ;;  %v2646_v50 = vld [vmem:[#allocation2 + $0x7f] sm:$0xff] }
 0x362   : > { %v2870_v31 = vmul.f32 %v6653_v37, %v2646_v50  ;;  %v3256_v37 = vld [vmem:[#allocation2 + $0x81] sm:$0xff] }
 0x363   : > { %v6779_v48 = vpop.permute.xlu1 %2390 }
 0x364   : > { %3131 = vrot.lane.b32.xlu1 %v3060_v9, %s5105_s14  ;;  %v6782_v27 = vpop.permute.xlu0 %2802  ;;  %v2871_v9 = vmul.f32 %v6658_v3, %v2647_v35  ;;  %v2455_v3 = vmul.f32 %v3256_v37, %v6665_v52  ;;  %v3066_v35 = vld [vmem:[#allocation2 + $0x98] sm:$0xff] }
 0x365   : > { %3546 = vrot.lane.b32.xlu0 %v3476_v42, %s5106_s15 }
 0x367   : > { %v6787_v13 = vpop.permute.xlu1 %2807 }
 0x368   : > { %2523 = vrot.lane.b32.xlu1 %v2451_v53, %s5103_s12  ;;  %v6790_v33 = vpop.permute.xlu0 %3412 }
 0x369   : > { %3548 = vrot.lane.b32.xlu0 %v3477_v14, %s5106_s15  ;;  %v3480_v14 = vmul.f32 %v6661_v43, %v3256_v37  ;;  %v2456_v43 = vmul.f32 %v3257_v10, %v6672_v58  ;;  %v3065_v58 = vld [vmem:[#allocation2 + $0x90] sm:$0xff] }
 0x36b   : > { %v6795_v25 = vpop.permute.xlu1 %2395 }
 0x36c   : > { %2525 = vrot.lane.b32.xlu1 %v2452_v29, %s5103_s12  ;;  %v6798_v7 = vpop.permute.xlu0 %3417 }
 0x36d   : > { %2940 = vrot.lane.b32.xlu0 %v2868_v49, %s5104_s13 }
 0x36f   : > { %v6802_v17 = vpop.permute.xlu1 %2400 }
 0x370   : > { %2942 = vrot.lane.b32.xlu1 %v2869_v63, %s5104_s13  ;;  %v6805_v16 = vpop.permute.xlu0 %2812  ;;  %v3481_v63 = vmul.f32 %v6668_v57, %v3257_v10  ;;  %v2649_v57 = vld [vmem:[#allocation2 + $0x97] sm:$0xff] }
 0x371   : > { %3133 = vrot.lane.b32.xlu0 %v3061_v26, %s5105_s14  ;;  %v2873_v18 = vmul.f32 %v6686_v34, %v2649_v57 }
 0x373   : > { %v6809_v55 = vpop.permute.xlu1 %2817 }
 0x374   : > { %3135 = vrot.lane.b32.xlu1 %v3062_v61, %s5105_s14  ;;  %v6812_v4 = vpop.permute.xlu0 %3422 }
 0x375   : > { %3550 = vrot.lane.b32.xlu0 %v3478_v40, %s5106_s15  ;;  %v2648_v40 = vld [vmem:[#allocation2 + $0x8f] sm:$0xff] }
 0x376   : > { %v2872_v61 = vmul.f32 %v6675_v30, %v2648_v40  ;;  %v3258_v30 = vld [vmem:[#allocation2 + $0x91] sm:$0xff] }
 0x377   : > { %v6817_v8 = vpop.permute.xlu1 %2405  ;;  %v3482_v50 = vmul.f32 %v6689_v12, %v3258_v30  ;;  %v2457_v34 = vmul.f32 %v3258_v30, %v6700_v28 }
 0x378   : > { %2527 = vrot.lane.b32.xlu1 %v2453_v51, %s5103_s12  ;;  %v6820_v59 = vpop.permute.xlu0 %3427 }
 0x379   : > { %3552 = vrot.lane.b32.xlu0 %v3479_v62, %s5106_s15 }
 0x37b   : > { %v6825_v42 = vpop.permute.xlu1 %2410 }
 0x37c   : > { %2529 = vrot.lane.b32.xlu1 %v2454_v15, %s5103_s12  ;;  %v6828_v6 = vpop.permute.xlu0 %2822 }
 0x37d   : > { %2944 = vrot.lane.b32.xlu0 %v2870_v31, %s5104_s13 }
 0x37f   : > { %v6832_v53 = vpop.permute.xlu1 %2827 }
 0x380   : > { %2946 = vrot.lane.b32.xlu1 %v2871_v9, %s5104_s13  ;;  %v6835_v45 = vpop.permute.xlu0 %3432 }
 0x381   : > { %3137 = vrot.lane.b32.xlu0 %v3063_v36, %s5105_s14  ;;  %v3259_v36 = vld [vmem:[#allocation2 + $0x99] sm:$0xff] }
 0x382   : > { %v3483_v37 = vmul.f32 %v6703_v20, %v3259_v36  ;;  %v2458_v12 = vmul.f32 %v3259_v36, %v6711_v47  ;;  %v2651_v20 = vld [vmem:[#allocation2 + $0xa7] sm:$0xff] }
 0x383   : > { %v6839_v29 = vpop.permute.xlu1 %2415  ;;  %v3067_v47 = vld [vmem:[#allocation2 + $0xa0] sm:$0xff] }
 0x384   : > { %3139 = vrot.lane.b32.xlu1 %v3064_v44, %s5105_s14  ;;  %v6842_v49 = vpop.permute.xlu0 %3437 }
 0x385   : > { %3554 = vrot.lane.b32.xlu0 %v3480_v14, %s5106_s15 }
 0x387   : > { %v6847_v26 = vpop.permute.xlu1 %2420 }
 0x388   : > { %2531 = vrot.lane.b32.xlu1 %v2455_v3, %s5103_s12  ;;  %v6850_v60 = vpop.permute.xlu0 %2832  ;;  %v2650_v3 = vld [vmem:[#allocation2 + $0x9f] sm:$0xff] }
 0x389   : > { %3556 = vrot.lane.b32.xlu0 %v3481_v63, %s5106_s15  ;;  %v2874_v10 = vmul.f32 %v6714_v1, %v2650_v3  ;;  %v3260_v1 = vld [vmem:[#allocation2 + $0xa1] sm:$0xff]  ;;  %v2653_v3 = vld [vmem:[#allocation2 + $0xb7] sm:$0xff] }
 0x38a   : > { %v3484_v57 = vmul.f32 %v6722_v46, %v3260_v1 }
 0x38b   : > { %v6855_v51 = vpop.permute.xlu1 %2837 }
 0x38c   : > { %2533 = vrot.lane.b32.xlu1 %v2456_v43, %s5103_s12  ;;  %v6858_v52 = vpop.permute.xlu0 %3442  ;;  %v2875_v43 = vmul.f32 %v6719_v23, %v2651_v20  ;;  %v2459_v23 = vmul.f32 %v3260_v1, %v6727_v19 }
 0x38d   : > { %2948 = vrot.lane.b32.xlu0 %v2872_v61, %s5104_s13 }
 0x38f   : > { %v6862_v62 = vpop.permute.xlu1 %2425 }
 0x390   : > { %2950 = vrot.lane.b32.xlu1 %v2873_v18, %s5104_s13  ;;  %v6865_v15 = vpop.permute.xlu0 %3447 }
 0x391   : > { %3141 = vrot.lane.b32.xlu0 %v3065_v58, %s5105_s14  ;;  %v3068_v58 = vld [vmem:[#allocation2 + $0xa8] sm:$0xff] }
 0x393   : > { %v6869_v31 = vpop.permute.xlu1 %2430 }
 0x394   : > { %3143 = vrot.lane.b32.xlu1 %v3066_v35, %s5105_s14  ;;  %v6872_v9 = vpop.permute.xlu0 %2842 }
 0x395   : > { %3558 = vrot.lane.b32.xlu0 %v3482_v50, %s5106_s15  ;;  %v3261_v50 = vld [vmem:[#allocation2 + $0xa9] sm:$0xff] }
 0x396   : > { %v3485_v35 = vmul.f32 %v6730_v22, %v3261_v50  ;;  %v2460_v36 = vmul.f32 %v3261_v50, %v6735_v24 }
 0x397   : > { %v6877_v14 = vpop.permute.xlu1 %2847 }
 0x398   : > { %2535 = vrot.lane.b32.xlu1 %v2457_v34, %s5103_s12  ;;  %v6880_v44 = vpop.permute.xlu0 %3452 }
 0x399   : > { %3560 = vrot.lane.b32.xlu0 %v3483_v37, %s5106_s15  ;;  %v2652_v37 = vld [vmem:[#allocation2 + $0xaf] sm:$0xff] }
 0x39b   : > { %v6885_v63 = vpop.permute.xlu1 %2435 }
 0x39c   : > { %2537 = vrot.lane.b32.xlu1 %v2458_v12, %s5103_s12  ;;  %v6888_v28 = vpop.permute.xlu0 %3457  ;;  %v2876_v12 = vmul.f32 %v6738_v5, %v2652_v37  ;;  %v3069_v5 = vld [vmem:[#allocation2 + $0xb0] sm:$0xff] }
 0x39d   : > { %2952 = vrot.lane.b32.xlu0 %v2874_v10, %s5104_s13  ;;  %v2877_v10 = vmul.f32 %v6742_v2, %v2653_v3  ;;  %v3071_v3 = vld [vmem:[#allocation2 + $0xc0] sm:$0xff] }
 0x39f   : > { %v6892_v40 = vpop.permute.xlu1 %2440 }
 0x3a0   : > { %2954 = vrot.lane.b32.xlu1 %v2875_v43, %s5104_s13  ;;  %v6895_v61 = vpop.permute.xlu0 %2852  ;;  %v3262_v43 = vld [vmem:[#allocation2 + $0xb1] sm:$0xff] }
 0x3a1   : > { %3145 = vrot.lane.b32.xlu0 %v3067_v47, %s5105_s14  ;;  %v3486_v47 = vmul.f32 %v6745_v41, %v3262_v43 }
 0x3a3   : > { %v6899_v18 = vpop.permute.xlu1 %2857 }
 0x3a4   : > { %3147 = vrot.lane.b32.xlu1 %v3068_v58, %s5105_s14  ;;  %v6902_v30 = vpop.permute.xlu0 %3462  ;;  %v2461_v58 = vmul.f32 %v3262_v43, %v6749_v56  ;;  %v3072_v43 = vld [vmem:[#allocation2 + $0xc8] sm:$0xff] }
 0x3a5   : > { %3562 = vrot.lane.b32.xlu0 %v3484_v57, %s5106_s15  ;;  %v3070_v57 = vld [vmem:[#allocation2 + $0xb8] sm:$0xff] }
 0x3a7   : > { %v6907_v34 = vpop.permute.xlu1 %3467 }
 0x3a8   : > { %2539 = vrot.lane.b32.xlu1 %v2459_v23, %s5103_s12  ;;  %v2508_v46 = vpop.permute.xlu0 %2507  ;;  %v3263_v23 = vld [vmem:[#allocation2 + $0xb9] sm:$0xff] }
 0x3a9   : > { %2604 = vst.msk [vmem:[#allocation3] sm:$0xff] %vm2603_vm7, %v2508_v46  ;;  %3564 = vrot.lane.b32.xlu0 %v3485_v35, %s5106_s15  ;;  %v3487_v50 = vmul.f32 %v6752_v39, %v3263_v23  ;;  %v2462_v46 = vmul.f32 %v3263_v23, %v6757_v38  ;;  %v2656_v23 = vld [vmem:[#allocation2 + $0xcf] sm:$0xff] }
 0x3ab   : > { %v2510_v19 = vpop.permute.xlu1 %2509 }
 0x3ac   : > { %2605 = vst.msk [vmem:[#allocation3 + $0x8] sm:$0xff] %vm2603_vm7, %v2510_v19  ;;  %2541 = vrot.lane.b32.xlu1 %v2460_v36, %s5103_s12  ;;  %v2925_v22 = vpop.permute.xlu0 %2924  ;;  %v2654_v36 = vld [vmem:[#allocation2 + $0xbf] sm:$0xff]  ;;  %v2655_v19 = vld [vmem:[#allocation2 + $0xc7] sm:$0xff] }
 0x3ad   : > { %3021 = vst.msk [vmem:[#allocation3] sm:$0xff] %vm3020_vm8, %v2925_v22  ;;  %2956 = vrot.lane.b32.xlu0 %v2876_v12, %s5104_s13  ;;  %v2878_v37 = vmul.f32 %v6760_v11, %v2654_v36  ;;  %v2879_v38 = vmul.f32 %v6765_v32, %v2655_v19  ;;  %v3073_v36 = vld [vmem:[#allocation2 + $0xd0] sm:$0xff]  ;;  %v3074_v19 = vld [vmem:[#allocation2 + $0xd8] sm:$0xff] }
 0x3af   : > { %v2927_v20 = vpop.permute.xlu1 %2926 }
 0x3b0   : > { %3022 = vst.msk [vmem:[#allocation3 + $0x8] sm:$0xff] %vm3020_vm8, %v2927_v20  ;;  %2958 = vrot.lane.b32.xlu1 %v2877_v10, %s5104_s13  ;;  %v3118_v24 = vpop.permute.xlu0 %3117  ;;  %v3264_v20 = vld [vmem:[#allocation2 + $0xc1] sm:$0xff] }
 0x3b1   : > { %3214 = vst.msk [vmem:[#allocation3] sm:$0xff] %vm3213_vm9, %v3118_v24  ;;  %3149 = vrot.lane.b32.xlu0 %v3069_v5, %s5105_s14  ;;  %v3488_v24 = vmul.f32 %v6768_v54, %v3264_v20 }
 0x3b3   : > { %v3120_v1 = vpop.permute.xlu1 %3119 }
 0x3b4   : > { %3215 = vst.msk [vmem:[#allocation3 + $0x8] sm:$0xff] %vm3213_vm9, %v3120_v1  ;;  %3151 = vrot.lane.b32.xlu1 %v3070_v57, %s5105_s14  ;;  %v3535_v2 = vpop.permute.xlu0 %3534  ;;  %v3265_v1 = vld [vmem:[#allocation2 + $0xc9] sm:$0xff] }
 0x3b5   : > { %3631 = vst.msk [vmem:[#allocation3] sm:$0xff] %vm3630_vm10, %v3535_v2  ;;  %3566 = vrot.lane.b32.xlu0 %v3486_v47, %s5106_s15  ;;  %v2463_v47 = vmul.f32 %v3264_v20, %v6772_v0  ;;  %v3489_v57 = vmul.f32 %v6775_v21, %v3265_v1  ;;  %v2658_v20 = vld [vmem:[#allocation2 + $0xdf] sm:$0xff] }
 0x3b7   : > { %v2512_v35 = vpop.permute.xlu1 %2511 }
 0x3b8   : > { %2606 = vst.msk [vmem:[#allocation3 + $0x10] sm:$0xff] %vm2603_vm7, %v2512_v35  ;;  %2543 = vrot.lane.b32.xlu1 %v2461_v58, %s5103_s12  ;;  %v3537_v41 = vpop.permute.xlu0 %3536  ;;  %v2464_v58 = vmul.f32 %v3265_v1, %v6779_v48 }
 0x3b9   : > { %3632 = vst.msk [vmem:[#allocation3 + $0x8] sm:$0xff] %vm3630_vm10, %v3537_v41  ;;  %3568 = vrot.lane.b32.xlu0 %v3487_v50, %s5106_s15  ;;  %v2880_v50 = vmul.f32 %v6782_v27, %v2656_v23  ;;  %v2657_v41 = vld [vmem:[#allocation2 + $0xd7] sm:$0xff] }
 0x3bb   : > { %v2514_v56 = vpop.permute.xlu1 %2513 }
 0x3bc   : > { %2607 = vst.msk [vmem:[#allocation3 + $0x18] sm:$0xff] %vm2603_vm7, %v2514_v56  ;;  %2545 = vrot.lane.b32.xlu1 %v2462_v46, %s5103_s12  ;;  %v2929_v39 = vpop.permute.xlu0 %2928  ;;  %v3663_v12 = vld [vmem:[#allocation3] sm:$0xff]  ;;  %v2881_v46 = vmul.f32 %v6787_v13, %v2657_v41  ;;  %v3266_v56 = vld [vmem:[#allocation2 + $0xd1] sm:$0xff] }
 0x3bd   : > { %3023 = vst.msk [vmem:[#allocation3 + $0x10] sm:$0xff] %vm3020_vm8, %v2929_v39  ;;  %2960 = vrot.lane.b32.xlu0 %v2878_v37, %s5104_s13  ;;  %4924 = vmatprep.mubr.msk.f32.mxu1 %vm3707_vm11, %v3663_v12  ;;  %v3490_v39 = vmul.f32 %v6790_v33, %v3266_v56  ;;  %v2660_v41 = vld [vmem:[#allocation2 + $0xef] sm:$0xff] }
 0x3bf   : > { %v2931_v22 = vpop.permute.xlu1 %2930 }
 0x3c0   : > { %3024 = vst.msk [vmem:[#allocation3 + $0x18] sm:$0xff] %vm3020_vm8, %v2931_v22  ;;  %2962 = vrot.lane.b32.xlu1 %v2879_v38, %s5104_s13  ;;  %v3122_v11 = vpop.permute.xlu0 %3121  ;;  %v3664_v10 = vld [vmem:[#allocation3 + $0x8] sm:$0xff]  ;;  %v2465_v38 = vmul.f32 %v3266_v56, %v6795_v25  ;;  %v3267_v22 = vld [vmem:[#allocation2 + $0xd9] sm:$0xff] }
 0x3c1   : > { %3216 = vst.msk [vmem:[#allocation3 + $0x10] sm:$0xff] %vm3213_vm9, %v3122_v11  ;;  %3153 = vrot.lane.b32.xlu0 %v3071_v3, %s5105_s14  ;;  %4925 = vmatmul.mubr.msk.f32.vlgmr.msra.gmra.mrb[16].mxu1 %vm3707_vm11, %v3664_v10  ;;  %v3491_v11 = vmul.f32 %v6798_v7, %v3267_v22  ;;  %v2466_v10 = vmul.f32 %v3267_v22, %v6802_v17  ;;  %v3271_v22 = vld [vmem:[#allocation2 + $0xf9] sm:$0xff] }
 0x3c3   : > { %v3124_v5 = vpop.permute.xlu1 %3123 }
 0x3c4   : > { %3217 = vst.msk [vmem:[#allocation3 + $0x18] sm:$0xff] %vm3213_vm9, %v3124_v5  ;;  %3155 = vrot.lane.b32.xlu1 %v3072_v43, %s5105_s14  ;;  %v3539_v32 = vpop.permute.xlu0 %3538  ;;  %v2659_v43 = vld [vmem:[#allocation2 + $0xe7] sm:$0xff] }
 0x3c5   : > { %3633 = vst.msk [vmem:[#allocation3 + $0x10] sm:$0xff] %vm3630_vm10, %v3539_v32  ;;  %3570 = vrot.lane.b32.xlu0 %v3488_v24, %s5106_s15  ;;  %v2882_v24 = vmul.f32 %v6805_v16, %v2658_v20  ;;  %v2883_v32 = vmul.f32 %v6809_v55, %v2659_v43 }
 0x3c7   : > { %v2516_v2 = vpop.permute.xlu1 %2515 }
 0x3c8   : > { %2608 = vst.msk [vmem:[#allocation3 + $0x20] sm:$0xff] %vm2603_vm7, %v2516_v2  ;;  %2547 = vrot.lane.b32.xlu1 %v2463_v47, %s5103_s12  ;;  %v3541_v54 = vpop.permute.xlu0 %3540  ;;  %v3075_v47 = vld [vmem:[#allocation2 + $0xe0] sm:$0xff] }
 0x3c9   : > { %3634 = vst.msk [vmem:[#allocation3 + $0x18] sm:$0xff] %vm3630_vm10, %v3541_v54  ;;  %3572 = vrot.lane.b32.xlu0 %v3489_v57, %s5106_s15  ;;  %v3268_v57 = vld [vmem:[#allocation2 + $0xe1] sm:$0xff] }
 0x3ca   : > { %v3492_v2 = vmul.f32 %v6812_v4, %v3268_v57  ;;  %v2467_v23 = vmul.f32 %v3268_v57, %v6817_v8  ;;  %v3273_v57 = vld [vmem:[#allocation2 + $0x109] sm:$0xff] }
 0x3cb   : > { %v2518_v35 = vpop.permute.xlu1 %2517 }
 0x3cc   : > { %2609 = vst.msk [vmem:[#allocation3 + $0x28] sm:$0xff] %vm2603_vm7, %v2518_v35  ;;  %2549 = vrot.lane.b32.xlu1 %v2464_v58, %s5103_s12  ;;  %v2933_v0 = vpop.permute.xlu0 %2932  ;;  %v3665_v21 = vld [vmem:[#allocation3 + $0x10] sm:$0xff]  ;;  %v3076_v58 = vld [vmem:[#allocation2 + $0xe8] sm:$0xff] }
 0x3cd   : > { %3025 = vst.msk [vmem:[#allocation3 + $0x20] sm:$0xff] %vm3020_vm8, %v2933_v0  ;;  %2964 = vrot.lane.b32.xlu0 %v2880_v50, %s5104_s13  ;;  %4927 = vmatprep.mubr.msk.f32.mxu1 %vm3707_vm11, %v3665_v21  ;;  %v3269_v50 = vld [vmem:[#allocation2 + $0xe9] sm:$0xff] }
 0x3ce   : > { %v3493_v35 = vmul.f32 %v6820_v59, %v3269_v50  ;;  %v2468_v21 = vmul.f32 %v3269_v50, %v6825_v42 }
 0x3cf   : > { %v2935_v48 = vpop.permute.xlu1 %2934 }
 0x3d0   : > { %3026 = vst.msk [vmem:[#allocation3 + $0x28] sm:$0xff] %vm3020_vm8, %v2935_v48  ;;  %2966 = vrot.lane.b32.xlu1 %v2881_v46, %s5104_s13  ;;  %v3126_v27 = vpop.permute.xlu0 %3125  ;;  %v3666_v37 = vld [vmem:[#allocation3 + $0x18] sm:$0xff]  ;;  %v2884_v46 = vmul.f32 %v6828_v6, %v2660_v41 }
 0x3d1   : > { %3218 = vst.msk [vmem:[#allocation3 + $0x20] sm:$0xff] %vm3213_vm9, %v3126_v27  ;;  %3157 = vrot.lane.b32.xlu0 %v3073_v36, %s5105_s14  ;;  %4928 = vmatmul.mubr.msk.f32.gmra.mrb[18].mxu1 %vm3707_vm11, %v3666_v37  ;;  %v2661_v27 = vld [vmem:[#allocation2 + $0xf7] sm:$0xff] }
 0x3d2   : > { %v2885_v36 = vmul.f32 %v6832_v53, %v2661_v27  ;;  %v3077_v37 = vld [vmem:[#allocation2 + $0xf0] sm:$0xff]  ;;  %v3275_v27 = vld [vmem:[#allocation2 + $0x119] sm:$0xff] }
 0x3d3   : > { %v3128_v12 = vpop.permute.xlu1 %3127  ;;  %v3274_v41 = vld [vmem:[#allocation2 + $0x111] sm:$0xff] }
 0x3d4   : > { %3219 = vst.msk [vmem:[#allocation3 + $0x28] sm:$0xff] %vm3213_vm9, %v3128_v12  ;;  %3159 = vrot.lane.b32.xlu1 %v3074_v19, %s5105_s14  ;;  %v3543_v13 = vpop.permute.xlu0 %3542 }
 0x3d5   : > { %3635 = vst.msk [vmem:[#allocation3 + $0x20] sm:$0xff] %vm3630_vm10, %v3543_v13  ;;  %3574 = vrot.lane.b32.xlu0 %v3490_v39, %s5106_s15  ;;  %v3270_v39 = vld [vmem:[#allocation2 + $0xf1] sm:$0xff] }
 0x3d6   : > { %v3494_v12 = vmul.f32 %v6835_v45, %v3270_v39  ;;  %v3078_v13 = vld [vmem:[#allocation2 + $0xf8] sm:$0xff] }
 0x3d7   : > { %v2520_v3 = vpop.permute.xlu1 %2519 }
 0x3d8   : > { %2610 = vst.msk [vmem:[#allocation3 + $0x30] sm:$0xff] %vm2603_vm7, %v2520_v3  ;;  %2551 = vrot.lane.b32.xlu1 %v2465_v38, %s5103_s12  ;;  %v3545_v33 = vpop.permute.xlu0 %3544  ;;  %v2469_v38 = vmul.f32 %v3270_v39, %v6839_v29 }
 0x3d9   : > { %3636 = vst.msk [vmem:[#allocation3 + $0x28] sm:$0xff] %vm3630_vm10, %v3545_v33  ;;  %3576 = vrot.lane.b32.xlu0 %v3491_v11, %s5106_s15  ;;  %v3495_v11 = vmul.f32 %v6842_v49, %v3271_v22  ;;  %v2470_v33 = vmul.f32 %v3271_v22, %v6847_v26 }
 0x3db   : > { %v2522_v5 = vpop.permute.xlu1 %2521 }
 0x3dc   : > { %2611 = vst.msk [vmem:[#allocation3 + $0x38] sm:$0xff] %vm2603_vm7, %v2522_v5  ;;  %2553 = vrot.lane.b32.xlu1 %v2466_v10, %s5103_s12  ;;  %v2937_v25 = vpop.permute.xlu0 %2936  ;;  %v3667_v7 = vld [vmem:[#allocation3 + $0x20] sm:$0xff] }
 0x3dd   : > { %3027 = vst.msk [vmem:[#allocation3 + $0x30] sm:$0xff] %vm3020_vm8, %v2937_v25  ;;  %2968 = vrot.lane.b32.xlu0 %v2882_v24, %s5104_s13  ;;  %4930 = vmatprep.mubr.msk.f32.mxu1 %vm3707_vm11, %v3667_v7  ;;  %v2662_v10 = vld [vmem:[#allocation2 + $0xff] sm:$0xff]  ;;  %v2663_v5 = vld [vmem:[#allocation2 + $0x107] sm:$0xff] }
 0x3de   : > { %v2886_v20 = vmul.f32 %v6850_v60, %v2662_v10  ;;  %v2887_v25 = vmul.f32 %v6855_v51, %v2663_v5  ;;  %v3079_v7 = vld [vmem:[#allocation2 + $0x100] sm:$0xff] }
 0x3df   : > { %v2939_v17 = vpop.permute.xlu1 %2938 }
 0x3e0   : > { %3028 = vst.msk [vmem:[#allocation3 + $0x38] sm:$0xff] %vm3020_vm8, %v2939_v17  ;;  %2970 = vrot.lane.b32.xlu1 %v2883_v32, %s5104_s13  ;;  %v3130_v16 = vpop.permute.xlu0 %3129  ;;  %v3668_v1 = vld [vmem:[#allocation3 + $0x28] sm:$0xff] }
 0x3e1   : > { %3220 = vst.msk [vmem:[#allocation3 + $0x30] sm:$0xff] %vm3213_vm9, %v3130_v16  ;;  %3161 = vrot.lane.b32.xlu0 %v3075_v47, %s5105_s14  ;;  %4931 = vmatmul.mubr.msk.f32.gmra.mrb[20].mxu1 %vm3707_vm11, %v3668_v1  ;;  %v3272_v32 = vld [vmem:[#allocation2 + $0x101] sm:$0xff] }
 0x3e2   : > { %v3496_v17 = vmul.f32 %v6858_v52, %v3272_v32  ;;  %v3080_v47 = vld [vmem:[#allocation2 + $0x108] sm:$0xff]  ;;  %v2471_v1 = vmul.f32 %v3272_v32, %v6862_v62 }
 0x3e3   : > { %v3132_v54 = vpop.permute.xlu1 %3131 }
 0x3e4   : > { %3221 = vst.msk [vmem:[#allocation3 + $0x38] sm:$0xff] %vm3213_vm9, %v3132_v54  ;;  %3163 = vrot.lane.b32.xlu1 %v3076_v58, %s5105_s14  ;;  %v3547_v55 = vpop.permute.xlu0 %3546  ;;  %v2472_v58 = vmul.f32 %v3273_v57, %v6869_v31 }
 0x3e5   : > { %3637 = vst.msk [vmem:[#allocation3 + $0x30] sm:$0xff] %vm3630_vm10, %v3547_v55  ;;  %3578 = vrot.lane.b32.xlu0 %v3492_v2, %s5106_s15  ;;  %v3497_v2 = vmul.f32 %v6865_v15, %v3273_v57  ;;  %v2664_v55 = vld [vmem:[#allocation2 + $0x10f] sm:$0xff] }
 0x3e7   : > { %v2524_v0 = vpop.permute.xlu1 %2523 }
 0x3e8   : > { %2612 = vst.msk [vmem:[#allocation3 + $0x40] sm:$0xff] %vm2603_vm7, %v2524_v0  ;;  %2555 = vrot.lane.b32.xlu1 %v2467_v23, %s5103_s12  ;;  %v3549_v4 = vpop.permute.xlu0 %3548  ;;  %v2888_v23 = vmul.f32 %v6872_v9, %v2664_v55 }
 0x3e9   : > { %3638 = vst.msk [vmem:[#allocation3 + $0x38] sm:$0xff] %vm3630_vm10, %v3549_v4  ;;  %3580 = vrot.lane.b32.xlu0 %v3493_v35, %s5106_s15  ;;  %v2665_v35 = vld [vmem:[#allocation2 + $0x117] sm:$0xff] }
 0x3ea   : > { %v2889_v0 = vmul.f32 %v6877_v14, %v2665_v35  ;;  %v3081_v4 = vld [vmem:[#allocation2 + $0x110] sm:$0xff] }
 0x3eb   : > { %v2526_v48 = vpop.permute.xlu1 %2525 }
 0x3ec   : > { %2613 = vst.msk [vmem:[#allocation3 + $0x48] sm:$0xff] %vm2603_vm7, %v2526_v48  ;;  %2557 = vrot.lane.b32.xlu1 %v2468_v21, %s5103_s12  ;;  %v2941_v8 = vpop.permute.xlu0 %2940  ;;  %v3669_v59 = vld [vmem:[#allocation3 + $0x30] sm:$0xff] }
 0x3ed   : > { %3029 = vst.msk [vmem:[#allocation3 + $0x40] sm:$0xff] %vm3020_vm8, %v2941_v8  ;;  %2972 = vrot.lane.b32.xlu0 %v2884_v46, %s5104_s13  ;;  %4933 = vmatprep.mubr.msk.f32.mxu1 %vm3707_vm11, %v3669_v59  ;;  %v3498_v46 = vmul.f32 %v6880_v44, %v3274_v41  ;;  %v3082_v8 = vld [vmem:[#allocation2 + $0x118] sm:$0xff]  ;;  %v2473_v59 = vmul.f32 %v3274_v41, %v6885_v63 }
 0x3ee   : > { %v2666_v63 = vld [vmem:[#allocation2 + $0x11f] sm:$0xff] }
 0x3ef   : > { %v2943_v42 = vpop.permute.xlu1 %2942 }
 0x3f0   : > { %3030 = vst.msk [vmem:[#allocation3 + $0x48] sm:$0xff] %vm3020_vm8, %v2943_v42  ;;  %2974 = vrot.lane.b32.xlu1 %v2885_v36, %s5104_s13  ;;  %v3134_v6 = vpop.permute.xlu0 %3133  ;;  %v3670_v56 = vld [vmem:[#allocation3 + $0x38] sm:$0xff]  ;;  %v3499_v36 = vmul.f32 %v6888_v28, %v3275_v27  ;;  %v2890_v28 = vmul.f32 %v6895_v61, %v2666_v63 }
 0x3f1   : > { %3222 = vst.msk [vmem:[#allocation3 + $0x40] sm:$0xff] %vm3213_vm9, %v3134_v6  ;;  %3165 = vrot.lane.b32.xlu0 %v3077_v37, %s5105_s14  ;;  %4934 = vmatmul.mubr.msk.f32.gmra.mrb[22].mxu1 %vm3707_vm11, %v3670_v56  ;;  %v4065_v6 = vld [vmem:[%s7403_s5] sm:$0xf]  ;;  %v2474_v37 = vmul.f32 %v3275_v27, %v6892_v40  ;;  %v2667_v56 = vld [vmem:[#allocation2 + $0x127] sm:$0xff] }
 0x3f2   : > { %4972 = vmatprep.subr.msk.mxu0 %vm3804_vm6, %v4065_v6  ;;  %v2891_v40 = vmul.f32 %v6899_v18, %v2667_v56 }
 0x3f3   : > { %v3136_v19 = vpop.permute.xlu1 %3135  ;;  %4973 = vmatpush3.msk.msra.mxu0 %vm3804_vm6, %v4065_v6 }
 0x3f4   : > { %3223 = vst.msk [vmem:[#allocation3 + $0x48] sm:$0xff] %vm3213_vm9, %v3136_v19  ;;  %3167 = vrot.lane.b32.xlu1 %v3078_v13, %s5105_s14  ;;  %v3551_v53 = vpop.permute.xlu0 %3550  ;;  %v3083_v13 = vld [vmem:[#allocation2 + $0x120] sm:$0xff] }
 0x3f5   : > { %3639 = vst.msk [vmem:[#allocation3 + $0x40] sm:$0xff] %vm3630_vm10, %v3551_v53  ;;  %3582 = vrot.lane.b32.xlu0 %v3494_v12, %s5106_s15  ;;  %v3276_v53 = vld [vmem:[#allocation2 + $0x121] sm:$0xff] }
 0x3f7   : > { %v2528_v3 = vpop.permute.xlu1 %2527 }
 0x3f8   : > { %2614 = vst.msk [vmem:[#allocation3 + $0x50] sm:$0xff] %vm2603_vm7, %v2528_v3  ;;  %2559 = vrot.lane.b32.xlu1 %v2469_v38, %s5103_s12  ;;  %v3553_v45 = vpop.permute.xlu0 %3552  ;;  %v3500_v3 = vmul.f32 %v6902_v30, %v3276_v53 }
 0x3f9   : > { %3640 = vst.msk [vmem:[#allocation3 + $0x48] sm:$0xff] %vm3630_vm10, %v3553_v45  ;;  %3584 = vrot.lane.b32.xlu0 %v3495_v11, %s5106_s15  ;;  %v3084_v11 = vld [vmem:[#allocation2 + $0x128] sm:$0xff] }
 0x3fa   : > { %v3277_v45 = vld [vmem:[#allocation2 + $0x129] sm:$0xff] }
 0x3fb   : > { %v2530_v24 = vpop.permute.xlu1 %2529  ;;  %v3501_v10 = vmul.f32 %v6907_v34, %v3277_v45 }
 0x3fc   : > { %2615 = vst.msk [vmem:[#allocation3 + $0x58] sm:$0xff] %vm2603_vm7, %v2530_v24  ;;  %2561 = vrot.lane.b32.xlu1 %v2470_v33, %s5103_s12  ;;  %v2945_v29 = vpop.permute.xlu0 %2944  ;;  %v3671_v49 = vld [vmem:[#allocation3 + $0x40] sm:$0xff] }
 0x3fd   : > { %3031 = vst.msk [vmem:[#allocation3 + $0x50] sm:$0xff] %vm3020_vm8, %v2945_v29  ;;  %2976 = vrot.lane.b32.xlu0 %v2886_v20, %s5104_s13  ;;  %4936 = vmatprep.mubr.msk.f32.mxu1 %vm3707_vm11, %v3671_v49 }
 0x3ff   : > { %v2947_v26 = vpop.permute.xlu1 %2946 }
 0x400   : > { %3032 = vst.msk [vmem:[#allocation3 + $0x58] sm:$0xff] %vm3020_vm8, %v2947_v26  ;;  %2978 = vrot.lane.b32.xlu1 %v2887_v25, %s5104_s13  ;;  %v3138_v60 = vpop.permute.xlu0 %3137  ;;  %v3672_v43 = vld [vmem:[#allocation3 + $0x48] sm:$0xff] }
 0x401   : > { %3224 = vst.msk [vmem:[#allocation3 + $0x50] sm:$0xff] %vm3213_vm9, %v3138_v60  ;;  %3169 = vrot.lane.b32.xlu0 %v3079_v7, %s5105_s14  ;;  %4937 = vmatmul.mubr.msk.f32.gmra.mrb[24].mxu1 %vm3707_vm11, %v3672_v43 }
 0x403   : > { %v3140_v16 = vpop.permute.xlu1 %3139 }
 0x404   : > { %3225 = vst.msk [vmem:[#allocation3 + $0x58] sm:$0xff] %vm3213_vm9, %v3140_v16  ;;  %3171 = vrot.lane.b32.xlu1 %v3080_v47, %s5105_s14  ;;  %v3555_v51 = vpop.permute.xlu0 %3554 }
 0x405   : > { %3641 = vst.msk [vmem:[#allocation3 + $0x50] sm:$0xff] %vm3630_vm10, %v3555_v51  ;;  %3586 = vrot.lane.b32.xlu0 %v3496_v17, %s5106_s15 }
 0x407   : > { %v2532_v54 = vpop.permute.xlu1 %2531 }
 0x408   : > { %2616 = vst.msk [vmem:[#allocation3 + $0x60] sm:$0xff] %vm2603_vm7, %v2532_v54  ;;  %2563 = vrot.lane.b32.xlu1 %v2471_v1, %s5103_s12  ;;  %v3557_v52 = vpop.permute.xlu0 %3556 }
 0x409   : > { %3642 = vst.msk [vmem:[#allocation3 + $0x58] sm:$0xff] %vm3630_vm10, %v3557_v52  ;;  %3588 = vrot.lane.b32.xlu0 %v3497_v2, %s5106_s15 }
 0x40b   : > { %v2534_v50 = vpop.permute.xlu1 %2533 }
 0x40c   : > { %2617 = vst.msk [vmem:[#allocation3 + $0x68] sm:$0xff] %vm2603_vm7, %v2534_v50  ;;  %2565 = vrot.lane.b32.xlu1 %v2472_v58, %s5103_s12  ;;  %v2949_v62 = vpop.permute.xlu0 %2948  ;;  %v3673_v15 = vld [vmem:[#allocation3 + $0x50] sm:$0xff] }
 0x40d   : > { %3033 = vst.msk [vmem:[#allocation3 + $0x60] sm:$0xff] %vm3020_vm8, %v2949_v62  ;;  %2980 = vrot.lane.b32.xlu0 %v2888_v23, %s5104_s13  ;;  %4939 = vmatprep.mubr.msk.f32.mxu1 %vm3707_vm11, %v3673_v15 }
 0x40f   : > { %v2951_v31 = vpop.permute.xlu1 %2950 }
 0x410   : > { %3034 = vst.msk [vmem:[#allocation3 + $0x68] sm:$0xff] %vm3020_vm8, %v2951_v31  ;;  %2982 = vrot.lane.b32.xlu1 %v2889_v0, %s5104_s13  ;;  %v3142_v9 = vpop.permute.xlu0 %3141  ;;  %v3674_v21 = vld [vmem:[#allocation3 + $0x58] sm:$0xff] }
 0x411   : > { %3226 = vst.msk [vmem:[#allocation3 + $0x60] sm:$0xff] %vm3213_vm9, %v3142_v9  ;;  %3173 = vrot.lane.b32.xlu0 %v3081_v4, %s5105_s14  ;;  %4940 = vmatmul.mubr.msk.f32.gmra.mrb[26].mxu1 %vm3707_vm11, %v3674_v21 }
 0x413   : > { %v3144_v48 = vpop.permute.xlu1 %3143 }
 0x414   : > { %3227 = vst.msk [vmem:[#allocation3 + $0x68] sm:$0xff] %vm3213_vm9, %v3144_v48  ;;  %3175 = vrot.lane.b32.xlu1 %v3082_v8, %s5105_s14  ;;  %v3559_v14 = vpop.permute.xlu0 %3558 }
 0x415   : > { %3643 = vst.msk [vmem:[#allocation3 + $0x60] sm:$0xff] %vm3630_vm10, %v3559_v14  ;;  %3590 = vrot.lane.b32.xlu0 %v3498_v46, %s5106_s15 }
 0x417   : > { %v2536_v42 = vpop.permute.xlu1 %2535 }
 0x418   : > { %2618 = vst.msk [vmem:[#allocation3 + $0x70] sm:$0xff] %vm2603_vm7, %v2536_v42  ;;  %2567 = vrot.lane.b32.xlu1 %v2473_v59, %s5103_s12  ;;  %v3561_v44 = vpop.permute.xlu0 %3560 }
 0x419   : > { %3644 = vst.msk [vmem:[#allocation3 + $0x68] sm:$0xff] %vm3630_vm10, %v3561_v44  ;;  %3592 = vrot.lane.b32.xlu0 %v3499_v36, %s5106_s15 }
 0x41b   : > { %v2538_v39 = vpop.permute.xlu1 %2537 }
 0x41c   : > { %2619 = vst.msk [vmem:[#allocation3 + $0x78] sm:$0xff] %vm2603_vm7, %v2538_v39  ;;  %2569 = vrot.lane.b32.xlu1 %v2474_v37, %s5103_s12  ;;  %v2953_v12 = vpop.permute.xlu0 %2952  ;;  %v3675_v19 = vld [vmem:[#allocation3 + $0x60] sm:$0xff] }
 0x41d   : > { %3035 = vst.msk [vmem:[#allocation3 + $0x70] sm:$0xff] %vm3020_vm8, %v2953_v12  ;;  %2984 = vrot.lane.b32.xlu0 %v2890_v28, %s5104_s13  ;;  %4942 = vmatprep.mubr.msk.f32.mxu1 %vm3707_vm11, %v3675_v19 }
 0x41f   : > { %v2955_v61 = vpop.permute.xlu1 %2954 }
 0x420   : > { %3036 = vst.msk [vmem:[#allocation3 + $0x78] sm:$0xff] %vm3020_vm8, %v2955_v61  ;;  %2986 = vrot.lane.b32.xlu1 %v2891_v40, %s5104_s13  ;;  %v3146_v38 = vpop.permute.xlu0 %3145  ;;  %v3676_v22 = vld [vmem:[#allocation3 + $0x68] sm:$0xff] }
 0x421   : > { %3228 = vst.msk [vmem:[#allocation3 + $0x70] sm:$0xff] %vm3213_vm9, %v3146_v38  ;;  %3177 = vrot.lane.b32.xlu0 %v3083_v13, %s5105_s14  ;;  %4943 = vmatmul.mubr.msk.f32.gmra.mrb[28].mxu1 %vm3707_vm11, %v3676_v22 }
 0x423   : > { %v3148_v18 = vpop.permute.xlu1 %3147 }
 0x424   : > { %3229 = vst.msk [vmem:[#allocation3 + $0x78] sm:$0xff] %vm3213_vm9, %v3148_v18  ;;  %3179 = vrot.lane.b32.xlu1 %v3084_v11, %s5105_s14  ;;  %v3563_v33 = vpop.permute.xlu0 %3562 }
 0x425   : > { %3645 = vst.msk [vmem:[#allocation3 + $0x70] sm:$0xff] %vm3630_vm10, %v3563_v33  ;;  %3594 = vrot.lane.b32.xlu0 %v3500_v3, %s5106_s15 }
 0x427   : > { %v2540_v20 = vpop.permute.xlu1 %2539 }
 0x428   : > { %2620 = vst.msk [vmem:[#allocation3 + $0x80] sm:$0xff] %vm2603_vm7, %v2540_v20  ;;  %3596 = vrot.lane.b32.xlu1 %v3501_v10, %s5106_s15  ;;  %v3565_v24 = vpop.permute.xlu0 %3564 }
 0x429   : > { %3646 = vst.msk [vmem:[#allocation3 + $0x78] sm:$0xff] %vm3630_vm10, %v3565_v24 }
 0x42b   : > { %v2542_v30 = vpop.permute.xlu1 %2541 }
 0x42c   : > { %2621 = vst.msk [vmem:[#allocation3 + $0x88] sm:$0xff] %vm2603_vm7, %v2542_v30  ;;  %v2957_v29 = vpop.permute.xlu0 %2956  ;;  %v3677_v49 = vld [vmem:[#allocation3 + $0x70] sm:$0xff] }
 0x42d   : > { %3037 = vst.msk [vmem:[#allocation3 + $0x80] sm:$0xff] %vm3020_vm8, %v2957_v29  ;;  %4945 = vmatprep.mubr.msk.f32.mxu1 %vm3707_vm11, %v3677_v49  ;;  %v7174_v49 = vld [vmem:[%s7402_s4] ss:$0 sm:$0xff] }
 0x42f   : > { %v2959_v5 = vpop.permute.xlu1 %2958 }
 0x430   : > { %3038 = vst.msk [vmem:[#allocation3 + $0x88] sm:$0xff] %vm3020_vm8, %v2959_v5  ;;  %v3150_v34 = vpop.permute.xlu0 %3149  ;;  %v3678_v25 = vld [vmem:[#allocation3 + $0x78] sm:$0xff] }
 0x431   : > { %3230 = vst.msk [vmem:[#allocation3 + $0x80] sm:$0xff] %vm3213_vm9, %v3150_v34  ;;  %4946 = vmatmul.mubr.msk.f32.gmra.mrb[30].mxu1 %vm3707_vm11, %v3678_v25 }
 0x433   : > { %v3152_v26 = vpop.permute.xlu1 %3151 }
 0x434   : > { %3231 = vst.msk [vmem:[#allocation3 + $0x88] sm:$0xff] %vm3213_vm9, %v3152_v26  ;;  %v3567_v60 = vpop.permute.xlu0 %3566 }
 0x435   : > { %3647 = vst.msk [vmem:[#allocation3 + $0x80] sm:$0xff] %vm3630_vm10, %v3567_v60 }
 0x437   : > { %v2544_v7 = vpop.permute.xlu1 %2543 }
 0x438   : > { %2622 = vst.msk [vmem:[#allocation3 + $0x90] sm:$0xff] %vm2603_vm7, %v2544_v7  ;;  %v3569_v43 = vpop.permute.xlu0 %3568 }
 0x439   : > { %3648 = vst.msk [vmem:[#allocation3 + $0x88] sm:$0xff] %vm3630_vm10, %v3569_v43 }
 0x43b   : > { %v2546_v32 = vpop.permute.xlu1 %2545 }
 0x43c   : > { %2623 = vst.msk [vmem:[#allocation3 + $0x98] sm:$0xff] %vm2603_vm7, %v2546_v32  ;;  %v2961_v17 = vpop.permute.xlu0 %2960  ;;  %v3679_v16 = vld [vmem:[#allocation3 + $0x80] sm:$0xff] }
 0x43d   : > { %3039 = vst.msk [vmem:[#allocation3 + $0x90] sm:$0xff] %vm3020_vm8, %v2961_v17  ;;  %4948 = vmatprep.mubr.msk.f32.mxu1 %vm3707_vm11, %v3679_v16 }
 0x43f   : > { %v2963_v47 = vpop.permute.xlu1 %2962 }
 0x440   : > { %3040 = vst.msk [vmem:[#allocation3 + $0x98] sm:$0xff] %vm3020_vm8, %v2963_v47  ;;  %v3154_v51 = vpop.permute.xlu0 %3153  ;;  %v3680_v1 = vld [vmem:[#allocation3 + $0x88] sm:$0xff] }
 0x441   : > { %3232 = vst.msk [vmem:[#allocation3 + $0x90] sm:$0xff] %vm3213_vm9, %v3154_v51  ;;  %4949 = vmatmul.mubr.msk.f32.gmra.mrb[32].mxu1 %vm3707_vm11, %v3680_v1 }
 0x443   : > { %v3156_v57 = vpop.permute.xlu1 %3155 }
 0x444   : > { %3233 = vst.msk [vmem:[#allocation3 + $0x98] sm:$0xff] %vm3213_vm9, %v3156_v57  ;;  %v3571_v2 = vpop.permute.xlu0 %3570 }
 0x445   : > { %3649 = vst.msk [vmem:[#allocation3 + $0x90] sm:$0xff] %vm3630_vm10, %v3571_v2 }
 0x447   : > { %v2548_v54 = vpop.permute.xlu1 %2547 }
 0x448   : > { %2624 = vst.msk [vmem:[#allocation3 + $0xa0] sm:$0xff] %vm2603_vm7, %v2548_v54  ;;  %v3573_v52 = vpop.permute.xlu0 %3572 }
 0x449   : > { %3650 = vst.msk [vmem:[#allocation3 + $0x98] sm:$0xff] %vm3630_vm10, %v3573_v52 }
 0x44b   : > { %v2550_v58 = vpop.permute.xlu1 %2549 }
 0x44c   : > { %2625 = vst.msk [vmem:[#allocation3 + $0xa8] sm:$0xff] %vm2603_vm7, %v2550_v58  ;;  %v2965_v55 = vpop.permute.xlu0 %2964  ;;  %v3681_v23 = vld [vmem:[#allocation3 + $0x90] sm:$0xff] }
 0x44d   : > { %3041 = vst.msk [vmem:[#allocation3 + $0xa0] sm:$0xff] %vm3020_vm8, %v2965_v55  ;;  %4951 = vmatprep.mubr.msk.f32.mxu1 %vm3707_vm11, %v3681_v23 }
 0x44f   : > { %v2967_v50 = vpop.permute.xlu1 %2966 }
 0x450   : > { %3042 = vst.msk [vmem:[#allocation3 + $0xa8] sm:$0xff] %vm3020_vm8, %v2967_v50  ;;  %v3158_v62 = vpop.permute.xlu0 %3157  ;;  %v3682_v15 = vld [vmem:[#allocation3 + $0x98] sm:$0xff] }
 0x451   : > { %3234 = vst.msk [vmem:[#allocation3 + $0xa0] sm:$0xff] %vm3213_vm9, %v3158_v62  ;;  %4952 = vmatmul.mubr.msk.f32.gmra.mrb[34].mxu1 %vm3707_vm11, %v3682_v15 }
 0x453   : > { %v3160_v35 = vpop.permute.xlu1 %3159 }
 0x454   : > { %3235 = vst.msk [vmem:[#allocation3 + $0xa8] sm:$0xff] %vm3213_vm9, %v3160_v35  ;;  %v3575_v0 = vpop.permute.xlu0 %3574 }
 0x455   : > { %3651 = vst.msk [vmem:[#allocation3 + $0xa0] sm:$0xff] %vm3630_vm10, %v3575_v0 }
 0x457   : > { %v2552_v31 = vpop.permute.xlu1 %2551 }
 0x458   : > { %2626 = vst.msk [vmem:[#allocation3 + $0xb0] sm:$0xff] %vm2603_vm7, %v2552_v31  ;;  %v3577_v9 = vpop.permute.xlu0 %3576 }
 0x459   : > { %3652 = vst.msk [vmem:[#allocation3 + $0xa8] sm:$0xff] %vm3630_vm10, %v3577_v9 }
 0x45b   : > { %v2554_v4 = vpop.permute.xlu1 %2553 }
 0x45c   : > { %2627 = vst.msk [vmem:[#allocation3 + $0xb8] sm:$0xff] %vm2603_vm7, %v2554_v4  ;;  %v2969_v21 = vpop.permute.xlu0 %2968  ;;  %v3683_v41 = vld [vmem:[#allocation3 + $0xa0] sm:$0xff] }
 0x45d   : > { %3043 = vst.msk [vmem:[#allocation3 + $0xb0] sm:$0xff] %vm3020_vm8, %v2969_v21  ;;  %4954 = vmatprep.mubr.msk.f32.mxu1 %vm3707_vm11, %v3683_v41 }
 0x45f   : > { %v2971_v46 = vpop.permute.xlu1 %2970 }
 0x460   : > { %3044 = vst.msk [vmem:[#allocation3 + $0xb8] sm:$0xff] %vm3020_vm8, %v2971_v46  ;;  %v3162_v48 = vpop.permute.xlu0 %3161  ;;  %v3684_v8 = vld [vmem:[#allocation3 + $0xa8] sm:$0xff] }
 0x461   : > { %3236 = vst.msk [vmem:[#allocation3 + $0xb0] sm:$0xff] %vm3213_vm9, %v3162_v48  ;;  %4955 = vmatmul.mubr.msk.f32.gmra.mrb[36].mxu1 %vm3707_vm11, %v3684_v8 }
 0x463   : > { %v3164_v14 = vpop.permute.xlu1 %3163 }
 0x464   : > { %3237 = vst.msk [vmem:[#allocation3 + $0xb8] sm:$0xff] %vm3213_vm9, %v3164_v14  ;;  %v3579_v59 = vpop.permute.xlu0 %3578 }
 0x465   : > { %3653 = vst.msk [vmem:[#allocation3 + $0xb0] sm:$0xff] %vm3630_vm10, %v3579_v59 }
 0x467   : > { %v2556_v27 = vpop.permute.xlu1 %2555 }
 0x468   : > { %2628 = vst.msk [vmem:[#allocation3 + $0xc0] sm:$0xff] %vm2603_vm7, %v2556_v27  ;;  %v3581_v36 = vpop.permute.xlu0 %3580 }
 0x469   : > { %3654 = vst.msk [vmem:[#allocation3 + $0xb8] sm:$0xff] %vm3630_vm10, %v3581_v36 }
 0x46b   : > { %v2558_v42 = vpop.permute.xlu1 %2557 }
 0x46c   : > { %2629 = vst.msk [vmem:[#allocation3 + $0xc8] sm:$0xff] %vm2603_vm7, %v2558_v42  ;;  %v2973_v44 = vpop.permute.xlu0 %2972  ;;  %v3685_v6 = vld [vmem:[#allocation3 + $0xb0] sm:$0xff] }
 0x46d   : > { %3045 = vst.msk [vmem:[#allocation3 + $0xc0] sm:$0xff] %vm3020_vm8, %v2973_v44  ;;  %4957 = vmatprep.mubr.msk.f32.mxu1 %vm3707_vm11, %v3685_v6 }
 0x46f   : > { %v2975_v37 = vpop.permute.xlu1 %2974 }
 0x470   : > { %3046 = vst.msk [vmem:[#allocation3 + $0xc8] sm:$0xff] %vm3020_vm8, %v2975_v37  ;;  %v3166_v63 = vpop.permute.xlu0 %3165  ;;  %v3686_v28 = vld [vmem:[#allocation3 + $0xb8] sm:$0xff] }
 0x471   : > { %3238 = vst.msk [vmem:[#allocation3 + $0xc0] sm:$0xff] %vm3213_vm9, %v3166_v63  ;;  %4958 = vmatmul.mubr.msk.f32.gmra.mrb[38].mxu1 %vm3707_vm11, %v3686_v28 }
 0x473   : > { %v3168_v56 = vpop.permute.xlu1 %3167 }
 0x474   : > { %3239 = vst.msk [vmem:[#allocation3 + $0xc8] sm:$0xff] %vm3213_vm9, %v3168_v56  ;;  %v3583_v39 = vpop.permute.xlu0 %3582 }
 0x475   : > { %3655 = vst.msk [vmem:[#allocation3 + $0xc0] sm:$0xff] %vm3630_vm10, %v3583_v39 }
 0x477   : > { %v2560_v12 = vpop.permute.xlu1 %2559 }
 0x478   : > { %2630 = vst.msk [vmem:[#allocation3 + $0xd0] sm:$0xff] %vm2603_vm7, %v2560_v12  ;;  %v3585_v19 = vpop.permute.xlu0 %3584 }
 0x479   : > { %3656 = vst.msk [vmem:[#allocation3 + $0xc8] sm:$0xff] %vm3630_vm10, %v3585_v19 }
 0x47b   : > { %v2562_v40 = vpop.permute.xlu1 %2561 }
 0x47c   : > { %2631 = vst.msk [vmem:[#allocation3 + $0xd8] sm:$0xff] %vm2603_vm7, %v2562_v40  ;;  %v2977_v13 = vpop.permute.xlu0 %2976  ;;  %v3687_v61 = vld [vmem:[#allocation3 + $0xc0] sm:$0xff] }
 0x47d   : > { %3047 = vst.msk [vmem:[#allocation3 + $0xd0] sm:$0xff] %vm3020_vm8, %v2977_v13  ;;  %4960 = vmatprep.mubr.msk.f32.mxu1 %vm3707_vm11, %v3687_v61 }
 0x47f   : > { %v2979_v53 = vpop.permute.xlu1 %2978 }
 0x480   : > { %3048 = vst.msk [vmem:[#allocation3 + $0xd8] sm:$0xff] %vm3020_vm8, %v2979_v53  ;;  %v3170_v38 = vpop.permute.xlu0 %3169  ;;  %v3688_v22 = vld [vmem:[#allocation3 + $0xc8] sm:$0xff] }
 0x481   : > { %3240 = vst.msk [vmem:[#allocation3 + $0xd0] sm:$0xff] %vm3213_vm9, %v3170_v38  ;;  %4961 = vmatmul.mubr.msk.f32.gmra.mrb[40].mxu1 %vm3707_vm11, %v3688_v22 }
 0x483   : > { %v3172_v11 = vpop.permute.xlu1 %3171 }
 0x484   : > { %3241 = vst.msk [vmem:[#allocation3 + $0xd8] sm:$0xff] %vm3213_vm9, %v3172_v11  ;;  %v3587_v3 = vpop.permute.xlu0 %3586 }
 0x485   : > { %3657 = vst.msk [vmem:[#allocation3 + $0xd0] sm:$0xff] %vm3630_vm10, %v3587_v3 }
 0x487   : > { %v2564_v45 = vpop.permute.xlu1 %2563 }
 0x488   : > { %2632 = vst.msk [vmem:[#allocation3 + $0xe0] sm:$0xff] %vm2603_vm7, %v2564_v45  ;;  %v3589_v18 = vpop.permute.xlu0 %3588 }
 0x489   : > { %3658 = vst.msk [vmem:[#allocation3 + $0xd8] sm:$0xff] %vm3630_vm10, %v3589_v18 }
 0x48b   : > { %v2566_v33 = vpop.permute.xlu1 %2565 }
 0x48c   : > { %2633 = vst.msk [vmem:[#allocation3 + $0xe8] sm:$0xff] %vm2603_vm7, %v2566_v33  ;;  %v2981_v10 = vpop.permute.xlu0 %2980  ;;  %v3689_v20 = vld [vmem:[#allocation3 + $0xd0] sm:$0xff] }
 0x48d   : > { %3049 = vst.msk [vmem:[#allocation3 + $0xe0] sm:$0xff] %vm3020_vm8, %v2981_v10  ;;  %4963 = vmatprep.mubr.msk.f32.mxu1 %vm3707_vm11, %v3689_v20 }
 0x48f   : > { %v2983_v24 = vpop.permute.xlu1 %2982 }
 0x490   : > { %3050 = vst.msk [vmem:[#allocation3 + $0xe8] sm:$0xff] %vm3020_vm8, %v2983_v24  ;;  %v3174_v30 = vpop.permute.xlu0 %3173  ;;  %v3690_v29 = vld [vmem:[#allocation3 + $0xd8] sm:$0xff] }
 0x491   : > { %3242 = vst.msk [vmem:[#allocation3 + $0xe0] sm:$0xff] %vm3213_vm9, %v3174_v30  ;;  %4964 = vmatmul.mubr.msk.f32.gmra.mrb[42].mxu1 %vm3707_vm11, %v3690_v29 }
 0x493   : > { %v3176_v5 = vpop.permute.xlu1 %3175 }
 0x494   : > { %3243 = vst.msk [vmem:[#allocation3 + $0xe8] sm:$0xff] %vm3213_vm9, %v3176_v5  ;;  %v4926_v34 = vpop.f32.mrb[16].mxu1  ;;  %v3591_v25 = vpop.permute.xlu0 %3590 }
 0x495   : > { %v3880_v26 = vadd.f32 %v4926_v34, %v7174_v49  ;;  %3659 = vst.msk [vmem:[#allocation3 + $0xe0] sm:$0xff] %vm3630_vm10, %v3591_v25  ;;  %v3874_v60 = vpop.f32.mrb[17].mxu1 }
 0x496   : > { %v3875_v7 = vadd.f32 %v7174_v49, %v3874_v60 }
 0x497   : > { %v2568_v43 = vpop.permute.xlu1 %2567  ;;  %v4034_v16 = vmax.f32 %v3880_v26, 0.0 }
 0x498   : > { %v4033_v32 = vmax.f32 %v3875_v7, 0.0  ;;  %2634 = vst.msk [vmem:[#allocation3 + $0xf0] sm:$0xff] %vm2603_vm7, %v2568_v43  ;;  %v3593_v17 = vpop.permute.xlu0 %3592 }
 0x499   : > { %3660 = vst.msk [vmem:[#allocation3 + $0xe8] sm:$0xff] %vm3630_vm10, %v3593_v17 }
 0x49a   : > { %4974 = vmatprep.mubr.msk.f32.mxu0 %vm306_vm0, %v4033_v32 }
 0x49b   : > { %v2570_v47 = vpop.permute.xlu1 %2569  ;;  %4975 = vmatmul.mubr.msk.f32.vlgmr.msra.gmra.mrb[16].mxu0 %vm306_vm0, %v4034_v16 }
 0x49c   : > { %2635 = vst.msk [vmem:[#allocation3 + $0xf8] sm:$0xff] %vm2603_vm7, %v2570_v47  ;;  %v2985_v51 = vpop.permute.xlu0 %2984  ;;  %v3691_v1 = vld [vmem:[#allocation3 + $0xe0] sm:$0xff] }
 0x49d   : > { %3051 = vst.msk [vmem:[#allocation3 + $0xf0] sm:$0xff] %vm3020_vm8, %v2985_v51  ;;  %4966 = vmatprep.mubr.msk.f32.mxu1 %vm3707_vm11, %v3691_v1 }
 0x49f   : > { %v2987_v57 = vpop.permute.xlu1 %2986 }
 0x4a0   : > { %3052 = vst.msk [vmem:[#allocation3 + $0xf8] sm:$0xff] %vm3020_vm8, %v2987_v57  ;;  %v3178_v2 = vpop.permute.xlu0 %3177  ;;  %v3692_v54 = vld [vmem:[#allocation3 + $0xe8] sm:$0xff] }
 0x4a1   : > { %3244 = vst.msk [vmem:[#allocation3 + $0xf0] sm:$0xff] %vm3213_vm9, %v3178_v2  ;;  %4967 = vmatmul.mubr.msk.f32.gmra.mrb[44].mxu1 %vm3707_vm11, %v3692_v54 }
 0x4a3   : > { %v3180_v52 = vpop.permute.xlu1 %3179 }
 0x4a4   : > { %3245 = vst.msk [vmem:[#allocation3 + $0xf8] sm:$0xff] %vm3213_vm9, %v3180_v52  ;;  %v3595_v58 = vpop.permute.xlu0 %3594  ;;  %v4929_v55 = vpop.f32.mrb[18].mxu1 }
 0x4a5   : > { %3661 = vst.msk [vmem:[#allocation3 + $0xf0] sm:$0xff] %vm3630_vm10, %v3595_v58  ;;  %v3890_v23 = vadd.f32 %v4929_v55, %v7174_v49  ;;  %v3884_v50 = vpop.f32.mrb[19].mxu1 }
 0x4a6   : > { %v3885_v62 = vadd.f32 %v7174_v49, %v3884_v50 }
 0x4a7   : > { %v3597_v15 = vpop.permute.xlu1 %3596  ;;  %v4036_v0 = vmax.f32 %v3890_v23, 0.0 }
 0x4a8   : > { %v4035_v35 = vmax.f32 %v3885_v62, 0.0  ;;  %3662 = vst.msk [vmem:[#allocation3 + $0xf8] sm:$0xff] %vm3630_vm10, %v3597_v15 }
 0x4aa   : > { %4977 = vmatprep.mubr.msk.f32.mxu0 %vm306_vm0, %v4035_v35 }
 0x4ab   : > { %4978 = vmatmul.mubr.msk.f32.gmra.mrb[18].mxu0 %vm306_vm0, %v4036_v0 }
 0x4ac   : > { %v3693_v31 = vld [vmem:[#allocation3 + $0xf0] sm:$0xff] }
 0x4ad   : > { %4969 = vmatprep.mubr.msk.f32.mxu1 %vm3707_vm11, %v3693_v31 }
 0x4af   : > { %v3694_v9 = vld [vmem:[#allocation3 + $0xf8] sm:$0xff] }
 0x4b0   : > { %4970 = vmatmul.mubr.msk.f32.gmra.mrb[46].mxu1 %vm3707_vm11, %v3694_v9 }
 0x4b4   : > { %v4932_v4 = vpop.f32.mrb[20].mxu1 }
 0x4b5   : > { %v3900_v21 = vadd.f32 %v4932_v4, %v7174_v49  ;;  %v3894_v41 = vpop.f32.mrb[21].mxu1 }
 0x4b6   : > { %v3895_v46 = vadd.f32 %v7174_v49, %v3894_v41 }
 0x4b7   : > { %v4038_v8 = vmax.f32 %v3900_v21, 0.0 }
 0x4b8   : > { %v4037_v48 = vmax.f32 %v3895_v46, 0.0 }
 0x4ba   : > { %4980 = vmatprep.mubr.msk.f32.mxu0 %vm306_vm0, %v4037_v48 }
 0x4bb   : > { %4981 = vmatmul.mubr.msk.f32.gmra.mrb[20].mxu0 %vm306_vm0, %v4038_v8 }
 0x4c4   : > { %v4935_v14 = vpop.f32.mrb[22].mxu1 }
 0x4c5   : > { %v3910_v59 = vadd.f32 %v4935_v14, %v7174_v49  ;;  %v3904_v27 = vpop.f32.mrb[23].mxu1 }
 0x4c6   : > { %v3905_v36 = vadd.f32 %v7174_v49, %v3904_v27 }
 0x4c7   : > { %v4040_v44 = vmax.f32 %v3910_v59, 0.0 }
 0x4c8   : > { %v4039_v42 = vmax.f32 %v3905_v36, 0.0  ;;  %v7250_v36 = vld [vmem:[%s7404_s6] ss:$0 sm:$0xff] }
 0x4ca   : > { %4983 = vmatprep.mubr.msk.f32.mxu0 %vm306_vm0, %v4039_v42 }
 0x4cb   : > { %4984 = vmatmul.mubr.msk.f32.gmra.mrb[22].mxu0 %vm306_vm0, %v4040_v44 }
 0x4d4   : > { %v4938_v6 = vpop.f32.mrb[24].mxu1 }
 0x4d5   : > { %v3920_v37 = vadd.f32 %v4938_v6, %v7174_v49  ;;  %v3914_v63 = vpop.f32.mrb[25].mxu1 }
 0x4d6   : > { %v3915_v28 = vadd.f32 %v7174_v49, %v3914_v63  ;;  %v5057_v63 = vld [vmem:[%s5202_s22 + $0x8] sm:$0xff] }
 0x4d7   : > { %v4042_v39 = vmax.f32 %v3920_v37, 0.0 }
 0x4d8   : > { %v4041_v56 = vmax.f32 %v3915_v28, 0.0 }
 0x4da   : > { %4986 = vmatprep.mubr.msk.f32.mxu0 %vm306_vm0, %v4041_v56  ;;  %v5058_v56 = vld [vmem:[%s5202_s22] sm:$0xff] }
 0x4db   : > { %4987 = vmatmul.mubr.msk.f32.gmra.mrb[24].mxu0 %vm306_vm0, %v4042_v39 }
 0x4e4   : > { %v4941_v12 = vpop.f32.mrb[26].mxu1 }
 0x4e5   : > { %v3930_v19 = vadd.f32 %v4941_v12, %v7174_v49  ;;  %v3924_v40 = vpop.f32.mrb[27].mxu1 }
 0x4e6   : > { %v3925_v13 = vadd.f32 %v7174_v49, %v3924_v40 }
 0x4e7   : > { %v4044_v53 = vmax.f32 %v3930_v19, 0.0 }
 0x4e8   : > { %v4043_v61 = vmax.f32 %v3925_v13, 0.0 }
 0x4ea   : > { %4989 = vmatprep.mubr.msk.f32.mxu0 %vm306_vm0, %v4043_v61 }
 0x4eb   : > { %4990 = vmatmul.mubr.msk.f32.gmra.mrb[26].mxu0 %vm306_vm0, %v4044_v53 }
 0x4f4   : > { %v4944_v38 = vpop.f32.mrb[28].mxu1 }
 0x4f5   : > { %v3940_v22 = vadd.f32 %v4944_v38, %v7174_v49  ;;  %v3934_v11 = vpop.f32.mrb[29].mxu1 }
 0x4f6   : > { %v3935_v3 = vadd.f32 %v7174_v49, %v3934_v11 }
 0x4f7   : > { %v4046_v18 = vmax.f32 %v3940_v22, 0.0 }
 0x4f8   : > { %v4045_v45 = vmax.f32 %v3935_v3, 0.0 }
 0x4fa   : > { %4992 = vmatprep.mubr.msk.f32.mxu0 %vm306_vm0, %v4045_v45 }
 0x4fb   : > { %4993 = vmatmul.mubr.msk.f32.gmra.mrb[28].mxu0 %vm306_vm0, %v4046_v18 }
 0x504   : > { %v4947_v33 = vpop.f32.mrb[30].mxu1 }
 0x505   : > { %v3950_v10 = vadd.f32 %v4947_v33, %v7174_v49  ;;  %v3944_v20 = vpop.f32.mrb[31].mxu1  ;;  %v5059_v33 = vld [vmem:[%s5202_s22 + $0x18] sm:$0xff] }
 0x506   : > { %v3945_v24 = vadd.f32 %v7174_v49, %v3944_v20  ;;  %v5060_v20 = vld [vmem:[%s5202_s22 + $0x10] sm:$0xff] }
 0x507   : > { %v4048_v29 = vmax.f32 %v3950_v10, 0.0 }
 0x508   : > { %v4047_v30 = vmax.f32 %v3945_v24, 0.0 }
 0x50a   : > { %4995 = vmatprep.mubr.msk.f32.mxu0 %vm306_vm0, %v4047_v30 }
 0x50b   : > { %4996 = vmatmul.mubr.msk.f32.gmra.mrb[30].mxu0 %vm306_vm0, %v4048_v29 }
 0x514   : > { %v4950_v5 = vpop.f32.mrb[32].mxu1 }
 0x515   : > { %v3960_v34 = vadd.f32 %v4950_v5, %v7174_v49  ;;  %v3954_v25 = vpop.f32.mrb[33].mxu1 }
 0x516   : > { %v3955_v26 = vadd.f32 %v7174_v49, %v3954_v25 }
 0x517   : > { %v4050_v7 = vmax.f32 %v3960_v34, 0.0 }
 0x518   : > { %v4049_v60 = vmax.f32 %v3955_v26, 0.0 }
 0x51a   : > { %4998 = vmatprep.mubr.msk.f32.mxu0 %vm306_vm0, %v4049_v60 }
 0x51b   : > { %4999 = vmatmul.mubr.msk.f32.gmra.mrb[32].mxu0 %vm306_vm0, %v4050_v7 }
 0x524   : > { %v4953_v43 = vpop.f32.mrb[34].mxu1 }
 0x525   : > { %v3970_v32 = vadd.f32 %v4953_v43, %v7174_v49  ;;  %v3964_v17 = vpop.f32.mrb[35].mxu1 }
 0x526   : > { %v3965_v16 = vadd.f32 %v7174_v49, %v3964_v17 }
 0x527   : > { %v4052_v51 = vmax.f32 %v3970_v32, 0.0 }
 0x528   : > { %v4051_v47 = vmax.f32 %v3965_v16, 0.0 }
 0x52a   : > { %5001 = vmatprep.mubr.msk.f32.mxu0 %vm306_vm0, %v4051_v47  ;;  %v5061_v47 = vld [vmem:[%s5202_s22 + $0x28] sm:$0xff] }
 0x52b   : > { %5002 = vmatmul.mubr.msk.f32.gmra.mrb[34].mxu0 %vm306_vm0, %v4052_v51  ;;  %v5062_v51 = vld [vmem:[%s5202_s22 + $0x20] sm:$0xff] }
 0x534   : > { %v4956_v1 = vpop.f32.mrb[36].mxu1 }
 0x535   : > { %v3980_v57 = vadd.f32 %v4956_v1, %v7174_v49  ;;  %v3974_v2 = vpop.f32.mrb[37].mxu1 }
 0x536   : > { %v3975_v54 = vadd.f32 %v7174_v49, %v3974_v2 }
 0x537   : > { %v4054_v58 = vmax.f32 %v3980_v57, 0.0 }
 0x538   : > { %v4053_v52 = vmax.f32 %v3975_v54, 0.0 }
 0x53a   : > { %5004 = vmatprep.mubr.msk.f32.mxu0 %vm306_vm0, %v4053_v52 }
 0x53b   : > { %5005 = vmatmul.mubr.msk.f32.gmra.mrb[36].mxu0 %vm306_vm0, %v4054_v58 }
 0x544   : > { %v4959_v55 = vpop.f32.mrb[38].mxu1 }
 0x545   : > { %v3990_v23 = vadd.f32 %v4959_v55, %v7174_v49  ;;  %v3984_v50 = vpop.f32.mrb[39].mxu1 }
 0x546   : > { %v3985_v62 = vadd.f32 %v7174_v49, %v3984_v50 }
 0x547   : > { %v4056_v35 = vmax.f32 %v3990_v23, 0.0  ;;  %v5063_v23 = vld [vmem:[%s5202_s22 + $0x38] sm:$0xff] }
 0x548   : > { %v4055_v15 = vmax.f32 %v3985_v62, 0.0  ;;  %v5064_v62 = vld [vmem:[%s5202_s22 + $0x30] sm:$0xff] }
 0x54a   : > { %5007 = vmatprep.mubr.msk.f32.mxu0 %vm306_vm0, %v4055_v15 }
 0x54b   : > { %5008 = vmatmul.mubr.msk.f32.gmra.mrb[38].mxu0 %vm306_vm0, %v4056_v35 }
 0x554   : > { %v4962_v0 = vpop.f32.mrb[40].mxu1 }
 0x555   : > { %v4000_v31 = vadd.f32 %v4962_v0, %v7174_v49  ;;  %v3994_v9 = vpop.f32.mrb[41].mxu1 }
 0x556   : > { %v3995_v4 = vadd.f32 %v7174_v49, %v3994_v9 }
 0x557   : > { %v4058_v41 = vmax.f32 %v4000_v31, 0.0 }
 0x558   : > { %v4057_v21 = vmax.f32 %v3995_v4, 0.0 }
 0x55a   : > { %5010 = vmatprep.mubr.msk.f32.mxu0 %vm306_vm0, %v4057_v21 }
 0x55b   : > { %5011 = vmatmul.mubr.msk.f32.gmra.mrb[40].mxu0 %vm306_vm0, %v4058_v41  ;;  %v5065_v41 = vld [vmem:[%s5202_s22 + $0x48] sm:$0xff] }
 0x564   : > { %v4965_v46 = vpop.f32.mrb[42].mxu1 }
 0x565   : > { %v4010_v48 = vadd.f32 %v4965_v46, %v7174_v49  ;;  %v4004_v8 = vpop.f32.mrb[43].mxu1 }
 0x566   : > { %v4005_v14 = vadd.f32 %v7174_v49, %v4004_v8 }
 0x567   : > { %v4060_v27 = vmax.f32 %v4010_v48, 0.0  ;;  %v5066_v48 = vld [vmem:[%s5202_s22 + $0x40] sm:$0xff] }
 0x568   : > { %v4059_v59 = vmax.f32 %v4005_v14, 0.0 }
 0x56a   : > { %5013 = vmatprep.mubr.msk.f32.mxu0 %vm306_vm0, %v4059_v59 }
 0x56b   : > { %5014 = vmatmul.mubr.msk.f32.gmra.mrb[42].mxu0 %vm306_vm0, %v4060_v27 }
 0x56e   : > { %v4976_v42 = vpop.f32.mrb[16].mxu0 }
 0x56f   : > { %v4244_v44 = vadd.f32 %v4976_v42, %v7250_v36  ;;  %v4238_v6 = vpop.f32.mrb[17].mxu0 }
 0x570   : > { %v4239_v37 = vadd.f32 %v7250_v36, %v4238_v6 }
 0x571   : > { %v4398_v28 = vadd.f32 %v5057_v63, %v4244_v44 }
 0x572   : > { %v4397_v39 = vadd.f32 %v5058_v56, %v4239_v37  ;;  %v5067_v37 = vld [vmem:[%s5202_s22 + $0x58] sm:$0xff] }
 0x573   : > { %v4430_v12 = vmax.f32 %v4398_v28, 0.0  ;;  %v5068_v28 = vld [vmem:[%s5202_s22 + $0x50] sm:$0xff] }
 0x574   : > { %v4429_v19 = vmax.f32 %v4397_v39, 0.0  ;;  %v4968_v40 = vpop.f32.mrb[44].mxu1 }
 0x575   : > { %4462 = vst.msk [vmem:[%s7260_s16 + $0x8] sm:$0xff] %vm356_vm1, %v4430_v12  ;;  %v4020_v13 = vadd.f32 %v4968_v40, %v7174_v49  ;;  %v4014_v61 = vpop.f32.mrb[45].mxu1 }
 0x576   : > { %4461 = vst.msk [vmem:[%s7260_s16] sm:$0xff] %vm356_vm1, %v4429_v19  ;;  %v4015_v53 = vadd.f32 %v7174_v49, %v4014_v61 }
 0x577   : > { %v4062_v22 = vmax.f32 %v4020_v13, 0.0 }
 0x578   : > { %v4061_v38 = vmax.f32 %v4015_v53, 0.0  ;;  %v5069_v53 = vld [vmem:[%s5202_s22 + $0x68] sm:$0xff] }
 0x57a   : > { %5016 = vmatprep.mubr.msk.f32.mxu0 %vm306_vm0, %v4061_v38 }
 0x57b   : > { %5017 = vmatmul.mubr.msk.f32.gmra.mrb[44].mxu0 %vm306_vm0, %v4062_v22  ;;  %v5070_v22 = vld [vmem:[%s5202_s22 + $0x60] sm:$0xff] }
 0x57e   : > { %v4979_v11 = vpop.f32.mrb[18].mxu0 }
 0x57f   : > { %v4254_v3 = vadd.f32 %v4979_v11, %v7250_v36  ;;  %v4248_v45 = vpop.f32.mrb[19].mxu0 }
 0x580   : > { %v4249_v18 = vadd.f32 %v7250_v36, %v4248_v45 }
 0x581   : > { %v4400_v10 = vadd.f32 %v5059_v33, %v4254_v3 }
 0x582   : > { %v4399_v24 = vadd.f32 %v5060_v20, %v4249_v18 }
 0x583   : > { %v4432_v30 = vmax.f32 %v4400_v10, 0.0  ;;  %v4971_v29 = vpop.f32.mrb[46].mxu1 }
 0x584   : > { %v4431_v5 = vmax.f32 %v4399_v24, 0.0  ;;  %v4030_v34 = vadd.f32 %v4971_v29, %v7174_v49  ;;  %v4024_v25 = vpop.f32.mrb[47].mxu1  ;;  %v5071_v24 = vld [vmem:[%s5202_s22 + $0x78] sm:$0xff]  ;;  %v5072_v29 = vld [vmem:[%s5202_s22 + $0x70] sm:$0xff] }
 0x585   : > { %4464 = vst.msk [vmem:[%s7260_s16 + $0x18] sm:$0xff] %vm356_vm1, %v4432_v30  ;;  %v4025_v26 = vadd.f32 %v7174_v49, %v4024_v25 }
 0x586   : > { %4463 = vst.msk [vmem:[%s7260_s16 + $0x10] sm:$0xff] %vm356_vm1, %v4431_v5  ;;  %v4064_v7 = vmax.f32 %v4030_v34, 0.0 }
 0x587   : > { %v4063_v60 = vmax.f32 %v4025_v26, 0.0 }
 0x589   : > { %5019 = vmatprep.mubr.msk.f32.mxu0 %vm306_vm0, %v4063_v60 }
 0x58a   : > { %5020 = vmatmul.mubr.msk.f32.gmra.mrb[46].mxu0 %vm306_vm0, %v4064_v7 }
 0x58e   : > { %v4982_v43 = vpop.f32.mrb[20].mxu0 }
 0x58f   : > { %v4264_v32 = vadd.f32 %v4982_v43, %v7250_v36  ;;  %v4258_v17 = vpop.f32.mrb[21].mxu0 }
 0x590   : > { %v4259_v16 = vadd.f32 %v7250_v36, %v4258_v17 }
 0x591   : > { %v4402_v49 = vadd.f32 %v5061_v47, %v4264_v32  ;;  %v5073_v32 = vld [vmem:[%s5202_s22 + $0x88] sm:$0xff] }
 0x592   : > { %v4401_v1 = vadd.f32 %v5062_v51, %v4259_v16  ;;  %v5074_v16 = vld [vmem:[%s5202_s22 + $0x80] sm:$0xff] }
 0x593   : > { %v4434_v57 = vmax.f32 %v4402_v49, 0.0 }
 0x594   : > { %v4433_v2 = vmax.f32 %v4401_v1, 0.0 }
 0x595   : > { %4466 = vst.msk [vmem:[%s7260_s16 + $0x28] sm:$0xff] %vm356_vm1, %v4434_v57 }
 0x596   : > { %4465 = vst.msk [vmem:[%s7260_s16 + $0x20] sm:$0xff] %vm356_vm1, %v4433_v2 }
 0x59e   : > { %v4985_v54 = vpop.f32.mrb[22].mxu0 }
 0x59f   : > { %v4274_v52 = vadd.f32 %v4985_v54, %v7250_v36  ;;  %v4268_v58 = vpop.f32.mrb[23].mxu0 }
 0x5a0   : > { %v4269_v55 = vadd.f32 %v7250_v36, %v4268_v58 }
 0x5a1   : > { %v4404_v50 = vadd.f32 %v5063_v23, %v4274_v52  ;;  %v5075_v52 = vld [vmem:[%s5202_s22 + $0x98] sm:$0xff] }
 0x5a2   : > { %v4403_v15 = vadd.f32 %v5064_v62, %v4269_v55  ;;  %v5076_v55 = vld [vmem:[%s5202_s22 + $0x90] sm:$0xff] }
 0x5a3   : > { %v4436_v35 = vmax.f32 %v4404_v50, 0.0 }
 0x5a4   : > { %v4435_v0 = vmax.f32 %v4403_v15, 0.0 }
 0x5a5   : > { %4468 = vst.msk [vmem:[%s7260_s16 + $0x38] sm:$0xff] %vm356_vm1, %v4436_v35 }
 0x5a6   : > { %4467 = vst.msk [vmem:[%s7260_s16 + $0x30] sm:$0xff] %vm356_vm1, %v4435_v0 }
 0x5ae   : > { %v4988_v31 = vpop.f32.mrb[24].mxu0 }
 0x5af   : > { %v4284_v9 = vadd.f32 %v4988_v31, %v7250_v36  ;;  %v4278_v4 = vpop.f32.mrb[25].mxu0 }
 0x5b0   : > { %v4279_v21 = vadd.f32 %v7250_v36, %v4278_v4 }
 0x5b1   : > { %v4406_v46 = vadd.f32 %v5065_v41, %v4284_v9  ;;  %v5077_v9 = vld [vmem:[%s5202_s22 + $0xa8] sm:$0xff] }
 0x5b2   : > { %v4405_v8 = vadd.f32 %v5066_v48, %v4279_v21  ;;  %v5078_v21 = vld [vmem:[%s5202_s22 + $0xa0] sm:$0xff] }
 0x5b3   : > { %v4438_v14 = vmax.f32 %v4406_v46, 0.0 }
 0x5b4   : > { %v4437_v59 = vmax.f32 %v4405_v8, 0.0 }
 0x5b5   : > { %4470 = vst.msk [vmem:[%s7260_s16 + $0x48] sm:$0xff] %vm356_vm1, %v4438_v14 }
 0x5b6   : > { %4469 = vst.msk [vmem:[%s7260_s16 + $0x40] sm:$0xff] %vm356_vm1, %v4437_v59 }
 0x5be   : > { %v4991_v27 = vpop.f32.mrb[26].mxu0 }
 0x5bf   : > { %v4294_v42 = vadd.f32 %v4991_v27, %v7250_v36  ;;  %v4288_v44 = vpop.f32.mrb[27].mxu0 }
 0x5c0   : > { %v4289_v6 = vadd.f32 %v7250_v36, %v4288_v44 }
 0x5c1   : > { %v4408_v63 = vadd.f32 %v5067_v37, %v4294_v42  ;;  %v5079_v42 = vld [vmem:[%s5202_s22 + $0xb8] sm:$0xff] }
 0x5c2   : > { %v4407_v56 = vadd.f32 %v5068_v28, %v4289_v6  ;;  %v5080_v6 = vld [vmem:[%s5202_s22 + $0xb0] sm:$0xff] }
 0x5c3   : > { %v4440_v39 = vmax.f32 %v4408_v63, 0.0 }
 0x5c4   : > { %v4439_v12 = vmax.f32 %v4407_v56, 0.0 }
 0x5c5   : > { %4472 = vst.msk [vmem:[%s7260_s16 + $0x58] sm:$0xff] %vm356_vm1, %v4440_v39 }
 0x5c6   : > { %4471 = vst.msk [vmem:[%s7260_s16 + $0x50] sm:$0xff] %vm356_vm1, %v4439_v12 }
 0x5ce   : > { %v4994_v19 = vpop.f32.mrb[28].mxu0 }
 0x5cf   : > { %v4304_v40 = vadd.f32 %v4994_v19, %v7250_v36  ;;  %v4298_v13 = vpop.f32.mrb[29].mxu0 }
 0x5d0   : > { %v4299_v61 = vadd.f32 %v7250_v36, %v4298_v13 }
 0x5d1   : > { %v4410_v38 = vadd.f32 %v5069_v53, %v4304_v40  ;;  %v5081_v40 = vld [vmem:[%s5202_s22 + $0xc8] sm:$0xff] }
 0x5d2   : > { %v4409_v11 = vadd.f32 %v5070_v22, %v4299_v61  ;;  %v5082_v61 = vld [vmem:[%s5202_s22 + $0xc0] sm:$0xff] }
 0x5d3   : > { %v4442_v3 = vmax.f32 %v4410_v38, 0.0 }
 0x5d4   : > { %v4441_v45 = vmax.f32 %v4409_v11, 0.0 }
 0x5d5   : > { %4474 = vst.msk [vmem:[%s7260_s16 + $0x68] sm:$0xff] %vm356_vm1, %v4442_v3 }
 0x5d6   : > { %4473 = vst.msk [vmem:[%s7260_s16 + $0x60] sm:$0xff] %vm356_vm1, %v4441_v45 }
 0x5de   : > { %v4997_v18 = vpop.f32.mrb[30].mxu0 }
 0x5df   : > { %v4314_v33 = vadd.f32 %v4997_v18, %v7250_v36  ;;  %v4308_v10 = vpop.f32.mrb[31].mxu0 }
 0x5e0   : > { %v4309_v20 = vadd.f32 %v7250_v36, %v4308_v10 }
 0x5e1   : > { %v4412_v30 = vadd.f32 %v5071_v24, %v4314_v33  ;;  %v5083_v33 = vld [vmem:[%s5202_s22 + $0xd8] sm:$0xff] }
 0x5e2   : > { %v4411_v5 = vadd.f32 %v5072_v29, %v4309_v20  ;;  %v5084_v20 = vld [vmem:[%s5202_s22 + $0xd0] sm:$0xff] }
 0x5e3   : > { %v4444_v34 = vmax.f32 %v4412_v30, 0.0 }
 0x5e4   : > { %v4443_v25 = vmax.f32 %v4411_v5, 0.0 }
 0x5e5   : > { %4476 = vst.msk [vmem:[%s7260_s16 + $0x78] sm:$0xff] %vm356_vm1, %v4444_v34 }
 0x5e6   : > { %4475 = vst.msk [vmem:[%s7260_s16 + $0x70] sm:$0xff] %vm356_vm1, %v4443_v25 }
 0x5ee   : > { %v5000_v26 = vpop.f32.mrb[32].mxu0 }
 0x5ef   : > { %v4324_v60 = vadd.f32 %v5000_v26, %v7250_v36  ;;  %v4318_v7 = vpop.f32.mrb[33].mxu0 }
 0x5f0   : > { %v4319_v43 = vadd.f32 %v7250_v36, %v4318_v7 }
 0x5f1   : > { %v4414_v17 = vadd.f32 %v5073_v32, %v4324_v60  ;;  %v5085_v60 = vld [vmem:[%s5202_s22 + $0xe8] sm:$0xff] }
 0x5f2   : > { %v4413_v47 = vadd.f32 %v5074_v16, %v4319_v43  ;;  %v5086_v43 = vld [vmem:[%s5202_s22 + $0xe0] sm:$0xff] }
 0x5f3   : > { %v4446_v49 = vmax.f32 %v4414_v17, 0.0 }
 0x5f4   : > { %v4445_v51 = vmax.f32 %v4413_v47, 0.0 }
 0x5f5   : > { %4478 = vst.msk [vmem:[%s7260_s16 + $0x88] sm:$0xff] %vm356_vm1, %v4446_v49 }
 0x5f6   : > { %4477 = vst.msk [vmem:[%s7260_s16 + $0x80] sm:$0xff] %vm356_vm1, %v4445_v51 }
 0x5fe   : > { %v5003_v1 = vpop.f32.mrb[34].mxu0 }
 0x5ff   : > { %v4334_v57 = vadd.f32 %v5003_v1, %v7250_v36  ;;  %v4328_v2 = vpop.f32.mrb[35].mxu0 }
 0x600   : > { %v4329_v54 = vadd.f32 %v7250_v36, %v4328_v2 }
 0x601   : > { %v4416_v58 = vadd.f32 %v5075_v52, %v4334_v57  ;;  %v5087_v57 = vld [vmem:[%s5202_s22 + $0xf8] sm:$0xff] }
 0x602   : > { %v4415_v23 = vadd.f32 %v5076_v55, %v4329_v54  ;;  %v5088_v54 = vld [vmem:[%s5202_s22 + $0xf0] sm:$0xff] }
 0x603   : > { %v4448_v50 = vmax.f32 %v4416_v58, 0.0 }
 0x604   : > { %v4447_v62 = vmax.f32 %v4415_v23, 0.0 }
 0x605   : > { %4480 = vst.msk [vmem:[%s7260_s16 + $0x98] sm:$0xff] %vm356_vm1, %v4448_v50 }
 0x606   : > { %4479 = vst.msk [vmem:[%s7260_s16 + $0x90] sm:$0xff] %vm356_vm1, %v4447_v62 }
 0x60e   : > { %v5006_v15 = vpop.f32.mrb[36].mxu0 }
 0x60f   : > { %v4344_v35 = vadd.f32 %v5006_v15, %v7250_v36  ;;  %v4338_v0 = vpop.f32.mrb[37].mxu0 }
 0x610   : > { %v4339_v31 = vadd.f32 %v7250_v36, %v4338_v0 }
 0x611   : > { %v4418_v4 = vadd.f32 %v5077_v9, %v4344_v35 }
 0x612   : > { %v4417_v41 = vadd.f32 %v5078_v21, %v4339_v31 }
 0x613   : > { %v4450_v46 = vmax.f32 %v4418_v4, 0.0 }
 0x614   : > { %v4449_v48 = vmax.f32 %v4417_v41, 0.0 }
 0x615   : > { %4482 = vst.msk [vmem:[%s7260_s16 + $0xa8] sm:$0xff] %vm356_vm1, %v4450_v46 }
 0x616   : > { %4481 = vst.msk [vmem:[%s7260_s16 + $0xa0] sm:$0xff] %vm356_vm1, %v4449_v48 }
 0x61e   : > { %v5009_v8 = vpop.f32.mrb[38].mxu0 }
 0x61f   : > { %v4354_v14 = vadd.f32 %v5009_v8, %v7250_v36  ;;  %v4348_v59 = vpop.f32.mrb[39].mxu0 }
 0x620   : > { %v4349_v27 = vadd.f32 %v7250_v36, %v4348_v59 }
 0x621   : > { %v4420_v44 = vadd.f32 %v5079_v42, %v4354_v14 }
 0x622   : > { %v4419_v37 = vadd.f32 %v5080_v6, %v4349_v27 }
 0x623   : > { %v4452_v63 = vmax.f32 %v4420_v44, 0.0 }
 0x624   : > { %v4451_v28 = vmax.f32 %v4419_v37, 0.0 }
 0x625   : > { %4484 = vst.msk [vmem:[%s7260_s16 + $0xb8] sm:$0xff] %vm356_vm1, %v4452_v63 }
 0x626   : > { %4483 = vst.msk [vmem:[%s7260_s16 + $0xb0] sm:$0xff] %vm356_vm1, %v4451_v28 }
 0x62e   : > { %v5012_v56 = vpop.f32.mrb[40].mxu0 }
 0x62f   : > { %v4364_v39 = vadd.f32 %v5012_v56, %v7250_v36  ;;  %v4358_v12 = vpop.f32.mrb[41].mxu0 }
 0x630   : > { %v4359_v19 = vadd.f32 %v7250_v36, %v4358_v12 }
 0x631   : > { %v4422_v13 = vadd.f32 %v5081_v40, %v4364_v39 }
 0x632   : > { %v4421_v53 = vadd.f32 %v5082_v61, %v4359_v19 }
 0x633   : > { %v4454_v38 = vmax.f32 %v4422_v13, 0.0 }
 0x634   : > { %v4453_v22 = vmax.f32 %v4421_v53, 0.0 }
 0x635   : > { %4486 = vst.msk [vmem:[%s7260_s16 + $0xc8] sm:$0xff] %vm356_vm1, %v4454_v38 }
 0x636   : > { %4485 = vst.msk [vmem:[%s7260_s16 + $0xc0] sm:$0xff] %vm356_vm1, %v4453_v22 }
 0x63e   : > { %v5015_v11 = vpop.f32.mrb[42].mxu0 }
 0x63f   : > { %v4374_v3 = vadd.f32 %v5015_v11, %v7250_v36  ;;  %v4368_v45 = vpop.f32.mrb[43].mxu0 }
 0x640   : > { %v4369_v18 = vadd.f32 %v7250_v36, %v4368_v45 }
 0x641   : > { %v4424_v10 = vadd.f32 %v5083_v33, %v4374_v3 }
 0x642   : > { %v4423_v24 = vadd.f32 %v5084_v20, %v4369_v18 }
 0x643   : > { %v4456_v30 = vmax.f32 %v4424_v10, 0.0 }
 0x644   : > { %v4455_v29 = vmax.f32 %v4423_v24, 0.0 }
 0x645   : > { %4488 = vst.msk [vmem:[%s7260_s16 + $0xd8] sm:$0xff] %vm356_vm1, %v4456_v30 }
 0x646   : > { %4487 = vst.msk [vmem:[%s7260_s16 + $0xd0] sm:$0xff] %vm356_vm1, %v4455_v29 }
 0x64e   : > { %v5018_v5 = vpop.f32.mrb[44].mxu0 }
 0x64f   : > { %v4384_v34 = vadd.f32 %v5018_v5, %v7250_v36  ;;  %v4378_v25 = vpop.f32.mrb[45].mxu0 }
 0x650   : > { %v4379_v26 = vadd.f32 %v7250_v36, %v4378_v25 }
 0x651   : > { %v4426_v7 = vadd.f32 %v5085_v60, %v4384_v34 }
 0x652   : > { %v4425_v32 = vadd.f32 %v5086_v43, %v4379_v26 }
 0x653   : > { %v4458_v17 = vmax.f32 %v4426_v7, 0.0 }
 0x654   : > { %v4457_v16 = vmax.f32 %v4425_v32, 0.0 }
 0x655   : > { %4490 = vst.msk [vmem:[%s7260_s16 + $0xe8] sm:$0xff] %vm356_vm1, %v4458_v17 }
 0x656   : > { %4489 = vst.msk [vmem:[%s7260_s16 + $0xe0] sm:$0xff] %vm356_vm1, %v4457_v16 }
 0x65d   : > { %v5021_v47 = vpop.f32.mrb[46].mxu0 }
 0x65e   : > { %v4394_v49 = vadd.f32 %v5021_v47, %v7250_v36  ;;  %v4388_v51 = vpop.f32.mrb[47].mxu0 }
 0x65f   : > { %v4389_v1 = vadd.f32 %v7250_v36, %v4388_v51 }
 0x660   : > { %v4428_v2 = vadd.f32 %v5087_v57, %v4394_v49 }
 0x661   : > { %v4427_v52 = vadd.f32 %v5088_v54, %v4389_v1 }
 0x662   : > { %v4460_v58 = vmax.f32 %v4428_v2, 0.0 }
 0x663   : > { %v4459_v55 = vmax.f32 %v4427_v52, 0.0 }
 0x664   : > { %4492 = vst.msk [vmem:[%s7260_s16 + $0xf8] sm:$0xff] %vm356_vm1, %v4460_v58 }
 0x665   : > { %4491 = vst.msk [vmem:[%s7260_s16 + $0xf0] sm:$0xff] %vm356_vm1, %v4459_v55 }
 0x666 PF: > { %s18_s27 = sadd.s32 1, %s5095_s27  }
 0x667   : > { %p15_p4 = scmp.ge.s32.totalorder %s18_s27, 4  }
 0x669   :  { %17 = sbr.rel (!%p15_p4) target bundleno = 1 (0x1), region = 83 }

</bundles_post_ra>
